<compile_context>
chip_gen: v7x
topology: tpu7x:2x2x1
jax: 0.10.0
libtpu: 0.0.40
codegen_flags: <defaults>
</compile_context>

<pallas_src>
import functools

import jax
import jax.numpy as jnp
from jax.experimental import pallas as pl
from jax.experimental.pallas import tpu as pltpu


# ---------------------------------------------------------------------------
# Tiling helpers
# ---------------------------------------------------------------------------
_TM, _TN, _TK = 256, 256, 512     # GEMM tile targets (fit all TPU generations)
_BN_TM = 512                      # BatchNorm M-tile target


def _round_up(x, m):
    return (x + m - 1) // m * m


def _pick_tile(dim, base, target):
    """Return (padded_dim, tile). Small dims: pad to `base`, full-extent tile.
    Large dims: pad to a multiple of `target`, tile by `target`."""
    if dim <= target:
        p = _round_up(dim, base)
        return p, p
    return _round_up(dim, target), target


# ---------------------------------------------------------------------------
# Pallas kernels
# ---------------------------------------------------------------------------
def _gemm_kernel(x_ref, w_ref, b_ref, o_ref, acc_ref, *, in_act, out_act):
    """One (g, i, j, k) grid step of out[g] = out_act(in_act(x[g]) @ w[g] + b[g])."""
    k = pl.program_id(3)

    @pl.when(k == 0)
    def _init():
        acc_ref[...] = jnp.zeros_like(acc_ref)

    x = x_ref[0]                                   # [tm, tk] bf16
    if in_act == "lrelu":                          # LeakyReLU(0.2) on conv input
        x = jnp.where(x > 0, x, 0.2 * x)
    elif in_act == "relu":                         # ReLU on conv-transpose input
        x = jnp.maximum(x, 0)
    acc_ref[...] += jnp.dot(x, w_ref[0], preferred_element_type=jnp.float32)

    @pl.when(k == pl.num_programs(3) - 1)
    def _finalize():
        y = acc_ref[...] + b_ref[0]
        if out_act == "tanh":
            y = jnp.tanh(y)
        o_ref[0] = y.astype(o_ref.dtype)


def _bn_stats_kernel(y_ref, s_ref):
    """Accumulate per-channel [sum; sum_sq] over M tiles into resident (2, C)."""
    @pl.when(pl.program_id(0) == 0)
    def _init():
        s_ref[...] = jnp.zeros_like(s_ref)

    y = y_ref[...]
    s_ref[...] += jnp.concatenate(
        [jnp.sum(y, axis=0, keepdims=True),
         jnp.sum(y * y, axis=0, keepdims=True)], axis=0)


def _bn_norm_kernel(y_ref, s_ref, g_ref, b_ref, o_ref, *, inv_m):
    """Normalize one M tile using the precomputed sums (biased var, eps=1e-5)."""
    s = s_ref[...]                                   # [2, C]
    mean = s[0:1, :] * inv_m
    var = jnp.maximum(s[1:2, :] * inv_m - mean * mean, 0.0)
    scale = g_ref[...] * jax.lax.rsqrt(var + 1e-5)
    shift = b_ref[...] - mean * scale
    o_ref[...] = y_ref[...] * scale + shift


# ---------------------------------------------------------------------------
# Pallas wrappers
# ---------------------------------------------------------------------------
def pallas_gemm(x, w, b, true_n, *, in_act=None, out_act=None):
    """Batched tiled GEMM on the MXU.

    x: [G, M, K]   (cast to bf16, M/K padded here)
    w: [G, Kp, Np] bf16 (pre-padded at parameter init)
    b: [G, 1, Np]  f32
    Returns f32 [G, M, true_n].
    """
    g, m, k = x.shape
    kp, tk = _pick_tile(k, 128, _TK)
    np_, tn = _pick_tile(true_n, 128, _TN)
    assert (g, kp, np_) == w.shape and (g, 1, np_) == b.shape
    mp, tm = _pick_tile(m, 16, _TM)

    xb = x.astype(jnp.bfloat16)
    if (mp, kp) != (m, k):
        xb = jnp.pad(xb, ((0, 0), (0, mp - m), (0, kp - k)))

    grid = (g, mp // tm, np_ // tn, kp // tk)
    out = pl.pallas_call(
        functools.partial(_gemm_kernel, in_act=in_act, out_act=out_act),
        out_shape=jax.ShapeDtypeStruct((g, mp, np_), jnp.float32),
        grid=grid,
        in_specs=[
            pl.BlockSpec((1, tm, tk), lambda gi, i, j, kk: (gi, i, kk)),
            pl.BlockSpec((1, tk, tn), lambda gi, i, j, kk: (gi, kk, j)),
            pl.BlockSpec((1, 1, tn), lambda gi, i, j, kk: (gi, 0, j)),
        ],
        out_specs=pl.BlockSpec((1, tm, tn), lambda gi, i, j, kk: (gi, i, j)),
        scratch_shapes=[pltpu.VMEM((tm, tn), jnp.float32)],
        compiler_params=pltpu.CompilerParams(
            dimension_semantics=("parallel", "parallel", "parallel", "arbitrary")),
        cost_estimate=pl.CostEstimate(
            flops=2 * g * mp * np_ * kp,
            transcendentals=(g * mp * np_) if out_act == "tanh" else 0,
            bytes_accessed=(g * mp * kp * 2 + g * kp * np_ * 2
                            + g * np_ * 4 + g * mp * np_ * 4)),
    )(xb, w, b)
    return out[:, :m, :true_n]


def pallas_batchnorm(y2d, gamma, beta):
    """BatchNorm2d (training-mode batch stats) on flattened [M, C] (NHWC channels)."""
    m, c = y2d.shape
    mp, tm = _pick_tile(m, 8, _BN_TM)
    yp = jnp.pad(y2d, ((0, mp - m), (0, 0))) if mp != m else y2d
    n_tiles = mp // tm

    stats = pl.pallas_call(
        _bn_stats_kernel,
        out_shape=jax.ShapeDtypeStruct((2, c), jnp.float32),
        grid=(n_tiles,),
        in_specs=[pl.BlockSpec((tm, c), lambda i: (i, 0))],
        out_specs=pl.BlockSpec((2, c), lambda i: (0, 0)),
        compiler_params=pltpu.CompilerParams(dimension_semantics=("arbitrary",)),
        cost_estimate=pl.CostEstimate(flops=3 * mp * c, transcendentals=0,
                                      bytes_accessed=mp * c * 4 + 2 * c * 4),
    )(yp)

    out = pl.pallas_call(
        functools.partial(_bn_norm_kernel, inv_m=1.0 / m),
        out_shape=jax.ShapeDtypeStruct((mp, c), jnp.float32),
        grid=(n_tiles,),
        in_specs=[
            pl.BlockSpec((tm, c), lambda i: (i, 0)),
            pl.BlockSpec((2, c), lambda i: (0, 0)),
            pl.BlockSpec((1, c), lambda i: (0, 0)),
            pl.BlockSpec((1, c), lambda i: (0, 0)),
        ],
        out_specs=pl.BlockSpec((tm, c), lambda i: (i, 0)),
        compiler_params=pltpu.CompilerParams(dimension_semantics=("parallel",)),
        cost_estimate=pl.CostEstimate(flops=4 * mp * c, transcendentals=0,
                                      bytes_accessed=2 * mp * c * 4 + 4 * c * 4),
    )(yp, stats, gamma, beta)
    return out[:m]


# ---------------------------------------------------------------------------
# Conv / ConvTranspose / BatchNorm layer wrappers (JAX glue around kernels)
# ---------------------------------------------------------------------------
def _im2col_s2(x, k=4, s=2, p=1):
    """x: [N,H,W,C] -> patches [1, N*Ho*Wo, k*k*C] ordered (kh, kw, cin)."""
    n, h, w, c = x.shape
    xp = jnp.pad(x, ((0, 0), (p, p), (p, p), (0, 0)))
    ho = (h + 2 * p - k) // s + 1
    wo = (w + 2 * p - k) // s + 1
    cols = []
    for kh in range(k):
        for kw in range(k):
            cols.append(xp[:, kh:kh + s * (ho - 1) + 1:s,
                           kw:kw + s * (wo - 1) + 1:s, :])
    patches = jnp.concatenate(cols, axis=-1)
    return patches.reshape(1, n * ho * wo, k * k * c), (n, ho, wo)


def conv4x4_s2(x, wp, bp, cout, *, in_act):
    """nn.Conv2d(k=4, s=2, p=1, bias=False) as a tiled im2col GEMM."""
    patches, (n, ho, wo) = _im2col_s2(x.astype(jnp.bfloat16))
    y = pallas_gemm(patches, wp, bp, cout, in_act=in_act)
    return y[0].reshape(n, ho, wo, cout)


def convT4x4_s2(x, wp, bp, cout, *, in_act, out_act=None):
    """nn.ConvTranspose2d(k=4, s=2, p=1) via the sub-pixel decomposition:
    4 independent 2x2 stride-1 convs (one per output parity) batched as G=4
    in a single tiled GEMM. No zero-dilated input is formed."""
    n, h, w, c = x.shape
    xb = x.astype(jnp.bfloat16)
    xpad = jnp.pad(xb, ((0, 0), (1, 1), (1, 1), (0, 0)))
    pats = []
    for dy in (0, 1):
        for dx in (0, 1):
            cols = []
            for r in (0, 1):
                for cc in (0, 1):
                    cols.append(xpad[:, dy + r:dy + r + h, dx + cc:dx + cc + w, :])
            pats.append(jnp.concatenate(cols, axis=-1).reshape(n * h * w, 4 * c))
    patches = jnp.stack(pats, axis=0)                      # [4, N*H*W, 4*Cin]
    y = pallas_gemm(patches, wp, bp, cout, in_act=in_act, out_act=out_act)
    # y[(dy,dx)] -> interleave parities into the (2H, 2W) output.
    y = y.reshape(2, 2, n, h, w, cout).transpose(2, 3, 0, 4, 1, 5)
    return y.reshape(n, 2 * h, 2 * w, cout)


def batchnorm(x, gamma, beta):
    n, h, w, c = x.shape
    y = pallas_batchnorm(x.reshape(n * h * w, c), gamma, beta)
    return y.reshape(n, h, w, c)


# ---------------------------------------------------------------------------
# Parameters (weight transforms hoisted to init, stored padded + bf16)
# ---------------------------------------------------------------------------
def _make_conv_gemm_weight(w_oihw):
    """Conv2d weight [Cout,Cin,4,4] -> ([1,Kp,Np] bf16, [1,1,Np] f32, cout)."""
    cout, cin = w_oihw.shape[0], w_oihw.shape[1]
    k = 16 * cin
    kp, _ = _pick_tile(k, 128, _TK)
    np_, _ = _pick_tile(cout, 128, _TN)
    wm = jnp.transpose(w_oihw, (2, 3, 1, 0)).reshape(k, cout)   # (kh,kw,ci) x co
    wm = jnp.pad(wm, ((0, kp - k), (0, np_ - cout))).astype(jnp.bfloat16)[None]
    b = jnp.zeros((1, 1, np_), jnp.float32)
    return wm, b, cout


def _make_convT_gemm_weights(wt, bias):
    """ConvTranspose2d weight [Cin,Cout,4,4] -> per-parity GEMM weights
    ([4,Kp,Np] bf16, [4,1,Np] f32, cout).  Parity (dy,dx) tap (r,c) uses
    W[:, :, 3-dy-2r, 3-dx-2c]."""
    cin, cout = wt.shape[0], wt.shape[1]
    k = 4 * cin
    kp, _ = _pick_tile(k, 128, _TK)
    np_, _ = _pick_tile(cout, 128, _TN)
    mats = []
    for dy in (0, 1):
        for dx in (0, 1):
            taps = jnp.stack(
                [jnp.stack([wt[:, :, 3 - dy - 2 * r, 3 - dx - 2 * c]
                            for c in (0, 1)], axis=0)
                 for r in (0, 1)], axis=0)                  # [r, c, Cin, Cout]
            mats.append(jnp.pad(taps.reshape(k, cout),
                                ((0, kp - k), (0, np_ - cout))))
    w_all = jnp.stack(mats, axis=0).astype(jnp.bfloat16)    # [4, Kp, Np]
    bvec = bias if bias is not None else jnp.zeros((cout,), jnp.float32)
    b_all = jnp.tile(jnp.pad(bvec, (0, np_ - cout)).reshape(1, 1, np_), (4, 1, 1))
    return w_all, b_all, cout


def init_block(key, outer_nc, inner_nc, input_nc=None, submodule=None,
               outermost=False, innermost=False):
    if input_nc is None:
        input_nc = outer_nc
    k_down, k_up, k_upb = jax.random.split(key, 3)
    p = {"outermost": outermost, "innermost": innermost, "sub": submodule}

    down_w = 0.02 * jax.random.normal(k_down, (inner_nc, input_nc, 4, 4),
                                      jnp.float32)
    p["down_w"], p["down_b"], p["down_cout"] = _make_conv_gemm_weight(down_w)
    if not (outermost or innermost):
        p["down_bn_g"] = jnp.ones((1, inner_nc), jnp.float32)
        p["down_bn_b"] = jnp.zeros((1, inner_nc), jnp.float32)

    up_in = inner_nc if innermost else inner_nc * 2
    up_w = 0.02 * jax.random.normal(k_up, (up_in, outer_nc, 4, 4), jnp.float32)
    up_bias = (0.02 * jax.random.normal(k_upb, (outer_nc,), jnp.float32)
               if outermost else None)
    p["up_w"], p["up_b"], p["up_cout"] = _make_convT_gemm_weights(up_w, up_bias)
    if not outermost:
        p["up_bn_g"] = jnp.ones((1, outer_nc), jnp.float32)
        p["up_bn_b"] = jnp.zeros((1, outer_nc), jnp.float32)
    return p


def init_unet_generator(key, input_nc, output_nc, num_downs, ngf=64):
    keys = iter(jax.random.split(key, num_downs + 1))
    blk = init_block(next(keys), ngf * 8, ngf * 8, innermost=True)
    for _ in range(num_downs - 5):
        blk = init_block(next(keys), ngf * 8, ngf * 8, submodule=blk)
    blk = init_block(next(keys), ngf * 4, ngf * 8, submodule=blk)
    blk = init_block(next(keys), ngf * 2, ngf * 4, submodule=blk)
    blk = init_block(next(keys), ngf, ngf * 2, submodule=blk)
    blk = init_block(next(keys), output_nc, ngf, input_nc=input_nc,
                     submodule=blk, outermost=True)
    return blk


# ---------------------------------------------------------------------------
# Forward (matches UnetSkipConnectionBlock.forward / UnetGenerator.forward)
# ---------------------------------------------------------------------------
def block_forward(p, x):
    """x: NHWC. Returns NHWC."""
    if p["outermost"]:
        h = conv4x4_s2(x, p["down_w"], p["down_b"], p["down_cout"], in_act=None)
        h = block_forward(p["sub"], h)
        return convT4x4_s2(h, p["up_w"], p["up_b"], p["up_cout"],
                           in_act="relu", out_act="tanh")
    elif p["innermost"]:
        h = conv4x4_s2(x, p["down_w"], p["down_b"], p["down_cout"], in_act="lrelu")
        y = convT4x4_s2(h, p["up_w"], p["up_b"], p["up_cout"], in_act="relu")
        y = batchnorm(y, p["up_bn_g"], p["up_bn_b"])
        return jnp.concatenate([x, y], axis=-1)
    else:
        h = conv4x4_s2(x, p["down_w"], p["down_b"], p["down_cout"], in_act="lrelu")
        h = batchnorm(h, p["down_bn_g"], p["down_bn_b"])
        h = block_forward(p["sub"], h)
        y = convT4x4_s2(h, p["up_w"], p["up_b"], p["up_cout"], in_act="relu")
        y = batchnorm(y, p["up_bn_g"], p["up_bn_b"])
        return jnp.concatenate([x, y], axis=-1)


def unet_generator_forward(params, x_nchw):
    x = jnp.transpose(x_nchw, (0, 2, 3, 1))      # NCHW -> NHWC
    y = block_forward(params, x)
    return jnp.transpose(y, (0, 3, 1, 2))        # NHWC -> NCHW


# ---------------------------------------------------------------------------
if __name__ == "__main__":
    key = jax.random.PRNGKey(0)
    k_param, k_input = jax.random.split(key)

    input_nc, output_nc, num_downs, ngf = 3, 3, 5, 8
    batch, spatial = 2, 32                       # 5 downs: 32 -> 1 at bottleneck

    params = init_unet_generator(k_param, input_nc, output_nc, num_downs, ngf)
    x = jax.random.normal(k_input, (batch, input_nc, spatial, spatial),
                          jnp.float32)

    fwd = jax.jit(lambda inp: unet_generator_forward(params, inp))
    out = fwd(x)
    jax.block_until_ready(out)
    assert out.shape == (batch, output_nc, spatial, spatial), out.shape
    assert bool(jnp.all(jnp.isfinite(out)))
    print("KERNEL_OK")
</pallas_src>

<mosaic_0001>
module attributes {stable_mosaic.version = 11 : i64} {
  func.func @_gemm_kernel(%arg0: i32, %arg1: i32, %arg2: i32, %arg3: i32, %arg4: memref<1x256x128xbf16, #tpu.memory_space<vmem>>, %arg5: memref<1x128x128xbf16, #tpu.memory_space<vmem>>, %arg6: memref<1x1x128xf32, #tpu.memory_space<vmem>>, %arg7: memref<1x256x128xf32, #tpu.memory_space<vmem>>, %arg8: memref<256x128xf32, #tpu.memory_space<vmem>>) attributes {dimension_semantics = [#tpu.dimension_semantics<parallel>, #tpu.dimension_semantics<parallel>, #tpu.dimension_semantics<parallel>, #tpu.dimension_semantics<arbitrary>], iteration_bounds = array<i64: 1, 2, 1, 1>, scalar_prefetch = 0 : i64, scratch_operands = 1 : i64, tpu.core_type = #tpu.core_type<tc>, window_params = [{transform_indices = @transform_0, window_bounds = array<i64: 1, 256, 128>}, {transform_indices = @transform_1, window_bounds = array<i64: 1, 128, 128>}, {transform_indices = @transform_2, window_bounds = array<i64: 1, 1, 128>}, {transform_indices = @transform_3, window_bounds = array<i64: 1, 256, 128>}]} {
    %c0_i32 = arith.constant 0 : i32
    %0 = arith.cmpi eq, %arg3, %c0_i32 : i32
    %1 = arith.extui %0 : i1 to i32
    %c0_i32_0 = arith.constant 0 : i32
    %2 = arith.cmpi ne, %1, %c0_i32_0 : i32
    scf.if %2 {
      %cst_12 = arith.constant 0.000000e+00 : f32
      %14 = vector.broadcast %cst_12 : f32 to vector<256x128xf32>
      %c0_13 = arith.constant 0 : index
      %c0_14 = arith.constant 0 : index
      %15 = vector.load %arg8[%c0_13, %c0_14] : memref<256x128xf32, #tpu.memory_space<vmem>>, vector<256x128xf32>
      tpu.vector_store %arg8[%c0_13, %c0_14], %14 {strides = array<i32>} : memref<256x128xf32, #tpu.memory_space<vmem>>, vector<256x128xf32>,
    } else {
    }
    %c0 = arith.constant 0 : index
    %c0_1 = arith.constant 0 : index
    %c0_2 = arith.constant 0 : index
    %3 = vector.load %arg4[%c0, %c0_1, %c0_2] : memref<1x256x128xbf16, #tpu.memory_space<vmem>>, vector<1x256x128xbf16>
    %4 = vector.shape_cast %3 : vector<1x256x128xbf16> to vector<256x128xbf16>
    %c0_3 = arith.constant 0 : index
    %c0_4 = arith.constant 0 : index
    %5 = vector.load %arg8[%c0_3, %c0_4] : memref<256x128xf32, #tpu.memory_space<vmem>>, vector<256x128xf32>
    %c0_5 = arith.constant 0 : index
    %c0_6 = arith.constant 0 : index
    %c0_7 = arith.constant 0 : index
    %6 = vector.load %arg5[%c0_5, %c0_6, %c0_7] : memref<1x128x128xbf16, #tpu.memory_space<vmem>>, vector<1x128x128xbf16>
    %7 = vector.shape_cast %6 : vector<1x128x128xbf16> to vector<128x128xbf16>
    %cst = arith.constant dense<0.000000e+00> : vector<256x128xf32>
    %8 = tpu.matmul %4, %7, %cst {dimension_numbers = #tpu.dot_dimension_numbers<[1], [0], [0], [1], [0, 0, 1, 1], [], []>} : vector<256x128xbf16>, vector<128x128xbf16>, vector<256x128xf32> -> vector<256x128xf32>
    %9 = arith.addf %5, %8 : vector<256x128xf32>
    %c0_8 = arith.constant 0 : index
    %c0_9 = arith.constant 0 : index
    %10 = vector.load %arg8[%c0_8, %c0_9] : memref<256x128xf32, #tpu.memory_space<vmem>>, vector<256x128xf32>
    tpu.vector_store %arg8[%c0_8, %c0_9], %9 {strides = array<i32>} : memref<256x128xf32, #tpu.memory_space<vmem>>, vector<256x128xf32>,
    %c0_i32_10 = arith.constant 0 : i32
    %11 = arith.cmpi eq, %arg3, %c0_i32_10 : i32
    %12 = arith.extui %11 : i1 to i32
    %c0_i32_11 = arith.constant 0 : i32
    %13 = arith.cmpi ne, %12, %c0_i32_11 : i32
    scf.if %13 {
      %c0_12 = arith.constant 0 : index
      %c0_13 = arith.constant 0 : index
      %14 = vector.load %arg8[%c0_12, %c0_13] : memref<256x128xf32, #tpu.memory_space<vmem>>, vector<256x128xf32>
      %c0_14 = arith.constant 0 : index
      %c0_15 = arith.constant 0 : index
      %c0_16 = arith.constant 0 : index
      %15 = vector.load %arg6[%c0_14, %c0_15, %c0_16] : memref<1x1x128xf32, #tpu.memory_space<vmem>>, vector<1x1x128xf32>
      %16 = vector.shape_cast %15 : vector<1x1x128xf32> to vector<1x128xf32>
      %17 = vector.broadcast %16 : vector<1x128xf32> to vector<256x128xf32>
      %18 = arith.addf %14, %17 : vector<256x128xf32>
      %c0_17 = arith.constant 0 : index
      %c0_18 = arith.constant 0 : index
      %c0_19 = arith.constant 0 : index
      %19 = vector.load %arg7[%c0_17, %c0_18, %c0_19] : memref<1x256x128xf32, #tpu.memory_space<vmem>>, vector<1x256x128xf32>
      %20 = vector.shape_cast %19 : vector<1x256x128xf32> to vector<256x128xf32>
      %21 = vector.shape_cast %18 : vector<256x128xf32> to vector<1x256x128xf32>
      tpu.vector_store %arg7[%c0_17, %c0_18, %c0_19], %21 {strides = array<i32>} : memref<1x256x128xf32, #tpu.memory_space<vmem>>, vector<1x256x128xf32>,
    } else {
    }
    return
  }
  func.func @transform_0(%arg0: i32, %arg1: i32, %arg2: i32, %arg3: i32) -> (i32, i32, i32) {
    %c0_i32 = arith.constant 0 : i32
    return %arg0, %arg1, %arg3 : i32, i32, i32
  }
  func.func @transform_1(%arg0: i32, %arg1: i32, %arg2: i32, %arg3: i32) -> (i32, i32, i32) {
    %c0_i32 = arith.constant 0 : i32
    return %arg0, %arg3, %arg2 : i32, i32, i32
  }
  func.func @transform_2(%arg0: i32, %arg1: i32, %arg2: i32, %arg3: i32) -> (i32, i32, i32) {
    %c0_i32 = arith.constant 0 : i32
    %c0_i32_0 = arith.constant 0 : i32
    return %arg0, %c0_i32, %arg2 : i32, i32, i32
  }
  func.func @transform_3(%arg0: i32, %arg1: i32, %arg2: i32, %arg3: i32) -> (i32, i32, i32) {
    %c0_i32 = arith.constant 0 : i32
    return %arg0, %arg1, %arg2 : i32, i32, i32
  }
}

module attributes {stable_mosaic.version = 11 : i64} {
  func.func @_gemm_kernel(%arg0: i32, %arg1: i32, %arg2: i32, %arg3: i32, %arg4: memref<1x128x128xbf16, #tpu.memory_space<vmem>>, %arg5: memref<1x128x128xbf16, #tpu.memory_space<vmem>>, %arg6: memref<1x1x128xf32, #tpu.memory_space<vmem>>, %arg7: memref<1x128x128xf32, #tpu.memory_space<vmem>>, %arg8: memref<128x128xf32, #tpu.memory_space<vmem>>) attributes {dimension_semantics = [#tpu.dimension_semantics<parallel>, #tpu.dimension_semantics<parallel>, #tpu.dimension_semantics<parallel>, #tpu.dimension_semantics<arbitrary>], iteration_bounds = array<i64: 1, 1, 1, 1>, scalar_prefetch = 0 : i64, scratch_operands = 1 : i64, tpu.core_type = #tpu.core_type<tc>, window_params = [{transform_indices = @transform_0, window_bounds = array<i64: 1, 128, 128>}, {transform_indices = @transform_1, window_bounds = array<i64: 1, 128, 128>}, {transform_indices = @transform_2, window_bounds = array<i64: 1, 1, 128>}, {transform_indices = @transform_3, window_bounds = array<i64: 1, 128, 128>}]} {
    %c0_i32 = arith.constant 0 : i32
    %0 = arith.cmpi eq, %arg3, %c0_i32 : i32
    %1 = arith.extui %0 : i1 to i32
    %c0_i32_0 = arith.constant 0 : i32
    %2 = arith.cmpi ne, %1, %c0_i32_0 : i32
    scf.if %2 {
      %cst_14 = arith.constant 0.000000e+00 : f32
      %19 = vector.broadcast %cst_14 : f32 to vector<128x128xf32>
      %c0_15 = arith.constant 0 : index
      %c0_16 = arith.constant 0 : index
      %20 = vector.load %arg8[%c0_15, %c0_16] : memref<128x128xf32, #tpu.memory_space<vmem>>, vector<128x128xf32>
      tpu.vector_store %arg8[%c0_15, %c0_16], %19 {strides = array<i32>} : memref<128x128xf32, #tpu.memory_space<vmem>>, vector<128x128xf32>,
    } else {
    }
    %c0 = arith.constant 0 : index
    %c0_1 = arith.constant 0 : index
    %c0_2 = arith.constant 0 : index
    %3 = vector.load %arg4[%c0, %c0_1, %c0_2] : memref<1x128x128xbf16, #tpu.memory_space<vmem>>, vector<1x128x128xbf16>
    %4 = vector.shape_cast %3 : vector<1x128x128xbf16> to vector<128x128xbf16>
    %cst = arith.constant 0.000000e+00 : bf16
    %5 = vector.broadcast %cst : bf16 to vector<128x128xbf16>
    %6 = arith.cmpf ogt, %4, %5 : vector<128x128xbf16>
    %cst_3 = arith.constant 2.001950e-01 : bf16
    %7 = vector.broadcast %cst_3 : bf16 to vector<128x128xbf16>
    %8 = arith.mulf %7, %4 : vector<128x128xbf16>
    %9 = arith.select %6, %4, %8 : vector<128x128xi1>, vector<128x128xbf16>
    %c0_4 = arith.constant 0 : index
    %c0_5 = arith.constant 0 : index
    %10 = vector.load %arg8[%c0_4, %c0_5] : memref<128x128xf32, #tpu.memory_space<vmem>>, vector<128x128xf32>
    %c0_6 = arith.constant 0 : index
    %c0_7 = arith.constant 0 : index
    %c0_8 = arith.constant 0 : index
    %11 = vector.load %arg5[%c0_6, %c0_7, %c0_8] : memref<1x128x128xbf16, #tpu.memory_space<vmem>>, vector<1x128x128xbf16>
    %12 = vector.shape_cast %11 : vector<1x128x128xbf16> to vector<128x128xbf16>
    %cst_9 = arith.constant dense<0.000000e+00> : vector<128x128xf32>
    %13 = tpu.matmul %9, %12, %cst_9 {dimension_numbers = #tpu.dot_dimension_numbers<[1], [0], [0], [1], [0, 0, 1, 1], [], []>} : vector<128x128xbf16>, vector<128x128xbf16>, vector<128x128xf32> -> vector<128x128xf32>
    %14 = arith.addf %10, %13 : vector<128x128xf32>
    %c0_10 = arith.constant 0 : index
    %c0_11 = arith.constant 0 : index
    %15 = vector.load %arg8[%c0_10, %c0_11] : memref<128x128xf32, #tpu.memory_space<vmem>>, vector<128x128xf32>
    tpu.vector_store %arg8[%c0_10, %c0_11], %14 {strides = array<i32>} : memref<128x128xf32, #tpu.memory_space<vmem>>, vector<128x128xf32>,
    %c0_i32_12 = arith.constant 0 : i32
    %16 = arith.cmpi eq, %arg3, %c0_i32_12 : i32
    %17 = arith.extui %16 : i1 to i32
    %c0_i32_13 = arith.constant 0 : i32
    %18 = arith.cmpi ne, %17, %c0_i32_13 : i32
    scf.if %18 {
      %c0_14 = arith.constant 0 : index
      %c0_15 = arith.constant 0 : index
      %19 = vector.load %arg8[%c0_14, %c0_15] : memref<128x128xf32, #tpu.memory_space<vmem>>, vector<128x128xf32>
      %c0_16 = arith.constant 0 : index
      %c0_17 = arith.constant 0 : index
      %c0_18 = arith.constant 0 : index
      %20 = vector.load %arg6[%c0_16, %c0_17, %c0_18] : memref<1x1x128xf32, #tpu.memory_space<vmem>>, vector<1x1x128xf32>
      %21 = vector.shape_cast %20 : vector<1x1x128xf32> to vector<1x128xf32>
      %22 = vector.broadcast %21 : vector<1x128xf32> to vector<128x128xf32>
      %23 = arith.addf %19, %22 : vector<128x128xf32>
      %c0_19 = arith.constant 0 : index
      %c0_20 = arith.constant 0 : index
      %c0_21 = arith.constant 0 : index
      %24 = vector.load %arg7[%c0_19, %c0_20, %c0_21] : memref<1x128x128xf32, #tpu.memory_space<vmem>>, vector<1x128x128xf32>
      %25 = vector.shape_cast %24 : vector<1x128x128xf32> to vector<128x128xf32>
      %26 = vector.shape_cast %23 : vector<128x128xf32> to vector<1x128x128xf32>
      tpu.vector_store %arg7[%c0_19, %c0_20, %c0_21], %26 {strides = array<i32>} : memref<1x128x128xf32, #tpu.memory_space<vmem>>, vector<1x128x128xf32>,
    } else {
    }
    return
  }
  func.func @transform_0(%arg0: i32, %arg1: i32, %arg2: i32, %arg3: i32) -> (i32, i32, i32) {
    %c0_i32 = arith.constant 0 : i32
    return %arg0, %arg1, %arg3 : i32, i32, i32
  }
  func.func @transform_1(%arg0: i32, %arg1: i32, %arg2: i32, %arg3: i32) -> (i32, i32, i32) {
    %c0_i32 = arith.constant 0 : i32
    return %arg0, %arg3, %arg2 : i32, i32, i32
  }
  func.func @transform_2(%arg0: i32, %arg1: i32, %arg2: i32, %arg3: i32) -> (i32, i32, i32) {
    %c0_i32 = arith.constant 0 : i32
    %c0_i32_0 = arith.constant 0 : i32
    return %arg0, %c0_i32, %arg2 : i32, i32, i32
  }
  func.func @transform_3(%arg0: i32, %arg1: i32, %arg2: i32, %arg3: i32) -> (i32, i32, i32) {
    %c0_i32 = arith.constant 0 : i32
    return %arg0, %arg1, %arg2 : i32, i32, i32
  }
}

module attributes {stable_mosaic.version = 11 : i64} {
  func.func @_bn_stats_kernel(%arg0: i32, %arg1: memref<128x16xf32, #tpu.memory_space<vmem>>, %arg2: memref<2x16xf32, #tpu.memory_space<vmem>>) attributes {dimension_semantics = [#tpu.dimension_semantics<arbitrary>], iteration_bounds = array<i64: 1>, scalar_prefetch = 0 : i64, scratch_operands = 0 : i64, tpu.core_type = #tpu.core_type<tc>, window_params = [{transform_indices = @transform_0, window_bounds = array<i64: 128, 16>}, {pipeline_mode = #tpu.pipeline_mode<synchronous>, transform_indices = @transform_1, window_bounds = array<i64: 2, 16>}]} {
    %c0_i32 = arith.constant 0 : i32
    %0 = arith.cmpi eq, %arg0, %c0_i32 : i32
    %1 = arith.extui %0 : i1 to i32
    %c0_i32_0 = arith.constant 0 : i32
    %2 = arith.cmpi ne, %1, %c0_i32_0 : i32
    scf.if %2 {
      %cst_7 = arith.constant 0.000000e+00 : f32
      %13 = vector.broadcast %cst_7 : f32 to vector<2x16xf32>
      %c0_8 = arith.constant 0 : index
      %c0_9 = arith.constant 0 : index
      %14 = vector.load %arg2[%c0_8, %c0_9] : memref<2x16xf32, #tpu.memory_space<vmem>>, vector<2x16xf32>
      tpu.vector_store %arg2[%c0_8, %c0_9], %13 {strides = array<i32>} : memref<2x16xf32, #tpu.memory_space<vmem>>, vector<2x16xf32>,
    } else {
    }
    %c0 = arith.constant 0 : index
    %c0_1 = arith.constant 0 : index
    %3 = vector.load %arg1[%c0, %c0_1] : memref<128x16xf32, #tpu.memory_space<vmem>>, vector<128x16xf32>
    %c0_2 = arith.constant 0 : index
    %c0_3 = arith.constant 0 : index
    %4 = vector.load %arg2[%c0_2, %c0_3] : memref<2x16xf32, #tpu.memory_space<vmem>>, vector<2x16xf32>
    %cst = arith.constant dense<0.000000e+00> : vector<16xf32>
    %5 = vector.multi_reduction <add>, %3, %cst [0] : vector<128x16xf32> to vector<16xf32>
    %6 = vector.shape_cast %5 : vector<16xf32> to vector<1x16xf32>
    %7 = arith.mulf %3, %3 : vector<128x16xf32>
    %cst_4 = arith.constant dense<0.000000e+00> : vector<16xf32>
    %8 = vector.multi_reduction <add>, %7, %cst_4 [0] : vector<128x16xf32> to vector<16xf32>
    %9 = vector.shape_cast %8 : vector<16xf32> to vector<1x16xf32>
    %10 = tpu.concatenate %6, %9 in 0 : vector<1x16xf32>, vector<1x16xf32> -> vector<2x16xf32>
    %11 = arith.addf %4, %10 : vector<2x16xf32>
    %c0_5 = arith.constant 0 : index
    %c0_6 = arith.constant 0 : index
    %12 = vector.load %arg2[%c0_5, %c0_6] : memref<2x16xf32, #tpu.memory_space<vmem>>, vector<2x16xf32>
    tpu.vector_store %arg2[%c0_5, %c0_6], %11 {strides = array<i32>} : memref<2x16xf32, #tpu.memory_space<vmem>>, vector<2x16xf32>,
    return
  }
  func.func @transform_0(%arg0: i32) -> (i32, i32) {
    %c0_i32 = arith.constant 0 : i32
    %c0_i32_0 = arith.constant 0 : i32
    return %arg0, %c0_i32 : i32, i32
  }
  func.func @transform_1(%arg0: i32) -> (i32, i32) {
    %c0_i32 = arith.constant 0 : i32
    %c0_i32_0 = arith.constant 0 : i32
    %c0_i32_1 = arith.constant 0 : i32
    return %c0_i32, %c0_i32_0 : i32, i32
  }
}

module attributes {stable_mosaic.version = 11 : i64} {
  func.func @_bn_norm_kernel(%arg0: i32, %arg1: memref<128x16xf32, #tpu.memory_space<vmem>>, %arg2: memref<2x16xf32, #tpu.memory_space<vmem>>, %arg3: memref<1x16xf32, #tpu.memory_space<vmem>>, %arg4: memref<1x16xf32, #tpu.memory_space<vmem>>, %arg5: memref<128x16xf32, #tpu.memory_space<vmem>>) attributes {dimension_semantics = [#tpu.dimension_semantics<parallel>], iteration_bounds = array<i64: 1>, scalar_prefetch = 0 : i64, scratch_operands = 0 : i64, tpu.core_type = #tpu.core_type<tc>, window_params = [{transform_indices = @transform_0, window_bounds = array<i64: 128, 16>}, {pipeline_mode = #tpu.pipeline_mode<synchronous>, transform_indices = @transform_1, window_bounds = array<i64: 2, 16>}, {pipeline_mode = #tpu.pipeline_mode<synchronous>, transform_indices = @transform_2, window_bounds = array<i64: 1, 16>}, {pipeline_mode = #tpu.pipeline_mode<synchronous>, transform_indices = @transform_3, window_bounds = array<i64: 1, 16>}, {transform_indices = @transform_4, window_bounds = array<i64: 128, 16>}]} {
    %c0 = arith.constant 0 : index
    %c0_0 = arith.constant 0 : index
    %0 = vector.load %arg2[%c0, %c0_0] : memref<2x16xf32, #tpu.memory_space<vmem>>, vector<2x16xf32>
    %1 = vector.extract_strided_slice %0 {offsets = [0, 0], sizes = [1, 16], strides = [1, 1]} : vector<2x16xf32> to vector<1x16xf32>
    %cst = arith.constant 7.812500e-03 : f32
    %2 = vector.broadcast %cst : f32 to vector<1x16xf32>
    %3 = arith.mulf %1, %2 : vector<1x16xf32>
    %4 = vector.extract_strided_slice %0 {offsets = [1, 0], sizes = [1, 16], strides = [1, 1]} : vector<2x16xf32> to vector<1x16xf32>
    %cst_1 = arith.constant 7.812500e-03 : f32
    %5 = vector.broadcast %cst_1 : f32 to vector<1x16xf32>
    %6 = arith.mulf %4, %5 : vector<1x16xf32>
    %7 = arith.mulf %3, %3 : vector<1x16xf32>
    %8 = arith.subf %6, %7 : vector<1x16xf32>
    %cst_2 = arith.constant 0.000000e+00 : f32
    %9 = vector.broadcast %cst_2 : f32 to vector<1x16xf32>
    %10 = arith.maximumf %8, %9 : vector<1x16xf32>
    %c0_3 = arith.constant 0 : index
    %c0_4 = arith.constant 0 : index
    %11 = vector.load %arg3[%c0_3, %c0_4] : memref<1x16xf32, #tpu.memory_space<vmem>>, vector<1x16xf32>
    %cst_5 = arith.constant 9.99999974E-6 : f32
    %12 = vector.broadcast %cst_5 : f32 to vector<1x16xf32>
    %13 = arith.addf %10, %12 : vector<1x16xf32>
    %14 = math.rsqrt %13 : vector<1x16xf32>
    %15 = arith.mulf %11, %14 : vector<1x16xf32>
    %c0_6 = arith.constant 0 : index
    %c0_7 = arith.constant 0 : index
    %16 = vector.load %arg4[%c0_6, %c0_7] : memref<1x16xf32, #tpu.memory_space<vmem>>, vector<1x16xf32>
    %17 = arith.mulf %3, %15 : vector<1x16xf32>
    %18 = arith.subf %16, %17 : vector<1x16xf32>
    %c0_8 = arith.constant 0 : index
    %c0_9 = arith.constant 0 : index
    %19 = vector.load %arg1[%c0_8, %c0_9] : memref<128x16xf32, #tpu.memory_space<vmem>>, vector<128x16xf32>
    %20 = vector.broadcast %15 : vector<1x16xf32> to vector<128x16xf32>
    %21 = arith.mulf %19, %20 : vector<128x16xf32>
    %22 = vector.broadcast %18 : vector<1x16xf32> to vector<128x16xf32>
    %23 = arith.addf %21, %22 : vector<128x16xf32>
    %c0_10 = arith.constant 0 : index
    %c0_11 = arith.constant 0 : index
    %24 = vector.load %arg5[%c0_10, %c0_11] : memref<128x16xf32, #tpu.memory_space<vmem>>, vector<128x16xf32>
    tpu.vector_store %arg5[%c0_10, %c0_11], %23 {strides = array<i32>} : memref<128x16xf32, #tpu.memory_space<vmem>>, vector<128x16xf32>,
    return
  }
  func.func @transform_0(%arg0: i32) -> (i32, i32) {
    %c0_i32 = arith.constant 0 : i32
    %c0_i32_0 = arith.constant 0 : i32
    return %arg0, %c0_i32 : i32, i32
  }
  func.func @transform_1(%arg0: i32) -> (i32, i32) {
    %c0_i32 = arith.constant 0 : i32
    %c0_i32_0 = arith.constant 0 : i32
    %c0_i32_1 = arith.constant 0 : i32
    return %c0_i32, %c0_i32_0 : i32, i32
  }
  func.func @transform_2(%arg0: i32) -> (i32, i32) {
    %c0_i32 = arith.constant 0 : i32
    %c0_i32_0 = arith.constant 0 : i32
    %c0_i32_1 = arith.constant 0 : i32
    return %c0_i32, %c0_i32_0 : i32, i32
  }
  func.func @transform_3(%arg0: i32) -> (i32, i32) {
    %c0_i32 = arith.constant 0 : i32
    %c0_i32_0 = arith.constant 0 : i32
    %c0_i32_1 = arith.constant 0 : i32
    return %c0_i32, %c0_i32_0 : i32, i32
  }
  func.func @transform_4(%arg0: i32) -> (i32, i32) {
    %c0_i32 = arith.constant 0 : i32
    %c0_i32_0 = arith.constant 0 : i32
    return %arg0, %c0_i32 : i32, i32
  }
}

module attributes {stable_mosaic.version = 11 : i64} {
  func.func @_gemm_kernel(%arg0: i32, %arg1: i32, %arg2: i32, %arg3: i32, %arg4: memref<1x32x256xbf16, #tpu.memory_space<vmem>>, %arg5: memref<1x256x128xbf16, #tpu.memory_space<vmem>>, %arg6: memref<1x1x128xf32, #tpu.memory_space<vmem>>, %arg7: memref<1x32x128xf32, #tpu.memory_space<vmem>>, %arg8: memref<32x128xf32, #tpu.memory_space<vmem>>) attributes {dimension_semantics = [#tpu.dimension_semantics<parallel>, #tpu.dimension_semantics<parallel>, #tpu.dimension_semantics<parallel>, #tpu.dimension_semantics<arbitrary>], iteration_bounds = array<i64: 1, 1, 1, 1>, scalar_prefetch = 0 : i64, scratch_operands = 1 : i64, tpu.core_type = #tpu.core_type<tc>, window_params = [{transform_indices = @transform_0, window_bounds = array<i64: 1, 32, 256>}, {transform_indices = @transform_1, window_bounds = array<i64: 1, 256, 128>}, {transform_indices = @transform_2, window_bounds = array<i64: 1, 1, 128>}, {transform_indices = @transform_3, window_bounds = array<i64: 1, 32, 128>}]} {
    %c0_i32 = arith.constant 0 : i32
    %0 = arith.cmpi eq, %arg3, %c0_i32 : i32
    %1 = arith.extui %0 : i1 to i32
    %c0_i32_0 = arith.constant 0 : i32
    %2 = arith.cmpi ne, %1, %c0_i32_0 : i32
    scf.if %2 {
      %cst_14 = arith.constant 0.000000e+00 : f32
      %19 = vector.broadcast %cst_14 : f32 to vector<32x128xf32>
      %c0_15 = arith.constant 0 : index
      %c0_16 = arith.constant 0 : index
      %20 = vector.load %arg8[%c0_15, %c0_16] : memref<32x128xf32, #tpu.memory_space<vmem>>, vector<32x128xf32>
      tpu.vector_store %arg8[%c0_15, %c0_16], %19 {strides = array<i32>} : memref<32x128xf32, #tpu.memory_space<vmem>>, vector<32x128xf32>,
    } else {
    }
    %c0 = arith.constant 0 : index
    %c0_1 = arith.constant 0 : index
    %c0_2 = arith.constant 0 : index
    %3 = vector.load %arg4[%c0, %c0_1, %c0_2] : memref<1x32x256xbf16, #tpu.memory_space<vmem>>, vector<1x32x256xbf16>
    %4 = vector.shape_cast %3 : vector<1x32x256xbf16> to vector<32x256xbf16>
    %cst = arith.constant 0.000000e+00 : bf16
    %5 = vector.broadcast %cst : bf16 to vector<32x256xbf16>
    %6 = arith.cmpf ogt, %4, %5 : vector<32x256xbf16>
    %cst_3 = arith.constant 2.001950e-01 : bf16
    %7 = vector.broadcast %cst_3 : bf16 to vector<32x256xbf16>
    %8 = arith.mulf %7, %4 : vector<32x256xbf16>
    %9 = arith.select %6, %4, %8 : vector<32x256xi1>, vector<32x256xbf16>
    %c0_4 = arith.constant 0 : index
    %c0_5 = arith.constant 0 : index
    %10 = vector.load %arg8[%c0_4, %c0_5] : memref<32x128xf32, #tpu.memory_space<vmem>>, vector<32x128xf32>
    %c0_6 = arith.constant 0 : index
    %c0_7 = arith.constant 0 : index
    %c0_8 = arith.constant 0 : index
    %11 = vector.load %arg5[%c0_6, %c0_7, %c0_8] : memref<1x256x128xbf16, #tpu.memory_space<vmem>>, vector<1x256x128xbf16>
    %12 = vector.shape_cast %11 : vector<1x256x128xbf16> to vector<256x128xbf16>
    %cst_9 = arith.constant dense<0.000000e+00> : vector<32x128xf32>
    %13 = tpu.matmul %9, %12, %cst_9 {dimension_numbers = #tpu.dot_dimension_numbers<[1], [0], [0], [1], [0, 0, 1, 1], [], []>} : vector<32x256xbf16>, vector<256x128xbf16>, vector<32x128xf32> -> vector<32x128xf32>
    %14 = arith.addf %10, %13 : vector<32x128xf32>
    %c0_10 = arith.constant 0 : index
    %c0_11 = arith.constant 0 : index
    %15 = vector.load %arg8[%c0_10, %c0_11] : memref<32x128xf32, #tpu.memory_space<vmem>>, vector<32x128xf32>
    tpu.vector_store %arg8[%c0_10, %c0_11], %14 {strides = array<i32>} : memref<32x128xf32, #tpu.memory_space<vmem>>, vector<32x128xf32>,
    %c0_i32_12 = arith.constant 0 : i32
    %16 = arith.cmpi eq, %arg3, %c0_i32_12 : i32
    %17 = arith.extui %16 : i1 to i32
    %c0_i32_13 = arith.constant 0 : i32
    %18 = arith.cmpi ne, %17, %c0_i32_13 : i32
    scf.if %18 {
      %c0_14 = arith.constant 0 : index
      %c0_15 = arith.constant 0 : index
      %19 = vector.load %arg8[%c0_14, %c0_15] : memref<32x128xf32, #tpu.memory_space<vmem>>, vector<32x128xf32>
      %c0_16 = arith.constant 0 : index
      %c0_17 = arith.constant 0 : index
      %c0_18 = arith.constant 0 : index
      %20 = vector.load %arg6[%c0_16, %c0_17, %c0_18] : memref<1x1x128xf32, #tpu.memory_space<vmem>>, vector<1x1x128xf32>
      %21 = vector.shape_cast %20 : vector<1x1x128xf32> to vector<1x128xf32>
      %22 = vector.broadcast %21 : vector<1x128xf32> to vector<32x128xf32>
      %23 = arith.addf %19, %22 : vector<32x128xf32>
      %c0_19 = arith.constant 0 : index
      %c0_20 = arith.constant 0 : index
      %c0_21 = arith.constant 0 : index
      %24 = vector.load %arg7[%c0_19, %c0_20, %c0_21] : memref<1x32x128xf32, #tpu.memory_space<vmem>>, vector<1x32x128xf32>
      %25 = vector.shape_cast %24 : vector<1x32x128xf32> to vector<32x128xf32>
      %26 = vector.shape_cast %23 : vector<32x128xf32> to vector<1x32x128xf32>
      tpu.vector_store %arg7[%c0_19, %c0_20, %c0_21], %26 {strides = array<i32>} : memref<1x32x128xf32, #tpu.memory_space<vmem>>, vector<1x32x128xf32>,
    } else {
    }
    return
  }
  func.func @transform_0(%arg0: i32, %arg1: i32, %arg2: i32, %arg3: i32) -> (i32, i32, i32) {
    %c0_i32 = arith.constant 0 : i32
    return %arg0, %arg1, %arg3 : i32, i32, i32
  }
  func.func @transform_1(%arg0: i32, %arg1: i32, %arg2: i32, %arg3: i32) -> (i32, i32, i32) {
    %c0_i32 = arith.constant 0 : i32
    return %arg0, %arg3, %arg2 : i32, i32, i32
  }
  func.func @transform_2(%arg0: i32, %arg1: i32, %arg2: i32, %arg3: i32) -> (i32, i32, i32) {
    %c0_i32 = arith.constant 0 : i32
    %c0_i32_0 = arith.constant 0 : i32
    return %arg0, %c0_i32, %arg2 : i32, i32, i32
  }
  func.func @transform_3(%arg0: i32, %arg1: i32, %arg2: i32, %arg3: i32) -> (i32, i32, i32) {
    %c0_i32 = arith.constant 0 : i32
    return %arg0, %arg1, %arg2 : i32, i32, i32
  }
}

module attributes {stable_mosaic.version = 11 : i64} {
  func.func @_bn_norm_kernel(%arg0: i32, %arg1: memref<32x32xf32, #tpu.memory_space<vmem>>, %arg2: memref<2x32xf32, #tpu.memory_space<vmem>>, %arg3: memref<1x32xf32, #tpu.memory_space<vmem>>, %arg4: memref<1x32xf32, #tpu.memory_space<vmem>>, %arg5: memref<32x32xf32, #tpu.memory_space<vmem>>) attributes {dimension_semantics = [#tpu.dimension_semantics<parallel>], iteration_bounds = array<i64: 1>, scalar_prefetch = 0 : i64, scratch_operands = 0 : i64, tpu.core_type = #tpu.core_type<tc>, window_params = [{transform_indices = @transform_0, window_bounds = array<i64: 32, 32>}, {pipeline_mode = #tpu.pipeline_mode<synchronous>, transform_indices = @transform_1, window_bounds = array<i64: 2, 32>}, {pipeline_mode = #tpu.pipeline_mode<synchronous>, transform_indices = @transform_2, window_bounds = array<i64: 1, 32>}, {pipeline_mode = #tpu.pipeline_mode<synchronous>, transform_indices = @transform_3, window_bounds = array<i64: 1, 32>}, {transform_indices = @transform_4, window_bounds = array<i64: 32, 32>}]} {
    %c0 = arith.constant 0 : index
    %c0_0 = arith.constant 0 : index
    %0 = vector.load %arg2[%c0, %c0_0] : memref<2x32xf32, #tpu.memory_space<vmem>>, vector<2x32xf32>
    %1 = vector.extract_strided_slice %0 {offsets = [0, 0], sizes = [1, 32], strides = [1, 1]} : vector<2x32xf32> to vector<1x32xf32>
    %cst = arith.constant 3.125000e-02 : f32
    %2 = vector.broadcast %cst : f32 to vector<1x32xf32>
    %3 = arith.mulf %1, %2 : vector<1x32xf32>
    %4 = vector.extract_strided_slice %0 {offsets = [1, 0], sizes = [1, 32], strides = [1, 1]} : vector<2x32xf32> to vector<1x32xf32>
    %cst_1 = arith.constant 3.125000e-02 : f32
    %5 = vector.broadcast %cst_1 : f32 to vector<1x32xf32>
    %6 = arith.mulf %4, %5 : vector<1x32xf32>
    %7 = arith.mulf %3, %3 : vector<1x32xf32>
    %8 = arith.subf %6, %7 : vector<1x32xf32>
    %cst_2 = arith.constant 0.000000e+00 : f32
    %9 = vector.broadcast %cst_2 : f32 to vector<1x32xf32>
    %10 = arith.maximumf %8, %9 : vector<1x32xf32>
    %c0_3 = arith.constant 0 : index
    %c0_4 = arith.constant 0 : index
    %11 = vector.load %arg3[%c0_3, %c0_4] : memref<1x32xf32, #tpu.memory_space<vmem>>, vector<1x32xf32>
    %cst_5 = arith.constant 9.99999974E-6 : f32
    %12 = vector.broadcast %cst_5 : f32 to vector<1x32xf32>
    %13 = arith.addf %10, %12 : vector<1x32xf32>
    %14 = math.rsqrt %13 : vector<1x32xf32>
    %15 = arith.mulf %11, %14 : vector<1x32xf32>
    %c0_6 = arith.constant 0 : index
    %c0_7 = arith.constant 0 : index
    %16 = vector.load %arg4[%c0_6, %c0_7] : memref<1x32xf32, #tpu.memory_space<vmem>>, vector<1x32xf32>
    %17 = arith.mulf %3, %15 : vector<1x32xf32>
    %18 = arith.subf %16, %17 : vector<1x32xf32>
    %c0_8 = arith.constant 0 : index
    %c0_9 = arith.constant 0 : index
    %19 = vector.load %arg1[%c0_8, %c0_9] : memref<32x32xf32, #tpu.memory_space<vmem>>, vector<32x32xf32>
    %20 = vector.broadcast %15 : vector<1x32xf32> to vector<32x32xf32>
    %21 = arith.mulf %19, %20 : vector<32x32xf32>
    %22 = vector.broadcast %18 : vector<1x32xf32> to vector<32x32xf32>
    %23 = arith.addf %21, %22 : vector<32x32xf32>
    %c0_10 = arith.constant 0 : index
    %c0_11 = arith.constant 0 : index
    %24 = vector.load %arg5[%c0_10, %c0_11] : memref<32x32xf32, #tpu.memory_space<vmem>>, vector<32x32xf32>
    tpu.vector_store %arg5[%c0_10, %c0_11], %23 {strides = array<i32>} : memref<32x32xf32, #tpu.memory_space<vmem>>, vector<32x32xf32>,
    return
  }
  func.func @transform_0(%arg0: i32) -> (i32, i32) {
    %c0_i32 = arith.constant 0 : i32
    %c0_i32_0 = arith.constant 0 : i32
    return %arg0, %c0_i32 : i32, i32
  }
  func.func @transform_1(%arg0: i32) -> (i32, i32) {
    %c0_i32 = arith.constant 0 : i32
    %c0_i32_0 = arith.constant 0 : i32
    %c0_i32_1 = arith.constant 0 : i32
    return %c0_i32, %c0_i32_0 : i32, i32
  }
  func.func @transform_2(%arg0: i32) -> (i32, i32) {
    %c0_i32 = arith.constant 0 : i32
    %c0_i32_0 = arith.constant 0 : i32
    %c0_i32_1 = arith.constant 0 : i32
    return %c0_i32, %c0_i32_0 : i32, i32
  }
  func.func @transform_3(%arg0: i32) -> (i32, i32) {
    %c0_i32 = arith.constant 0 : i32
    %c0_i32_0 = arith.constant 0 : i32
    %c0_i32_1 = arith.constant 0 : i32
    return %c0_i32, %c0_i32_0 : i32, i32
  }
  func.func @transform_4(%arg0: i32) -> (i32, i32) {
    %c0_i32 = arith.constant 0 : i32
    %c0_i32_0 = arith.constant 0 : i32
    return %arg0, %c0_i32 : i32, i32
  }
}

module attributes {stable_mosaic.version = 11 : i64} {
  func.func @_bn_stats_kernel(%arg0: i32, %arg1: memref<32x32xf32, #tpu.memory_space<vmem>>, %arg2: memref<2x32xf32, #tpu.memory_space<vmem>>) attributes {dimension_semantics = [#tpu.dimension_semantics<arbitrary>], iteration_bounds = array<i64: 1>, scalar_prefetch = 0 : i64, scratch_operands = 0 : i64, tpu.core_type = #tpu.core_type<tc>, window_params = [{transform_indices = @transform_0, window_bounds = array<i64: 32, 32>}, {pipeline_mode = #tpu.pipeline_mode<synchronous>, transform_indices = @transform_1, window_bounds = array<i64: 2, 32>}]} {
    %c0_i32 = arith.constant 0 : i32
    %0 = arith.cmpi eq, %arg0, %c0_i32 : i32
    %1 = arith.extui %0 : i1 to i32
    %c0_i32_0 = arith.constant 0 : i32
    %2 = arith.cmpi ne, %1, %c0_i32_0 : i32
    scf.if %2 {
      %cst_7 = arith.constant 0.000000e+00 : f32
      %13 = vector.broadcast %cst_7 : f32 to vector<2x32xf32>
      %c0_8 = arith.constant 0 : index
      %c0_9 = arith.constant 0 : index
      %14 = vector.load %arg2[%c0_8, %c0_9] : memref<2x32xf32, #tpu.memory_space<vmem>>, vector<2x32xf32>
      tpu.vector_store %arg2[%c0_8, %c0_9], %13 {strides = array<i32>} : memref<2x32xf32, #tpu.memory_space<vmem>>, vector<2x32xf32>,
    } else {
    }
    %c0 = arith.constant 0 : index
    %c0_1 = arith.constant 0 : index
    %3 = vector.load %arg1[%c0, %c0_1] : memref<32x32xf32, #tpu.memory_space<vmem>>, vector<32x32xf32>
    %c0_2 = arith.constant 0 : index
    %c0_3 = arith.constant 0 : index
    %4 = vector.load %arg2[%c0_2, %c0_3] : memref<2x32xf32, #tpu.memory_space<vmem>>, vector<2x32xf32>
    %cst = arith.constant dense<0.000000e+00> : vector<32xf32>
    %5 = vector.multi_reduction <add>, %3, %cst [0] : vector<32x32xf32> to vector<32xf32>
    %6 = vector.shape_cast %5 : vector<32xf32> to vector<1x32xf32>
    %7 = arith.mulf %3, %3 : vector<32x32xf32>
    %cst_4 = arith.constant dense<0.000000e+00> : vector<32xf32>
    %8 = vector.multi_reduction <add>, %7, %cst_4 [0] : vector<32x32xf32> to vector<32xf32>
    %9 = vector.shape_cast %8 : vector<32xf32> to vector<1x32xf32>
    %10 = tpu.concatenate %6, %9 in 0 : vector<1x32xf32>, vector<1x32xf32> -> vector<2x32xf32>
    %11 = arith.addf %4, %10 : vector<2x32xf32>
    %c0_5 = arith.constant 0 : index
    %c0_6 = arith.constant 0 : index
    %12 = vector.load %arg2[%c0_5, %c0_6] : memref<2x32xf32, #tpu.memory_space<vmem>>, vector<2x32xf32>
    tpu.vector_store %arg2[%c0_5, %c0_6], %11 {strides = array<i32>} : memref<2x32xf32, #tpu.memory_space<vmem>>, vector<2x32xf32>,
    return
  }
  func.func @transform_0(%arg0: i32) -> (i32, i32) {
    %c0_i32 = arith.constant 0 : i32
    %c0_i32_0 = arith.constant 0 : i32
    return %arg0, %c0_i32 : i32, i32
  }
  func.func @transform_1(%arg0: i32) -> (i32, i32) {
    %c0_i32 = arith.constant 0 : i32
    %c0_i32_0 = arith.constant 0 : i32
    %c0_i32_1 = arith.constant 0 : i32
    return %c0_i32, %c0_i32_0 : i32, i32
  }
}

module attributes {stable_mosaic.version = 11 : i64} {
  func.func @_bn_stats_kernel(%arg0: i32, %arg1: memref<8x64xf32, #tpu.memory_space<vmem>>, %arg2: memref<2x64xf32, #tpu.memory_space<vmem>>) attributes {dimension_semantics = [#tpu.dimension_semantics<arbitrary>], iteration_bounds = array<i64: 1>, scalar_prefetch = 0 : i64, scratch_operands = 0 : i64, tpu.core_type = #tpu.core_type<tc>, window_params = [{transform_indices = @transform_0, window_bounds = array<i64: 8, 64>}, {pipeline_mode = #tpu.pipeline_mode<synchronous>, transform_indices = @transform_1, window_bounds = array<i64: 2, 64>}]} {
    %c0_i32 = arith.constant 0 : i32
    %0 = arith.cmpi eq, %arg0, %c0_i32 : i32
    %1 = arith.extui %0 : i1 to i32
    %c0_i32_0 = arith.constant 0 : i32
    %2 = arith.cmpi ne, %1, %c0_i32_0 : i32
    scf.if %2 {
      %cst_7 = arith.constant 0.000000e+00 : f32
      %13 = vector.broadcast %cst_7 : f32 to vector<2x64xf32>
      %c0_8 = arith.constant 0 : index
      %c0_9 = arith.constant 0 : index
      %14 = vector.load %arg2[%c0_8, %c0_9] : memref<2x64xf32, #tpu.memory_space<vmem>>, vector<2x64xf32>
      tpu.vector_store %arg2[%c0_8, %c0_9], %13 {strides = array<i32>} : memref<2x64xf32, #tpu.memory_space<vmem>>, vector<2x64xf32>,
    } else {
    }
    %c0 = arith.constant 0 : index
    %c0_1 = arith.constant 0 : index
    %3 = vector.load %arg1[%c0, %c0_1] : memref<8x64xf32, #tpu.memory_space<vmem>>, vector<8x64xf32>
    %c0_2 = arith.constant 0 : index
    %c0_3 = arith.constant 0 : index
    %4 = vector.load %arg2[%c0_2, %c0_3] : memref<2x64xf32, #tpu.memory_space<vmem>>, vector<2x64xf32>
    %cst = arith.constant dense<0.000000e+00> : vector<64xf32>
    %5 = vector.multi_reduction <add>, %3, %cst [0] : vector<8x64xf32> to vector<64xf32>
    %6 = vector.shape_cast %5 : vector<64xf32> to vector<1x64xf32>
    %7 = arith.mulf %3, %3 : vector<8x64xf32>
    %cst_4 = arith.constant dense<0.000000e+00> : vector<64xf32>
    %8 = vector.multi_reduction <add>, %7, %cst_4 [0] : vector<8x64xf32> to vector<64xf32>
    %9 = vector.shape_cast %8 : vector<64xf32> to vector<1x64xf32>
    %10 = tpu.concatenate %6, %9 in 0 : vector<1x64xf32>, vector<1x64xf32> -> vector<2x64xf32>
    %11 = arith.addf %4, %10 : vector<2x64xf32>
    %c0_5 = arith.constant 0 : index
    %c0_6 = arith.constant 0 : index
    %12 = vector.load %arg2[%c0_5, %c0_6] : memref<2x64xf32, #tpu.memory_space<vmem>>, vector<2x64xf32>
    tpu.vector_store %arg2[%c0_5, %c0_6], %11 {strides = array<i32>} : memref<2x64xf32, #tpu.memory_space<vmem>>, vector<2x64xf32>,
    return
  }
  func.func @transform_0(%arg0: i32) -> (i32, i32) {
    %c0_i32 = arith.constant 0 : i32
    %c0_i32_0 = arith.constant 0 : i32
    return %arg0, %c0_i32 : i32, i32
  }
  func.func @transform_1(%arg0: i32) -> (i32, i32) {
    %c0_i32 = arith.constant 0 : i32
    %c0_i32_0 = arith.constant 0 : i32
    %c0_i32_1 = arith.constant 0 : i32
    return %c0_i32, %c0_i32_0 : i32, i32
  }
}

module attributes {stable_mosaic.version = 11 : i64} {
  func.func @_gemm_kernel(%arg0: i32, %arg1: i32, %arg2: i32, %arg3: i32, %arg4: memref<1x16x512xbf16, #tpu.memory_space<vmem>>, %arg5: memref<1x512x128xbf16, #tpu.memory_space<vmem>>, %arg6: memref<1x1x128xf32, #tpu.memory_space<vmem>>, %arg7: memref<1x16x128xf32, #tpu.memory_space<vmem>>, %arg8: memref<16x128xf32, #tpu.memory_space<vmem>>) attributes {dimension_semantics = [#tpu.dimension_semantics<parallel>, #tpu.dimension_semantics<parallel>, #tpu.dimension_semantics<parallel>, #tpu.dimension_semantics<arbitrary>], iteration_bounds = array<i64: 1, 1, 1, 1>, scalar_prefetch = 0 : i64, scratch_operands = 1 : i64, tpu.core_type = #tpu.core_type<tc>, window_params = [{transform_indices = @transform_0, window_bounds = array<i64: 1, 16, 512>}, {transform_indices = @transform_1, window_bounds = array<i64: 1, 512, 128>}, {transform_indices = @transform_2, window_bounds = array<i64: 1, 1, 128>}, {transform_indices = @transform_3, window_bounds = array<i64: 1, 16, 128>}]} {
    %c0_i32 = arith.constant 0 : i32
    %0 = arith.cmpi eq, %arg3, %c0_i32 : i32
    %1 = arith.extui %0 : i1 to i32
    %c0_i32_0 = arith.constant 0 : i32
    %2 = arith.cmpi ne, %1, %c0_i32_0 : i32
    scf.if %2 {
      %cst_14 = arith.constant 0.000000e+00 : f32
      %19 = vector.broadcast %cst_14 : f32 to vector<16x128xf32>
      %c0_15 = arith.constant 0 : index
      %c0_16 = arith.constant 0 : index
      %20 = vector.load %arg8[%c0_15, %c0_16] : memref<16x128xf32, #tpu.memory_space<vmem>>, vector<16x128xf32>
      tpu.vector_store %arg8[%c0_15, %c0_16], %19 {strides = array<i32>} : memref<16x128xf32, #tpu.memory_space<vmem>>, vector<16x128xf32>,
    } else {
    }
    %c0 = arith.constant 0 : index
    %c0_1 = arith.constant 0 : index
    %c0_2 = arith.constant 0 : index
    %3 = vector.load %arg4[%c0, %c0_1, %c0_2] : memref<1x16x512xbf16, #tpu.memory_space<vmem>>, vector<1x16x512xbf16>
    %4 = vector.shape_cast %3 : vector<1x16x512xbf16> to vector<16x512xbf16>
    %cst = arith.constant 0.000000e+00 : bf16
    %5 = vector.broadcast %cst : bf16 to vector<16x512xbf16>
    %6 = arith.cmpf ogt, %4, %5 : vector<16x512xbf16>
    %cst_3 = arith.constant 2.001950e-01 : bf16
    %7 = vector.broadcast %cst_3 : bf16 to vector<16x512xbf16>
    %8 = arith.mulf %7, %4 : vector<16x512xbf16>
    %9 = arith.select %6, %4, %8 : vector<16x512xi1>, vector<16x512xbf16>
    %c0_4 = arith.constant 0 : index
    %c0_5 = arith.constant 0 : index
    %10 = vector.load %arg8[%c0_4, %c0_5] : memref<16x128xf32, #tpu.memory_space<vmem>>, vector<16x128xf32>
    %c0_6 = arith.constant 0 : index
    %c0_7 = arith.constant 0 : index
    %c0_8 = arith.constant 0 : index
    %11 = vector.load %arg5[%c0_6, %c0_7, %c0_8] : memref<1x512x128xbf16, #tpu.memory_space<vmem>>, vector<1x512x128xbf16>
    %12 = vector.shape_cast %11 : vector<1x512x128xbf16> to vector<512x128xbf16>
    %cst_9 = arith.constant dense<0.000000e+00> : vector<16x128xf32>
    %13 = tpu.matmul %9, %12, %cst_9 {dimension_numbers = #tpu.dot_dimension_numbers<[1], [0], [0], [1], [0, 0, 1, 1], [], []>} : vector<16x512xbf16>, vector<512x128xbf16>, vector<16x128xf32> -> vector<16x128xf32>
    %14 = arith.addf %10, %13 : vector<16x128xf32>
    %c0_10 = arith.constant 0 : index
    %c0_11 = arith.constant 0 : index
    %15 = vector.load %arg8[%c0_10, %c0_11] : memref<16x128xf32, #tpu.memory_space<vmem>>, vector<16x128xf32>
    tpu.vector_store %arg8[%c0_10, %c0_11], %14 {strides = array<i32>} : memref<16x128xf32, #tpu.memory_space<vmem>>, vector<16x128xf32>,
    %c0_i32_12 = arith.constant 0 : i32
    %16 = arith.cmpi eq, %arg3, %c0_i32_12 : i32
    %17 = arith.extui %16 : i1 to i32
    %c0_i32_13 = arith.constant 0 : i32
    %18 = arith.cmpi ne, %17, %c0_i32_13 : i32
    scf.if %18 {
      %c0_14 = arith.constant 0 : index
      %c0_15 = arith.constant 0 : index
      %19 = vector.load %arg8[%c0_14, %c0_15] : memref<16x128xf32, #tpu.memory_space<vmem>>, vector<16x128xf32>
      %c0_16 = arith.constant 0 : index
      %c0_17 = arith.constant 0 : index
      %c0_18 = arith.constant 0 : index
      %20 = vector.load %arg6[%c0_16, %c0_17, %c0_18] : memref<1x1x128xf32, #tpu.memory_space<vmem>>, vector<1x1x128xf32>
      %21 = vector.shape_cast %20 : vector<1x1x128xf32> to vector<1x128xf32>
      %22 = vector.broadcast %21 : vector<1x128xf32> to vector<16x128xf32>
      %23 = arith.addf %19, %22 : vector<16x128xf32>
      %c0_19 = arith.constant 0 : index
      %c0_20 = arith.constant 0 : index
      %c0_21 = arith.constant 0 : index
      %24 = vector.load %arg7[%c0_19, %c0_20, %c0_21] : memref<1x16x128xf32, #tpu.memory_space<vmem>>, vector<1x16x128xf32>
      %25 = vector.shape_cast %24 : vector<1x16x128xf32> to vector<16x128xf32>
      %26 = vector.shape_cast %23 : vector<16x128xf32> to vector<1x16x128xf32>
      tpu.vector_store %arg7[%c0_19, %c0_20, %c0_21], %26 {strides = array<i32>} : memref<1x16x128xf32, #tpu.memory_space<vmem>>, vector<1x16x128xf32>,
    } else {
    }
    return
  }
  func.func @transform_0(%arg0: i32, %arg1: i32, %arg2: i32, %arg3: i32) -> (i32, i32, i32) {
    %c0_i32 = arith.constant 0 : i32
    return %arg0, %arg1, %arg3 : i32, i32, i32
  }
  func.func @transform_1(%arg0: i32, %arg1: i32, %arg2: i32, %arg3: i32) -> (i32, i32, i32) {
    %c0_i32 = arith.constant 0 : i32
    return %arg0, %arg3, %arg2 : i32, i32, i32
  }
  func.func @transform_2(%arg0: i32, %arg1: i32, %arg2: i32, %arg3: i32) -> (i32, i32, i32) {
    %c0_i32 = arith.constant 0 : i32
    %c0_i32_0 = arith.constant 0 : i32
    return %arg0, %c0_i32, %arg2 : i32, i32, i32
  }
  func.func @transform_3(%arg0: i32, %arg1: i32, %arg2: i32, %arg3: i32) -> (i32, i32, i32) {
    %c0_i32 = arith.constant 0 : i32
    return %arg0, %arg1, %arg2 : i32, i32, i32
  }
}

module attributes {stable_mosaic.version = 11 : i64} {
  func.func @_bn_norm_kernel(%arg0: i32, %arg1: memref<8x64xf32, #tpu.memory_space<vmem>>, %arg2: memref<2x64xf32, #tpu.memory_space<vmem>>, %arg3: memref<1x64xf32, #tpu.memory_space<vmem>>, %arg4: memref<1x64xf32, #tpu.memory_space<vmem>>, %arg5: memref<8x64xf32, #tpu.memory_space<vmem>>) attributes {dimension_semantics = [#tpu.dimension_semantics<parallel>], iteration_bounds = array<i64: 1>, scalar_prefetch = 0 : i64, scratch_operands = 0 : i64, tpu.core_type = #tpu.core_type<tc>, window_params = [{transform_indices = @transform_0, window_bounds = array<i64: 8, 64>}, {pipeline_mode = #tpu.pipeline_mode<synchronous>, transform_indices = @transform_1, window_bounds = array<i64: 2, 64>}, {pipeline_mode = #tpu.pipeline_mode<synchronous>, transform_indices = @transform_2, window_bounds = array<i64: 1, 64>}, {pipeline_mode = #tpu.pipeline_mode<synchronous>, transform_indices = @transform_3, window_bounds = array<i64: 1, 64>}, {transform_indices = @transform_4, window_bounds = array<i64: 8, 64>}]} {
    %c0 = arith.constant 0 : index
    %c0_0 = arith.constant 0 : index
    %0 = vector.load %arg2[%c0, %c0_0] : memref<2x64xf32, #tpu.memory_space<vmem>>, vector<2x64xf32>
    %1 = vector.extract_strided_slice %0 {offsets = [0, 0], sizes = [1, 64], strides = [1, 1]} : vector<2x64xf32> to vector<1x64xf32>
    %cst = arith.constant 1.250000e-01 : f32
    %2 = vector.broadcast %cst : f32 to vector<1x64xf32>
    %3 = arith.mulf %1, %2 : vector<1x64xf32>
    %4 = vector.extract_strided_slice %0 {offsets = [1, 0], sizes = [1, 64], strides = [1, 1]} : vector<2x64xf32> to vector<1x64xf32>
    %cst_1 = arith.constant 1.250000e-01 : f32
    %5 = vector.broadcast %cst_1 : f32 to vector<1x64xf32>
    %6 = arith.mulf %4, %5 : vector<1x64xf32>
    %7 = arith.mulf %3, %3 : vector<1x64xf32>
    %8 = arith.subf %6, %7 : vector<1x64xf32>
    %cst_2 = arith.constant 0.000000e+00 : f32
    %9 = vector.broadcast %cst_2 : f32 to vector<1x64xf32>
    %10 = arith.maximumf %8, %9 : vector<1x64xf32>
    %c0_3 = arith.constant 0 : index
    %c0_4 = arith.constant 0 : index
    %11 = vector.load %arg3[%c0_3, %c0_4] : memref<1x64xf32, #tpu.memory_space<vmem>>, vector<1x64xf32>
    %cst_5 = arith.constant 9.99999974E-6 : f32
    %12 = vector.broadcast %cst_5 : f32 to vector<1x64xf32>
    %13 = arith.addf %10, %12 : vector<1x64xf32>
    %14 = math.rsqrt %13 : vector<1x64xf32>
    %15 = arith.mulf %11, %14 : vector<1x64xf32>
    %c0_6 = arith.constant 0 : index
    %c0_7 = arith.constant 0 : index
    %16 = vector.load %arg4[%c0_6, %c0_7] : memref<1x64xf32, #tpu.memory_space<vmem>>, vector<1x64xf32>
    %17 = arith.mulf %3, %15 : vector<1x64xf32>
    %18 = arith.subf %16, %17 : vector<1x64xf32>
    %c0_8 = arith.constant 0 : index
    %c0_9 = arith.constant 0 : index
    %19 = vector.load %arg1[%c0_8, %c0_9] : memref<8x64xf32, #tpu.memory_space<vmem>>, vector<8x64xf32>
    %20 = vector.broadcast %15 : vector<1x64xf32> to vector<8x64xf32>
    %21 = arith.mulf %19, %20 : vector<8x64xf32>
    %22 = vector.broadcast %18 : vector<1x64xf32> to vector<8x64xf32>
    %23 = arith.addf %21, %22 : vector<8x64xf32>
    %c0_10 = arith.constant 0 : index
    %c0_11 = arith.constant 0 : index
    %24 = vector.load %arg5[%c0_10, %c0_11] : memref<8x64xf32, #tpu.memory_space<vmem>>, vector<8x64xf32>
    tpu.vector_store %arg5[%c0_10, %c0_11], %23 {strides = array<i32>} : memref<8x64xf32, #tpu.memory_space<vmem>>, vector<8x64xf32>,
    return
  }
  func.func @transform_0(%arg0: i32) -> (i32, i32) {
    %c0_i32 = arith.constant 0 : i32
    %c0_i32_0 = arith.constant 0 : i32
    return %arg0, %c0_i32 : i32, i32
  }
  func.func @transform_1(%arg0: i32) -> (i32, i32) {
    %c0_i32 = arith.constant 0 : i32
    %c0_i32_0 = arith.constant 0 : i32
    %c0_i32_1 = arith.constant 0 : i32
    return %c0_i32, %c0_i32_0 : i32, i32
  }
  func.func @transform_2(%arg0: i32) -> (i32, i32) {
    %c0_i32 = arith.constant 0 : i32
    %c0_i32_0 = arith.constant 0 : i32
    %c0_i32_1 = arith.constant 0 : i32
    return %c0_i32, %c0_i32_0 : i32, i32
  }
  func.func @transform_3(%arg0: i32) -> (i32, i32) {
    %c0_i32 = arith.constant 0 : i32
    %c0_i32_0 = arith.constant 0 : i32
    %c0_i32_1 = arith.constant 0 : i32
    return %c0_i32, %c0_i32_0 : i32, i32
  }
  func.func @transform_4(%arg0: i32) -> (i32, i32) {
    %c0_i32 = arith.constant 0 : i32
    %c0_i32_0 = arith.constant 0 : i32
    return %arg0, %c0_i32 : i32, i32
  }
}

module attributes {stable_mosaic.version = 11 : i64} {
  func.func @_gemm_kernel(%arg0: i32, %arg1: i32, %arg2: i32, %arg3: i32, %arg4: memref<1x16x512xbf16, #tpu.memory_space<vmem>>, %arg5: memref<1x512x128xbf16, #tpu.memory_space<vmem>>, %arg6: memref<1x1x128xf32, #tpu.memory_space<vmem>>, %arg7: memref<1x16x128xf32, #tpu.memory_space<vmem>>, %arg8: memref<16x128xf32, #tpu.memory_space<vmem>>) attributes {dimension_semantics = [#tpu.dimension_semantics<parallel>, #tpu.dimension_semantics<parallel>, #tpu.dimension_semantics<parallel>, #tpu.dimension_semantics<arbitrary>], iteration_bounds = array<i64: 1, 1, 1, 2>, scalar_prefetch = 0 : i64, scratch_operands = 1 : i64, tpu.core_type = #tpu.core_type<tc>, window_params = [{transform_indices = @transform_0, window_bounds = array<i64: 1, 16, 512>}, {transform_indices = @transform_1, window_bounds = array<i64: 1, 512, 128>}, {transform_indices = @transform_2, window_bounds = array<i64: 1, 1, 128>}, {transform_indices = @transform_3, window_bounds = array<i64: 1, 16, 128>}]} {
    %c0_i32 = arith.constant 0 : i32
    %0 = arith.cmpi eq, %arg3, %c0_i32 : i32
    %1 = arith.extui %0 : i1 to i32
    %c0_i32_0 = arith.constant 0 : i32
    %2 = arith.cmpi ne, %1, %c0_i32_0 : i32
    scf.if %2 {
      %cst_13 = arith.constant 0.000000e+00 : f32
      %19 = vector.broadcast %cst_13 : f32 to vector<16x128xf32>
      %c0_14 = arith.constant 0 : index
      %c0_15 = arith.constant 0 : index
      %20 = vector.load %arg8[%c0_14, %c0_15] : memref<16x128xf32, #tpu.memory_space<vmem>>, vector<16x128xf32>
      tpu.vector_store %arg8[%c0_14, %c0_15], %19 {strides = array<i32>} : memref<16x128xf32, #tpu.memory_space<vmem>>, vector<16x128xf32>,
    } else {
    }
    %c0 = arith.constant 0 : index
    %c0_1 = arith.constant 0 : index
    %c0_2 = arith.constant 0 : index
    %3 = vector.load %arg4[%c0, %c0_1, %c0_2] : memref<1x16x512xbf16, #tpu.memory_space<vmem>>, vector<1x16x512xbf16>
    %4 = vector.shape_cast %3 : vector<1x16x512xbf16> to vector<16x512xbf16>
    %cst = arith.constant 0.000000e+00 : bf16
    %5 = vector.broadcast %cst : bf16 to vector<16x512xbf16>
    %6 = arith.cmpf ogt, %4, %5 : vector<16x512xbf16>
    %cst_3 = arith.constant 2.001950e-01 : bf16
    %7 = vector.broadcast %cst_3 : bf16 to vector<16x512xbf16>
    %8 = arith.mulf %7, %4 : vector<16x512xbf16>
    %9 = arith.select %6, %4, %8 : vector<16x512xi1>, vector<16x512xbf16>
    %c0_4 = arith.constant 0 : index
    %c0_5 = arith.constant 0 : index
    %10 = vector.load %arg8[%c0_4, %c0_5] : memref<16x128xf32, #tpu.memory_space<vmem>>, vector<16x128xf32>
    %c0_6 = arith.constant 0 : index
    %c0_7 = arith.constant 0 : index
    %c0_8 = arith.constant 0 : index
    %11 = vector.load %arg5[%c0_6, %c0_7, %c0_8] : memref<1x512x128xbf16, #tpu.memory_space<vmem>>, vector<1x512x128xbf16>
    %12 = vector.shape_cast %11 : vector<1x512x128xbf16> to vector<512x128xbf16>
    %cst_9 = arith.constant dense<0.000000e+00> : vector<16x128xf32>
    %13 = tpu.matmul %9, %12, %cst_9 {dimension_numbers = #tpu.dot_dimension_numbers<[1], [0], [0], [1], [0, 0, 1, 1], [], []>} : vector<16x512xbf16>, vector<512x128xbf16>, vector<16x128xf32> -> vector<16x128xf32>
    %14 = arith.addf %10, %13 : vector<16x128xf32>
    %c0_10 = arith.constant 0 : index
    %c0_11 = arith.constant 0 : index
    %15 = vector.load %arg8[%c0_10, %c0_11] : memref<16x128xf32, #tpu.memory_space<vmem>>, vector<16x128xf32>
    tpu.vector_store %arg8[%c0_10, %c0_11], %14 {strides = array<i32>} : memref<16x128xf32, #tpu.memory_space<vmem>>, vector<16x128xf32>,
    %c1_i32 = arith.constant 1 : i32
    %16 = arith.cmpi eq, %arg3, %c1_i32 : i32
    %17 = arith.extui %16 : i1 to i32
    %c0_i32_12 = arith.constant 0 : i32
    %18 = arith.cmpi ne, %17, %c0_i32_12 : i32
    scf.if %18 {
      %c0_13 = arith.constant 0 : index
      %c0_14 = arith.constant 0 : index
      %19 = vector.load %arg8[%c0_13, %c0_14] : memref<16x128xf32, #tpu.memory_space<vmem>>, vector<16x128xf32>
      %c0_15 = arith.constant 0 : index
      %c0_16 = arith.constant 0 : index
      %c0_17 = arith.constant 0 : index
      %20 = vector.load %arg6[%c0_15, %c0_16, %c0_17] : memref<1x1x128xf32, #tpu.memory_space<vmem>>, vector<1x1x128xf32>
      %21 = vector.shape_cast %20 : vector<1x1x128xf32> to vector<1x128xf32>
      %22 = vector.broadcast %21 : vector<1x128xf32> to vector<16x128xf32>
      %23 = arith.addf %19, %22 : vector<16x128xf32>
      %c0_18 = arith.constant 0 : index
      %c0_19 = arith.constant 0 : index
      %c0_20 = arith.constant 0 : index
      %24 = vector.load %arg7[%c0_18, %c0_19, %c0_20] : memref<1x16x128xf32, #tpu.memory_space<vmem>>, vector<1x16x128xf32>
      %25 = vector.shape_cast %24 : vector<1x16x128xf32> to vector<16x128xf32>
      %26 = vector.shape_cast %23 : vector<16x128xf32> to vector<1x16x128xf32>
      tpu.vector_store %arg7[%c0_18, %c0_19, %c0_20], %26 {strides = array<i32>} : memref<1x16x128xf32, #tpu.memory_space<vmem>>, vector<1x16x128xf32>,
    } else {
    }
    return
  }
  func.func @transform_0(%arg0: i32, %arg1: i32, %arg2: i32, %arg3: i32) -> (i32, i32, i32) {
    %c0_i32 = arith.constant 0 : i32
    return %arg0, %arg1, %arg3 : i32, i32, i32
  }
  func.func @transform_1(%arg0: i32, %arg1: i32, %arg2: i32, %arg3: i32) -> (i32, i32, i32) {
    %c0_i32 = arith.constant 0 : i32
    return %arg0, %arg3, %arg2 : i32, i32, i32
  }
  func.func @transform_2(%arg0: i32, %arg1: i32, %arg2: i32, %arg3: i32) -> (i32, i32, i32) {
    %c0_i32 = arith.constant 0 : i32
    %c0_i32_0 = arith.constant 0 : i32
    return %arg0, %c0_i32, %arg2 : i32, i32, i32
  }
  func.func @transform_3(%arg0: i32, %arg1: i32, %arg2: i32, %arg3: i32) -> (i32, i32, i32) {
    %c0_i32 = arith.constant 0 : i32
    return %arg0, %arg1, %arg2 : i32, i32, i32
  }
}

module attributes {stable_mosaic.version = 11 : i64} {
  func.func @_gemm_kernel(%arg0: i32, %arg1: i32, %arg2: i32, %arg3: i32, %arg4: memref<1x16x256xbf16, #tpu.memory_space<vmem>>, %arg5: memref<1x256x128xbf16, #tpu.memory_space<vmem>>, %arg6: memref<1x1x128xf32, #tpu.memory_space<vmem>>, %arg7: memref<1x16x128xf32, #tpu.memory_space<vmem>>, %arg8: memref<16x128xf32, #tpu.memory_space<vmem>>) attributes {dimension_semantics = [#tpu.dimension_semantics<parallel>, #tpu.dimension_semantics<parallel>, #tpu.dimension_semantics<parallel>, #tpu.dimension_semantics<arbitrary>], iteration_bounds = array<i64: 4, 1, 1, 1>, scalar_prefetch = 0 : i64, scratch_operands = 1 : i64, tpu.core_type = #tpu.core_type<tc>, window_params = [{transform_indices = @transform_0, window_bounds = array<i64: 1, 16, 256>}, {transform_indices = @transform_1, window_bounds = array<i64: 1, 256, 128>}, {transform_indices = @transform_2, window_bounds = array<i64: 1, 1, 128>}, {transform_indices = @transform_3, window_bounds = array<i64: 1, 16, 128>}]} {
    %c0_i32 = arith.constant 0 : i32
    %0 = arith.cmpi eq, %arg3, %c0_i32 : i32
    %1 = arith.extui %0 : i1 to i32
    %c0_i32_0 = arith.constant 0 : i32
    %2 = arith.cmpi ne, %1, %c0_i32_0 : i32
    scf.if %2 {
      %cst_13 = arith.constant 0.000000e+00 : f32
      %16 = vector.broadcast %cst_13 : f32 to vector<16x128xf32>
      %c0_14 = arith.constant 0 : index
      %c0_15 = arith.constant 0 : index
      %17 = vector.load %arg8[%c0_14, %c0_15] : memref<16x128xf32, #tpu.memory_space<vmem>>, vector<16x128xf32>
      tpu.vector_store %arg8[%c0_14, %c0_15], %16 {strides = array<i32>} : memref<16x128xf32, #tpu.memory_space<vmem>>, vector<16x128xf32>,
    } else {
    }
    %c0 = arith.constant 0 : index
    %c0_1 = arith.constant 0 : index
    %c0_2 = arith.constant 0 : index
    %3 = vector.load %arg4[%c0, %c0_1, %c0_2] : memref<1x16x256xbf16, #tpu.memory_space<vmem>>, vector<1x16x256xbf16>
    %4 = vector.shape_cast %3 : vector<1x16x256xbf16> to vector<16x256xbf16>
    %cst = arith.constant 0.000000e+00 : bf16
    %5 = vector.broadcast %cst : bf16 to vector<16x256xbf16>
    %6 = arith.maximumf %4, %5 : vector<16x256xbf16>
    %c0_3 = arith.constant 0 : index
    %c0_4 = arith.constant 0 : index
    %7 = vector.load %arg8[%c0_3, %c0_4] : memref<16x128xf32, #tpu.memory_space<vmem>>, vector<16x128xf32>
    %c0_5 = arith.constant 0 : index
    %c0_6 = arith.constant 0 : index
    %c0_7 = arith.constant 0 : index
    %8 = vector.load %arg5[%c0_5, %c0_6, %c0_7] : memref<1x256x128xbf16, #tpu.memory_space<vmem>>, vector<1x256x128xbf16>
    %9 = vector.shape_cast %8 : vector<1x256x128xbf16> to vector<256x128xbf16>
    %cst_8 = arith.constant dense<0.000000e+00> : vector<16x128xf32>
    %10 = tpu.matmul %6, %9, %cst_8 {dimension_numbers = #tpu.dot_dimension_numbers<[1], [0], [0], [1], [0, 0, 1, 1], [], []>} : vector<16x256xbf16>, vector<256x128xbf16>, vector<16x128xf32> -> vector<16x128xf32>
    %11 = arith.addf %7, %10 : vector<16x128xf32>
    %c0_9 = arith.constant 0 : index
    %c0_10 = arith.constant 0 : index
    %12 = vector.load %arg8[%c0_9, %c0_10] : memref<16x128xf32, #tpu.memory_space<vmem>>, vector<16x128xf32>
    tpu.vector_store %arg8[%c0_9, %c0_10], %11 {strides = array<i32>} : memref<16x128xf32, #tpu.memory_space<vmem>>, vector<16x128xf32>,
    %c0_i32_11 = arith.constant 0 : i32
    %13 = arith.cmpi eq, %arg3, %c0_i32_11 : i32
    %14 = arith.extui %13 : i1 to i32
    %c0_i32_12 = arith.constant 0 : i32
    %15 = arith.cmpi ne, %14, %c0_i32_12 : i32
    scf.if %15 {
      %c0_13 = arith.constant 0 : index
      %c0_14 = arith.constant 0 : index
      %16 = vector.load %arg8[%c0_13, %c0_14] : memref<16x128xf32, #tpu.memory_space<vmem>>, vector<16x128xf32>
      %c0_15 = arith.constant 0 : index
      %c0_16 = arith.constant 0 : index
      %c0_17 = arith.constant 0 : index
      %17 = vector.load %arg6[%c0_15, %c0_16, %c0_17] : memref<1x1x128xf32, #tpu.memory_space<vmem>>, vector<1x1x128xf32>
      %18 = vector.shape_cast %17 : vector<1x1x128xf32> to vector<1x128xf32>
      %19 = vector.broadcast %18 : vector<1x128xf32> to vector<16x128xf32>
      %20 = arith.addf %16, %19 : vector<16x128xf32>
      %c0_18 = arith.constant 0 : index
      %c0_19 = arith.constant 0 : index
      %c0_20 = arith.constant 0 : index
      %21 = vector.load %arg7[%c0_18, %c0_19, %c0_20] : memref<1x16x128xf32, #tpu.memory_space<vmem>>, vector<1x16x128xf32>
      %22 = vector.shape_cast %21 : vector<1x16x128xf32> to vector<16x128xf32>
      %23 = vector.shape_cast %20 : vector<16x128xf32> to vector<1x16x128xf32>
      tpu.vector_store %arg7[%c0_18, %c0_19, %c0_20], %23 {strides = array<i32>} : memref<1x16x128xf32, #tpu.memory_space<vmem>>, vector<1x16x128xf32>,
    } else {
    }
    return
  }
  func.func @transform_0(%arg0: i32, %arg1: i32, %arg2: i32, %arg3: i32) -> (i32, i32, i32) {
    %c0_i32 = arith.constant 0 : i32
    return %arg0, %arg1, %arg3 : i32, i32, i32
  }
  func.func @transform_1(%arg0: i32, %arg1: i32, %arg2: i32, %arg3: i32) -> (i32, i32, i32) {
    %c0_i32 = arith.constant 0 : i32
    return %arg0, %arg3, %arg2 : i32, i32, i32
  }
  func.func @transform_2(%arg0: i32, %arg1: i32, %arg2: i32, %arg3: i32) -> (i32, i32, i32) {
    %c0_i32 = arith.constant 0 : i32
    %c0_i32_0 = arith.constant 0 : i32
    return %arg0, %c0_i32, %arg2 : i32, i32, i32
  }
  func.func @transform_3(%arg0: i32, %arg1: i32, %arg2: i32, %arg3: i32) -> (i32, i32, i32) {
    %c0_i32 = arith.constant 0 : i32
    return %arg0, %arg1, %arg2 : i32, i32, i32
  }
}

module attributes {stable_mosaic.version = 11 : i64} {
  func.func @_gemm_kernel(%arg0: i32, %arg1: i32, %arg2: i32, %arg3: i32, %arg4: memref<1x16x512xbf16, #tpu.memory_space<vmem>>, %arg5: memref<1x512x128xbf16, #tpu.memory_space<vmem>>, %arg6: memref<1x1x128xf32, #tpu.memory_space<vmem>>, %arg7: memref<1x16x128xf32, #tpu.memory_space<vmem>>, %arg8: memref<16x128xf32, #tpu.memory_space<vmem>>) attributes {dimension_semantics = [#tpu.dimension_semantics<parallel>, #tpu.dimension_semantics<parallel>, #tpu.dimension_semantics<parallel>, #tpu.dimension_semantics<arbitrary>], iteration_bounds = array<i64: 4, 1, 1, 1>, scalar_prefetch = 0 : i64, scratch_operands = 1 : i64, tpu.core_type = #tpu.core_type<tc>, window_params = [{transform_indices = @transform_0, window_bounds = array<i64: 1, 16, 512>}, {transform_indices = @transform_1, window_bounds = array<i64: 1, 512, 128>}, {transform_indices = @transform_2, window_bounds = array<i64: 1, 1, 128>}, {transform_indices = @transform_3, window_bounds = array<i64: 1, 16, 128>}]} {
    %c0_i32 = arith.constant 0 : i32
    %0 = arith.cmpi eq, %arg3, %c0_i32 : i32
    %1 = arith.extui %0 : i1 to i32
    %c0_i32_0 = arith.constant 0 : i32
    %2 = arith.cmpi ne, %1, %c0_i32_0 : i32
    scf.if %2 {
      %cst_13 = arith.constant 0.000000e+00 : f32
      %16 = vector.broadcast %cst_13 : f32 to vector<16x128xf32>
      %c0_14 = arith.constant 0 : index
      %c0_15 = arith.constant 0 : index
      %17 = vector.load %arg8[%c0_14, %c0_15] : memref<16x128xf32, #tpu.memory_space<vmem>>, vector<16x128xf32>
      tpu.vector_store %arg8[%c0_14, %c0_15], %16 {strides = array<i32>} : memref<16x128xf32, #tpu.memory_space<vmem>>, vector<16x128xf32>,
    } else {
    }
    %c0 = arith.constant 0 : index
    %c0_1 = arith.constant 0 : index
    %c0_2 = arith.constant 0 : index
    %3 = vector.load %arg4[%c0, %c0_1, %c0_2] : memref<1x16x512xbf16, #tpu.memory_space<vmem>>, vector<1x16x512xbf16>
    %4 = vector.shape_cast %3 : vector<1x16x512xbf16> to vector<16x512xbf16>
    %cst = arith.constant 0.000000e+00 : bf16
    %5 = vector.broadcast %cst : bf16 to vector<16x512xbf16>
    %6 = arith.maximumf %4, %5 : vector<16x512xbf16>
    %c0_3 = arith.constant 0 : index
    %c0_4 = arith.constant 0 : index
    %7 = vector.load %arg8[%c0_3, %c0_4] : memref<16x128xf32, #tpu.memory_space<vmem>>, vector<16x128xf32>
    %c0_5 = arith.constant 0 : index
    %c0_6 = arith.constant 0 : index
    %c0_7 = arith.constant 0 : index
    %8 = vector.load %arg5[%c0_5, %c0_6, %c0_7] : memref<1x512x128xbf16, #tpu.memory_space<vmem>>, vector<1x512x128xbf16>
    %9 = vector.shape_cast %8 : vector<1x512x128xbf16> to vector<512x128xbf16>
    %cst_8 = arith.constant dense<0.000000e+00> : vector<16x128xf32>
    %10 = tpu.matmul %6, %9, %cst_8 {dimension_numbers = #tpu.dot_dimension_numbers<[1], [0], [0], [1], [0, 0, 1, 1], [], []>} : vector<16x512xbf16>, vector<512x128xbf16>, vector<16x128xf32> -> vector<16x128xf32>
    %11 = arith.addf %7, %10 : vector<16x128xf32>
    %c0_9 = arith.constant 0 : index
    %c0_10 = arith.constant 0 : index
    %12 = vector.load %arg8[%c0_9, %c0_10] : memref<16x128xf32, #tpu.memory_space<vmem>>, vector<16x128xf32>
    tpu.vector_store %arg8[%c0_9, %c0_10], %11 {strides = array<i32>} : memref<16x128xf32, #tpu.memory_space<vmem>>, vector<16x128xf32>,
    %c0_i32_11 = arith.constant 0 : i32
    %13 = arith.cmpi eq, %arg3, %c0_i32_11 : i32
    %14 = arith.extui %13 : i1 to i32
    %c0_i32_12 = arith.constant 0 : i32
    %15 = arith.cmpi ne, %14, %c0_i32_12 : i32
    scf.if %15 {
      %c0_13 = arith.constant 0 : index
      %c0_14 = arith.constant 0 : index
      %16 = vector.load %arg8[%c0_13, %c0_14] : memref<16x128xf32, #tpu.memory_space<vmem>>, vector<16x128xf32>
      %c0_15 = arith.constant 0 : index
      %c0_16 = arith.constant 0 : index
      %c0_17 = arith.constant 0 : index
      %17 = vector.load %arg6[%c0_15, %c0_16, %c0_17] : memref<1x1x128xf32, #tpu.memory_space<vmem>>, vector<1x1x128xf32>
      %18 = vector.shape_cast %17 : vector<1x1x128xf32> to vector<1x128xf32>
      %19 = vector.broadcast %18 : vector<1x128xf32> to vector<16x128xf32>
      %20 = arith.addf %16, %19 : vector<16x128xf32>
      %c0_18 = arith.constant 0 : index
      %c0_19 = arith.constant 0 : index
      %c0_20 = arith.constant 0 : index
      %21 = vector.load %arg7[%c0_18, %c0_19, %c0_20] : memref<1x16x128xf32, #tpu.memory_space<vmem>>, vector<1x16x128xf32>
      %22 = vector.shape_cast %21 : vector<1x16x128xf32> to vector<16x128xf32>
      %23 = vector.shape_cast %20 : vector<16x128xf32> to vector<1x16x128xf32>
      tpu.vector_store %arg7[%c0_18, %c0_19, %c0_20], %23 {strides = array<i32>} : memref<1x16x128xf32, #tpu.memory_space<vmem>>, vector<1x16x128xf32>,
    } else {
    }
    return
  }
  func.func @transform_0(%arg0: i32, %arg1: i32, %arg2: i32, %arg3: i32) -> (i32, i32, i32) {
    %c0_i32 = arith.constant 0 : i32
    return %arg0, %arg1, %arg3 : i32, i32, i32
  }
  func.func @transform_1(%arg0: i32, %arg1: i32, %arg2: i32, %arg3: i32) -> (i32, i32, i32) {
    %c0_i32 = arith.constant 0 : i32
    return %arg0, %arg3, %arg2 : i32, i32, i32
  }
  func.func @transform_2(%arg0: i32, %arg1: i32, %arg2: i32, %arg3: i32) -> (i32, i32, i32) {
    %c0_i32 = arith.constant 0 : i32
    %c0_i32_0 = arith.constant 0 : i32
    return %arg0, %c0_i32, %arg2 : i32, i32, i32
  }
  func.func @transform_3(%arg0: i32, %arg1: i32, %arg2: i32, %arg3: i32) -> (i32, i32, i32) {
    %c0_i32 = arith.constant 0 : i32
    return %arg0, %arg1, %arg2 : i32, i32, i32
  }
}

module attributes {stable_mosaic.version = 11 : i64} {
  func.func @_gemm_kernel(%arg0: i32, %arg1: i32, %arg2: i32, %arg3: i32, %arg4: memref<1x32x256xbf16, #tpu.memory_space<vmem>>, %arg5: memref<1x256x128xbf16, #tpu.memory_space<vmem>>, %arg6: memref<1x1x128xf32, #tpu.memory_space<vmem>>, %arg7: memref<1x32x128xf32, #tpu.memory_space<vmem>>, %arg8: memref<32x128xf32, #tpu.memory_space<vmem>>) attributes {dimension_semantics = [#tpu.dimension_semantics<parallel>, #tpu.dimension_semantics<parallel>, #tpu.dimension_semantics<parallel>, #tpu.dimension_semantics<arbitrary>], iteration_bounds = array<i64: 4, 1, 1, 1>, scalar_prefetch = 0 : i64, scratch_operands = 1 : i64, tpu.core_type = #tpu.core_type<tc>, window_params = [{transform_indices = @transform_0, window_bounds = array<i64: 1, 32, 256>}, {transform_indices = @transform_1, window_bounds = array<i64: 1, 256, 128>}, {transform_indices = @transform_2, window_bounds = array<i64: 1, 1, 128>}, {transform_indices = @transform_3, window_bounds = array<i64: 1, 32, 128>}]} {
    %c0_i32 = arith.constant 0 : i32
    %0 = arith.cmpi eq, %arg3, %c0_i32 : i32
    %1 = arith.extui %0 : i1 to i32
    %c0_i32_0 = arith.constant 0 : i32
    %2 = arith.cmpi ne, %1, %c0_i32_0 : i32
    scf.if %2 {
      %cst_13 = arith.constant 0.000000e+00 : f32
      %16 = vector.broadcast %cst_13 : f32 to vector<32x128xf32>
      %c0_14 = arith.constant 0 : index
      %c0_15 = arith.constant 0 : index
      %17 = vector.load %arg8[%c0_14, %c0_15] : memref<32x128xf32, #tpu.memory_space<vmem>>, vector<32x128xf32>
      tpu.vector_store %arg8[%c0_14, %c0_15], %16 {strides = array<i32>} : memref<32x128xf32, #tpu.memory_space<vmem>>, vector<32x128xf32>,
    } else {
    }
    %c0 = arith.constant 0 : index
    %c0_1 = arith.constant 0 : index
    %c0_2 = arith.constant 0 : index
    %3 = vector.load %arg4[%c0, %c0_1, %c0_2] : memref<1x32x256xbf16, #tpu.memory_space<vmem>>, vector<1x32x256xbf16>
    %4 = vector.shape_cast %3 : vector<1x32x256xbf16> to vector<32x256xbf16>
    %cst = arith.constant 0.000000e+00 : bf16
    %5 = vector.broadcast %cst : bf16 to vector<32x256xbf16>
    %6 = arith.maximumf %4, %5 : vector<32x256xbf16>
    %c0_3 = arith.constant 0 : index
    %c0_4 = arith.constant 0 : index
    %7 = vector.load %arg8[%c0_3, %c0_4] : memref<32x128xf32, #tpu.memory_space<vmem>>, vector<32x128xf32>
    %c0_5 = arith.constant 0 : index
    %c0_6 = arith.constant 0 : index
    %c0_7 = arith.constant 0 : index
    %8 = vector.load %arg5[%c0_5, %c0_6, %c0_7] : memref<1x256x128xbf16, #tpu.memory_space<vmem>>, vector<1x256x128xbf16>
    %9 = vector.shape_cast %8 : vector<1x256x128xbf16> to vector<256x128xbf16>
    %cst_8 = arith.constant dense<0.000000e+00> : vector<32x128xf32>
    %10 = tpu.matmul %6, %9, %cst_8 {dimension_numbers = #tpu.dot_dimension_numbers<[1], [0], [0], [1], [0, 0, 1, 1], [], []>} : vector<32x256xbf16>, vector<256x128xbf16>, vector<32x128xf32> -> vector<32x128xf32>
    %11 = arith.addf %7, %10 : vector<32x128xf32>
    %c0_9 = arith.constant 0 : index
    %c0_10 = arith.constant 0 : index
    %12 = vector.load %arg8[%c0_9, %c0_10] : memref<32x128xf32, #tpu.memory_space<vmem>>, vector<32x128xf32>
    tpu.vector_store %arg8[%c0_9, %c0_10], %11 {strides = array<i32>} : memref<32x128xf32, #tpu.memory_space<vmem>>, vector<32x128xf32>,
    %c0_i32_11 = arith.constant 0 : i32
    %13 = arith.cmpi eq, %arg3, %c0_i32_11 : i32
    %14 = arith.extui %13 : i1 to i32
    %c0_i32_12 = arith.constant 0 : i32
    %15 = arith.cmpi ne, %14, %c0_i32_12 : i32
    scf.if %15 {
      %c0_13 = arith.constant 0 : index
      %c0_14 = arith.constant 0 : index
      %16 = vector.load %arg8[%c0_13, %c0_14] : memref<32x128xf32, #tpu.memory_space<vmem>>, vector<32x128xf32>
      %c0_15 = arith.constant 0 : index
      %c0_16 = arith.constant 0 : index
      %c0_17 = arith.constant 0 : index
      %17 = vector.load %arg6[%c0_15, %c0_16, %c0_17] : memref<1x1x128xf32, #tpu.memory_space<vmem>>, vector<1x1x128xf32>
      %18 = vector.shape_cast %17 : vector<1x1x128xf32> to vector<1x128xf32>
      %19 = vector.broadcast %18 : vector<1x128xf32> to vector<32x128xf32>
      %20 = arith.addf %16, %19 : vector<32x128xf32>
      %c0_18 = arith.constant 0 : index
      %c0_19 = arith.constant 0 : index
      %c0_20 = arith.constant 0 : index
      %21 = vector.load %arg7[%c0_18, %c0_19, %c0_20] : memref<1x32x128xf32, #tpu.memory_space<vmem>>, vector<1x32x128xf32>
      %22 = vector.shape_cast %21 : vector<1x32x128xf32> to vector<32x128xf32>
      %23 = vector.shape_cast %20 : vector<32x128xf32> to vector<1x32x128xf32>
      tpu.vector_store %arg7[%c0_18, %c0_19, %c0_20], %23 {strides = array<i32>} : memref<1x32x128xf32, #tpu.memory_space<vmem>>, vector<1x32x128xf32>,
    } else {
    }
    return
  }
  func.func @transform_0(%arg0: i32, %arg1: i32, %arg2: i32, %arg3: i32) -> (i32, i32, i32) {
    %c0_i32 = arith.constant 0 : i32
    return %arg0, %arg1, %arg3 : i32, i32, i32
  }
  func.func @transform_1(%arg0: i32, %arg1: i32, %arg2: i32, %arg3: i32) -> (i32, i32, i32) {
    %c0_i32 = arith.constant 0 : i32
    return %arg0, %arg3, %arg2 : i32, i32, i32
  }
  func.func @transform_2(%arg0: i32, %arg1: i32, %arg2: i32, %arg3: i32) -> (i32, i32, i32) {
    %c0_i32 = arith.constant 0 : i32
    %c0_i32_0 = arith.constant 0 : i32
    return %arg0, %c0_i32, %arg2 : i32, i32, i32
  }
  func.func @transform_3(%arg0: i32, %arg1: i32, %arg2: i32, %arg3: i32) -> (i32, i32, i32) {
    %c0_i32 = arith.constant 0 : i32
    return %arg0, %arg1, %arg2 : i32, i32, i32
  }
}

module attributes {stable_mosaic.version = 11 : i64} {
  func.func @_gemm_kernel(%arg0: i32, %arg1: i32, %arg2: i32, %arg3: i32, %arg4: memref<1x128x128xbf16, #tpu.memory_space<vmem>>, %arg5: memref<1x128x128xbf16, #tpu.memory_space<vmem>>, %arg6: memref<1x1x128xf32, #tpu.memory_space<vmem>>, %arg7: memref<1x128x128xf32, #tpu.memory_space<vmem>>, %arg8: memref<128x128xf32, #tpu.memory_space<vmem>>) attributes {dimension_semantics = [#tpu.dimension_semantics<parallel>, #tpu.dimension_semantics<parallel>, #tpu.dimension_semantics<parallel>, #tpu.dimension_semantics<arbitrary>], iteration_bounds = array<i64: 4, 1, 1, 1>, scalar_prefetch = 0 : i64, scratch_operands = 1 : i64, tpu.core_type = #tpu.core_type<tc>, window_params = [{transform_indices = @transform_0, window_bounds = array<i64: 1, 128, 128>}, {transform_indices = @transform_1, window_bounds = array<i64: 1, 128, 128>}, {transform_indices = @transform_2, window_bounds = array<i64: 1, 1, 128>}, {transform_indices = @transform_3, window_bounds = array<i64: 1, 128, 128>}]} {
    %c0_i32 = arith.constant 0 : i32
    %0 = arith.cmpi eq, %arg3, %c0_i32 : i32
    %1 = arith.extui %0 : i1 to i32
    %c0_i32_0 = arith.constant 0 : i32
    %2 = arith.cmpi ne, %1, %c0_i32_0 : i32
    scf.if %2 {
      %cst_13 = arith.constant 0.000000e+00 : f32
      %16 = vector.broadcast %cst_13 : f32 to vector<128x128xf32>
      %c0_14 = arith.constant 0 : index
      %c0_15 = arith.constant 0 : index
      %17 = vector.load %arg8[%c0_14, %c0_15] : memref<128x128xf32, #tpu.memory_space<vmem>>, vector<128x128xf32>
      tpu.vector_store %arg8[%c0_14, %c0_15], %16 {strides = array<i32>} : memref<128x128xf32, #tpu.memory_space<vmem>>, vector<128x128xf32>,
    } else {
    }
    %c0 = arith.constant 0 : index
    %c0_1 = arith.constant 0 : index
    %c0_2 = arith.constant 0 : index
    %3 = vector.load %arg4[%c0, %c0_1, %c0_2] : memref<1x128x128xbf16, #tpu.memory_space<vmem>>, vector<1x128x128xbf16>
    %4 = vector.shape_cast %3 : vector<1x128x128xbf16> to vector<128x128xbf16>
    %cst = arith.constant 0.000000e+00 : bf16
    %5 = vector.broadcast %cst : bf16 to vector<128x128xbf16>
    %6 = arith.maximumf %4, %5 : vector<128x128xbf16>
    %c0_3 = arith.constant 0 : index
    %c0_4 = arith.constant 0 : index
    %7 = vector.load %arg8[%c0_3, %c0_4] : memref<128x128xf32, #tpu.memory_space<vmem>>, vector<128x128xf32>
    %c0_5 = arith.constant 0 : index
    %c0_6 = arith.constant 0 : index
    %c0_7 = arith.constant 0 : index
    %8 = vector.load %arg5[%c0_5, %c0_6, %c0_7] : memref<1x128x128xbf16, #tpu.memory_space<vmem>>, vector<1x128x128xbf16>
    %9 = vector.shape_cast %8 : vector<1x128x128xbf16> to vector<128x128xbf16>
    %cst_8 = arith.constant dense<0.000000e+00> : vector<128x128xf32>
    %10 = tpu.matmul %6, %9, %cst_8 {dimension_numbers = #tpu.dot_dimension_numbers<[1], [0], [0], [1], [0, 0, 1, 1], [], []>} : vector<128x128xbf16>, vector<128x128xbf16>, vector<128x128xf32> -> vector<128x128xf32>
    %11 = arith.addf %7, %10 : vector<128x128xf32>
    %c0_9 = arith.constant 0 : index
    %c0_10 = arith.constant 0 : index
    %12 = vector.load %arg8[%c0_9, %c0_10] : memref<128x128xf32, #tpu.memory_space<vmem>>, vector<128x128xf32>
    tpu.vector_store %arg8[%c0_9, %c0_10], %11 {strides = array<i32>} : memref<128x128xf32, #tpu.memory_space<vmem>>, vector<128x128xf32>,
    %c0_i32_11 = arith.constant 0 : i32
    %13 = arith.cmpi eq, %arg3, %c0_i32_11 : i32
    %14 = arith.extui %13 : i1 to i32
    %c0_i32_12 = arith.constant 0 : i32
    %15 = arith.cmpi ne, %14, %c0_i32_12 : i32
    scf.if %15 {
      %c0_13 = arith.constant 0 : index
      %c0_14 = arith.constant 0 : index
      %16 = vector.load %arg8[%c0_13, %c0_14] : memref<128x128xf32, #tpu.memory_space<vmem>>, vector<128x128xf32>
      %c0_15 = arith.constant 0 : index
      %c0_16 = arith.constant 0 : index
      %c0_17 = arith.constant 0 : index
      %17 = vector.load %arg6[%c0_15, %c0_16, %c0_17] : memref<1x1x128xf32, #tpu.memory_space<vmem>>, vector<1x1x128xf32>
      %18 = vector.shape_cast %17 : vector<1x1x128xf32> to vector<1x128xf32>
      %19 = vector.broadcast %18 : vector<1x128xf32> to vector<128x128xf32>
      %20 = arith.addf %16, %19 : vector<128x128xf32>
      %c0_18 = arith.constant 0 : index
      %c0_19 = arith.constant 0 : index
      %c0_20 = arith.constant 0 : index
      %21 = vector.load %arg7[%c0_18, %c0_19, %c0_20] : memref<1x128x128xf32, #tpu.memory_space<vmem>>, vector<1x128x128xf32>
      %22 = vector.shape_cast %21 : vector<1x128x128xf32> to vector<128x128xf32>
      %23 = vector.shape_cast %20 : vector<128x128xf32> to vector<1x128x128xf32>
      tpu.vector_store %arg7[%c0_18, %c0_19, %c0_20], %23 {strides = array<i32>} : memref<1x128x128xf32, #tpu.memory_space<vmem>>, vector<1x128x128xf32>,
    } else {
    }
    return
  }
  func.func @transform_0(%arg0: i32, %arg1: i32, %arg2: i32, %arg3: i32) -> (i32, i32, i32) {
    %c0_i32 = arith.constant 0 : i32
    return %arg0, %arg1, %arg3 : i32, i32, i32
  }
  func.func @transform_1(%arg0: i32, %arg1: i32, %arg2: i32, %arg3: i32) -> (i32, i32, i32) {
    %c0_i32 = arith.constant 0 : i32
    return %arg0, %arg3, %arg2 : i32, i32, i32
  }
  func.func @transform_2(%arg0: i32, %arg1: i32, %arg2: i32, %arg3: i32) -> (i32, i32, i32) {
    %c0_i32 = arith.constant 0 : i32
    %c0_i32_0 = arith.constant 0 : i32
    return %arg0, %c0_i32, %arg2 : i32, i32, i32
  }
  func.func @transform_3(%arg0: i32, %arg1: i32, %arg2: i32, %arg3: i32) -> (i32, i32, i32) {
    %c0_i32 = arith.constant 0 : i32
    return %arg0, %arg1, %arg2 : i32, i32, i32
  }
}

module attributes {stable_mosaic.version = 11 : i64} {
  func.func @_bn_stats_kernel(%arg0: i32, %arg1: memref<512x8xf32, #tpu.memory_space<vmem>>, %arg2: memref<2x8xf32, #tpu.memory_space<vmem>>) attributes {dimension_semantics = [#tpu.dimension_semantics<arbitrary>], iteration_bounds = array<i64: 1>, scalar_prefetch = 0 : i64, scratch_operands = 0 : i64, tpu.core_type = #tpu.core_type<tc>, window_params = [{transform_indices = @transform_0, window_bounds = array<i64: 512, 8>}, {pipeline_mode = #tpu.pipeline_mode<synchronous>, transform_indices = @transform_1, window_bounds = array<i64: 2, 8>}]} {
    %c0_i32 = arith.constant 0 : i32
    %0 = arith.cmpi eq, %arg0, %c0_i32 : i32
    %1 = arith.extui %0 : i1 to i32
    %c0_i32_0 = arith.constant 0 : i32
    %2 = arith.cmpi ne, %1, %c0_i32_0 : i32
    scf.if %2 {
      %cst_7 = arith.constant 0.000000e+00 : f32
      %13 = vector.broadcast %cst_7 : f32 to vector<2x8xf32>
      %c0_8 = arith.constant 0 : index
      %c0_9 = arith.constant 0 : index
      %14 = vector.load %arg2[%c0_8, %c0_9] : memref<2x8xf32, #tpu.memory_space<vmem>>, vector<2x8xf32>
      tpu.vector_store %arg2[%c0_8, %c0_9], %13 {strides = array<i32>} : memref<2x8xf32, #tpu.memory_space<vmem>>, vector<2x8xf32>,
    } else {
    }
    %c0 = arith.constant 0 : index
    %c0_1 = arith.constant 0 : index
    %3 = vector.load %arg1[%c0, %c0_1] : memref<512x8xf32, #tpu.memory_space<vmem>>, vector<512x8xf32>
    %c0_2 = arith.constant 0 : index
    %c0_3 = arith.constant 0 : index
    %4 = vector.load %arg2[%c0_2, %c0_3] : memref<2x8xf32, #tpu.memory_space<vmem>>, vector<2x8xf32>
    %cst = arith.constant dense<0.000000e+00> : vector<8xf32>
    %5 = vector.multi_reduction <add>, %3, %cst [0] : vector<512x8xf32> to vector<8xf32>
    %6 = vector.shape_cast %5 : vector<8xf32> to vector<1x8xf32>
    %7 = arith.mulf %3, %3 : vector<512x8xf32>
    %cst_4 = arith.constant dense<0.000000e+00> : vector<8xf32>
    %8 = vector.multi_reduction <add>, %7, %cst_4 [0] : vector<512x8xf32> to vector<8xf32>
    %9 = vector.shape_cast %8 : vector<8xf32> to vector<1x8xf32>
    %10 = tpu.concatenate %6, %9 in 0 : vector<1x8xf32>, vector<1x8xf32> -> vector<2x8xf32>
    %11 = arith.addf %4, %10 : vector<2x8xf32>
    %c0_5 = arith.constant 0 : index
    %c0_6 = arith.constant 0 : index
    %12 = vector.load %arg2[%c0_5, %c0_6] : memref<2x8xf32, #tpu.memory_space<vmem>>, vector<2x8xf32>
    tpu.vector_store %arg2[%c0_5, %c0_6], %11 {strides = array<i32>} : memref<2x8xf32, #tpu.memory_space<vmem>>, vector<2x8xf32>,
    return
  }
  func.func @transform_0(%arg0: i32) -> (i32, i32) {
    %c0_i32 = arith.constant 0 : i32
    %c0_i32_0 = arith.constant 0 : i32
    return %arg0, %c0_i32 : i32, i32
  }
  func.func @transform_1(%arg0: i32) -> (i32, i32) {
    %c0_i32 = arith.constant 0 : i32
    %c0_i32_0 = arith.constant 0 : i32
    %c0_i32_1 = arith.constant 0 : i32
    return %c0_i32, %c0_i32_0 : i32, i32
  }
}

module attributes {stable_mosaic.version = 11 : i64} {
  func.func @_bn_norm_kernel(%arg0: i32, %arg1: memref<512x8xf32, #tpu.memory_space<vmem>>, %arg2: memref<2x8xf32, #tpu.memory_space<vmem>>, %arg3: memref<1x8xf32, #tpu.memory_space<vmem>>, %arg4: memref<1x8xf32, #tpu.memory_space<vmem>>, %arg5: memref<512x8xf32, #tpu.memory_space<vmem>>) attributes {dimension_semantics = [#tpu.dimension_semantics<parallel>], iteration_bounds = array<i64: 1>, scalar_prefetch = 0 : i64, scratch_operands = 0 : i64, tpu.core_type = #tpu.core_type<tc>, window_params = [{transform_indices = @transform_0, window_bounds = array<i64: 512, 8>}, {pipeline_mode = #tpu.pipeline_mode<synchronous>, transform_indices = @transform_1, window_bounds = array<i64: 2, 8>}, {pipeline_mode = #tpu.pipeline_mode<synchronous>, transform_indices = @transform_2, window_bounds = array<i64: 1, 8>}, {pipeline_mode = #tpu.pipeline_mode<synchronous>, transform_indices = @transform_3, window_bounds = array<i64: 1, 8>}, {transform_indices = @transform_4, window_bounds = array<i64: 512, 8>}]} {
    %c0 = arith.constant 0 : index
    %c0_0 = arith.constant 0 : index
    %0 = vector.load %arg2[%c0, %c0_0] : memref<2x8xf32, #tpu.memory_space<vmem>>, vector<2x8xf32>
    %1 = vector.extract_strided_slice %0 {offsets = [0, 0], sizes = [1, 8], strides = [1, 1]} : vector<2x8xf32> to vector<1x8xf32>
    %cst = arith.constant 0.001953125 : f32
    %2 = vector.broadcast %cst : f32 to vector<1x8xf32>
    %3 = arith.mulf %1, %2 : vector<1x8xf32>
    %4 = vector.extract_strided_slice %0 {offsets = [1, 0], sizes = [1, 8], strides = [1, 1]} : vector<2x8xf32> to vector<1x8xf32>
    %cst_1 = arith.constant 0.001953125 : f32
    %5 = vector.broadcast %cst_1 : f32 to vector<1x8xf32>
    %6 = arith.mulf %4, %5 : vector<1x8xf32>
    %7 = arith.mulf %3, %3 : vector<1x8xf32>
    %8 = arith.subf %6, %7 : vector<1x8xf32>
    %cst_2 = arith.constant 0.000000e+00 : f32
    %9 = vector.broadcast %cst_2 : f32 to vector<1x8xf32>
    %10 = arith.maximumf %8, %9 : vector<1x8xf32>
    %c0_3 = arith.constant 0 : index
    %c0_4 = arith.constant 0 : index
    %11 = vector.load %arg3[%c0_3, %c0_4] : memref<1x8xf32, #tpu.memory_space<vmem>>, vector<1x8xf32>
    %cst_5 = arith.constant 9.99999974E-6 : f32
    %12 = vector.broadcast %cst_5 : f32 to vector<1x8xf32>
    %13 = arith.addf %10, %12 : vector<1x8xf32>
    %14 = math.rsqrt %13 : vector<1x8xf32>
    %15 = arith.mulf %11, %14 : vector<1x8xf32>
    %c0_6 = arith.constant 0 : index
    %c0_7 = arith.constant 0 : index
    %16 = vector.load %arg4[%c0_6, %c0_7] : memref<1x8xf32, #tpu.memory_space<vmem>>, vector<1x8xf32>
    %17 = arith.mulf %3, %15 : vector<1x8xf32>
    %18 = arith.subf %16, %17 : vector<1x8xf32>
    %c0_8 = arith.constant 0 : index
    %c0_9 = arith.constant 0 : index
    %19 = vector.load %arg1[%c0_8, %c0_9] : memref<512x8xf32, #tpu.memory_space<vmem>>, vector<512x8xf32>
    %20 = vector.broadcast %15 : vector<1x8xf32> to vector<512x8xf32>
    %21 = arith.mulf %19, %20 : vector<512x8xf32>
    %22 = vector.broadcast %18 : vector<1x8xf32> to vector<512x8xf32>
    %23 = arith.addf %21, %22 : vector<512x8xf32>
    %c0_10 = arith.constant 0 : index
    %c0_11 = arith.constant 0 : index
    %24 = vector.load %arg5[%c0_10, %c0_11] : memref<512x8xf32, #tpu.memory_space<vmem>>, vector<512x8xf32>
    tpu.vector_store %arg5[%c0_10, %c0_11], %23 {strides = array<i32>} : memref<512x8xf32, #tpu.memory_space<vmem>>, vector<512x8xf32>,
    return
  }
  func.func @transform_0(%arg0: i32) -> (i32, i32) {
    %c0_i32 = arith.constant 0 : i32
    %c0_i32_0 = arith.constant 0 : i32
    return %arg0, %c0_i32 : i32, i32
  }
  func.func @transform_1(%arg0: i32) -> (i32, i32) {
    %c0_i32 = arith.constant 0 : i32
    %c0_i32_0 = arith.constant 0 : i32
    %c0_i32_1 = arith.constant 0 : i32
    return %c0_i32, %c0_i32_0 : i32, i32
  }
  func.func @transform_2(%arg0: i32) -> (i32, i32) {
    %c0_i32 = arith.constant 0 : i32
    %c0_i32_0 = arith.constant 0 : i32
    %c0_i32_1 = arith.constant 0 : i32
    return %c0_i32, %c0_i32_0 : i32, i32
  }
  func.func @transform_3(%arg0: i32) -> (i32, i32) {
    %c0_i32 = arith.constant 0 : i32
    %c0_i32_0 = arith.constant 0 : i32
    %c0_i32_1 = arith.constant 0 : i32
    return %c0_i32, %c0_i32_0 : i32, i32
  }
  func.func @transform_4(%arg0: i32) -> (i32, i32) {
    %c0_i32 = arith.constant 0 : i32
    %c0_i32_0 = arith.constant 0 : i32
    return %arg0, %c0_i32 : i32, i32
  }
}

module attributes {stable_mosaic.version = 11 : i64} {
  func.func @_gemm_kernel(%arg0: i32, %arg1: i32, %arg2: i32, %arg3: i32, %arg4: memref<1x256x128xbf16, #tpu.memory_space<vmem>>, %arg5: memref<1x128x128xbf16, #tpu.memory_space<vmem>>, %arg6: memref<1x1x128xf32, #tpu.memory_space<vmem>>, %arg7: memref<1x256x128xf32, #tpu.memory_space<vmem>>, %arg8: memref<256x128xf32, #tpu.memory_space<vmem>>) attributes {dimension_semantics = [#tpu.dimension_semantics<parallel>, #tpu.dimension_semantics<parallel>, #tpu.dimension_semantics<parallel>, #tpu.dimension_semantics<arbitrary>], iteration_bounds = array<i64: 4, 2, 1, 1>, scalar_prefetch = 0 : i64, scratch_operands = 1 : i64, tpu.core_type = #tpu.core_type<tc>, window_params = [{transform_indices = @transform_0, window_bounds = array<i64: 1, 256, 128>}, {transform_indices = @transform_1, window_bounds = array<i64: 1, 128, 128>}, {transform_indices = @transform_2, window_bounds = array<i64: 1, 1, 128>}, {transform_indices = @transform_3, window_bounds = array<i64: 1, 256, 128>}]} {
    %c0_i32 = arith.constant 0 : i32
    %0 = arith.cmpi eq, %arg3, %c0_i32 : i32
    %1 = arith.extui %0 : i1 to i32
    %c0_i32_0 = arith.constant 0 : i32
    %2 = arith.cmpi ne, %1, %c0_i32_0 : i32
    scf.if %2 {
      %cst_13 = arith.constant 0.000000e+00 : f32
      %16 = vector.broadcast %cst_13 : f32 to vector<256x128xf32>
      %c0_14 = arith.constant 0 : index
      %c0_15 = arith.constant 0 : index
      %17 = vector.load %arg8[%c0_14, %c0_15] : memref<256x128xf32, #tpu.memory_space<vmem>>, vector<256x128xf32>
      tpu.vector_store %arg8[%c0_14, %c0_15], %16 {strides = array<i32>} : memref<256x128xf32, #tpu.memory_space<vmem>>, vector<256x128xf32>,
    } else {
    }
    %c0 = arith.constant 0 : index
    %c0_1 = arith.constant 0 : index
    %c0_2 = arith.constant 0 : index
    %3 = vector.load %arg4[%c0, %c0_1, %c0_2] : memref<1x256x128xbf16, #tpu.memory_space<vmem>>, vector<1x256x128xbf16>
    %4 = vector.shape_cast %3 : vector<1x256x128xbf16> to vector<256x128xbf16>
    %cst = arith.constant 0.000000e+00 : bf16
    %5 = vector.broadcast %cst : bf16 to vector<256x128xbf16>
    %6 = arith.maximumf %4, %5 : vector<256x128xbf16>
    %c0_3 = arith.constant 0 : index
    %c0_4 = arith.constant 0 : index
    %7 = vector.load %arg8[%c0_3, %c0_4] : memref<256x128xf32, #tpu.memory_space<vmem>>, vector<256x128xf32>
    %c0_5 = arith.constant 0 : index
    %c0_6 = arith.constant 0 : index
    %c0_7 = arith.constant 0 : index
    %8 = vector.load %arg5[%c0_5, %c0_6, %c0_7] : memref<1x128x128xbf16, #tpu.memory_space<vmem>>, vector<1x128x128xbf16>
    %9 = vector.shape_cast %8 : vector<1x128x128xbf16> to vector<128x128xbf16>
    %cst_8 = arith.constant dense<0.000000e+00> : vector<256x128xf32>
    %10 = tpu.matmul %6, %9, %cst_8 {dimension_numbers = #tpu.dot_dimension_numbers<[1], [0], [0], [1], [0, 0, 1, 1], [], []>} : vector<256x128xbf16>, vector<128x128xbf16>, vector<256x128xf32> -> vector<256x128xf32>
    %11 = arith.addf %7, %10 : vector<256x128xf32>
    %c0_9 = arith.constant 0 : index
    %c0_10 = arith.constant 0 : index
    %12 = vector.load %arg8[%c0_9, %c0_10] : memref<256x128xf32, #tpu.memory_space<vmem>>, vector<256x128xf32>
    tpu.vector_store %arg8[%c0_9, %c0_10], %11 {strides = array<i32>} : memref<256x128xf32, #tpu.memory_space<vmem>>, vector<256x128xf32>,
    %c0_i32_11 = arith.constant 0 : i32
    %13 = arith.cmpi eq, %arg3, %c0_i32_11 : i32
    %14 = arith.extui %13 : i1 to i32
    %c0_i32_12 = arith.constant 0 : i32
    %15 = arith.cmpi ne, %14, %c0_i32_12 : i32
    scf.if %15 {
      %c0_13 = arith.constant 0 : index
      %c0_14 = arith.constant 0 : index
      %16 = vector.load %arg8[%c0_13, %c0_14] : memref<256x128xf32, #tpu.memory_space<vmem>>, vector<256x128xf32>
      %c0_15 = arith.constant 0 : index
      %c0_16 = arith.constant 0 : index
      %c0_17 = arith.constant 0 : index
      %17 = vector.load %arg6[%c0_15, %c0_16, %c0_17] : memref<1x1x128xf32, #tpu.memory_space<vmem>>, vector<1x1x128xf32>
      %18 = vector.shape_cast %17 : vector<1x1x128xf32> to vector<1x128xf32>
      %19 = vector.broadcast %18 : vector<1x128xf32> to vector<256x128xf32>
      %20 = arith.addf %16, %19 : vector<256x128xf32>
      %21 = math.tanh %20 : vector<256x128xf32>
      %c0_18 = arith.constant 0 : index
      %c0_19 = arith.constant 0 : index
      %c0_20 = arith.constant 0 : index
      %22 = vector.load %arg7[%c0_18, %c0_19, %c0_20] : memref<1x256x128xf32, #tpu.memory_space<vmem>>, vector<1x256x128xf32>
      %23 = vector.shape_cast %22 : vector<1x256x128xf32> to vector<256x128xf32>
      %24 = vector.shape_cast %21 : vector<256x128xf32> to vector<1x256x128xf32>
      tpu.vector_store %arg7[%c0_18, %c0_19, %c0_20], %24 {strides = array<i32>} : memref<1x256x128xf32, #tpu.memory_space<vmem>>, vector<1x256x128xf32>,
    } else {
    }
    return
  }
  func.func @transform_0(%arg0: i32, %arg1: i32, %arg2: i32, %arg3: i32) -> (i32, i32, i32) {
    %c0_i32 = arith.constant 0 : i32
    return %arg0, %arg1, %arg3 : i32, i32, i32
  }
  func.func @transform_1(%arg0: i32, %arg1: i32, %arg2: i32, %arg3: i32) -> (i32, i32, i32) {
    %c0_i32 = arith.constant 0 : i32
    return %arg0, %arg3, %arg2 : i32, i32, i32
  }
  func.func @transform_2(%arg0: i32, %arg1: i32, %arg2: i32, %arg3: i32) -> (i32, i32, i32) {
    %c0_i32 = arith.constant 0 : i32
    %c0_i32_0 = arith.constant 0 : i32
    return %arg0, %c0_i32, %arg2 : i32, i32, i32
  }
  func.func @transform_3(%arg0: i32, %arg1: i32, %arg2: i32, %arg3: i32) -> (i32, i32, i32) {
    %c0_i32 = arith.constant 0 : i32
    return %arg0, %arg1, %arg2 : i32, i32, i32
  }
}

</mosaic_0001>

<bundles_post_ra>
// kernel: _lambda_.24
= control target key start
LH: loop header
LB: loop body
LE: loop exit
PB: predicated region body
PF: predicated region fallthrough
CT: control target
= control target key end

     0   :  { %s1270_s12 = smov 0   ;;  %s1272_s13 = smov 0   ;;  %s1420_s0 = inlined_call_operand.vmem [shape: bf16[1,512,128], index: 0, kind: input, shape index: {}]   ;;  %s1421_s1 = inlined_call_operand.vmem [shape: bf16[1,128,128], index: 1, kind: input, shape index: {}]   ;;  %s1422_s2 = inlined_call_operand.vmem [shape: f32[1,1,128], index: 2, kind: input, shape index: {}]   ;;  %s1423_s3 = inlined_call_operand.vmem [shape: f32[1,512,128], index: 3, kind: output, shape index: {}]  }
   0x1   :  { %s1274_s14 = smov 0  }
   0x2 LB: > { %s35_s15 = sadd.s32 1, %s1244_s13  ;;  %p1058_p0 = scmp.ge.s32.totalorder %s1248_s14, 1  ;;  %s1248_s14 = sphi %s1274_s14, %s13_s14   ;;  %s1244_s13 = sphi %s1272_s13, %s1425_s13   ;;  %s1240_s12 = sphi %s1270_s12, %s1424_s12  }
   0x3   : > { %p37_p1 = scmp.ge.s32.totalorder %s35_s15, 2  ;;  %p214_p2 = scmp.lt.s32.totalorder %s1248_s14, 3 }
   0x5   : > { %s1427_s15 = smov (%p37_p1, %s35_s15), 0  ;;  %p215_p3 = pnand %p1058_p0, %p214_p2 }
   0x6   : > { %v1202_v0 = vld [vmem:[%s1421_s1] sm:$0xff] (!%p215_p3)   ;;  %s1059_s18 = sshll.u32 (!%p215_p3), %s1240_s12, 5  ;;  %v1203_v1 = vld [vmem:[%s1421_s1 + $0x8] sm:$0xff] (!%p215_p3)   ;;  %v1204_v2 = vld [vmem:[%s1421_s1 + $0x10] sm:$0xff] (!%p215_p3)  }
   0x7   : > { %218 = sbr.rel (%p215_p3) target bundleno = 281 (0x119), region = 32  ;;  %p273_p4 = scmp.lt.s32.totalorder (!%p215_p3), %s1059_s18, 63  ;;  %1114 = vmatprep.subr.bf16.mxu0 (!%p215_p3), %v1202_v0  ;;  %1162 = vmatprep.subr.bf16.mxu1 (!%p215_p3), %v1202_v0  ;;  %v1205_v3 = vld [vmem:[%s1421_s1 + $0x18] sm:$0xff] (!%p215_p3)   ;;  %v1206_v6 = vld [vmem:[%s1421_s1 + $0x20] sm:$0xff] (!%p215_p3)   ;;  %v1207_v7 = vld [vmem:[%s1421_s1 + $0x28] sm:$0xff] (!%p215_p3)  }
   0x8   : > { %1115 = vmatpush3.bf16.msra.mxu0 (!%p215_p3), %v1202_v0  ;;  %1170 = vmatpush3.bf16.msra.mxu1 (!%p215_p3), %v1202_v0  ;;  %v1208_v8 = vld [vmem:[%s1421_s1 + $0x30] sm:$0xff] (!%p215_p3)   ;;  %v1209_v9 = vld [vmem:[%s1421_s1 + $0x38] sm:$0xff] (!%p215_p3)   ;;  %v1340_v24 = vld [vmem:[%s1422_s2] ss:$0 sm:$0xff] (!%p215_p3) }
   0x9   : > { %1116 = vmatprep.subr.bf16.mxu0 (!%p215_p3), %v1203_v1  ;;  %1163 = vmatprep.subr.bf16.mxu1 (!%p215_p3), %v1203_v1 }
   0xc   : > { %1117 = vmatpush3.bf16.msra.mxu0 (!%p215_p3), %v1203_v1  ;;  %1171 = vmatpush3.bf16.msra.mxu1 (!%p215_p3), %v1203_v1 }
   0xd   : > { %1118 = vmatprep.subr.bf16.mxu0 (!%p215_p3), %v1204_v2  ;;  %1164 = vmatprep.subr.bf16.mxu1 (!%p215_p3), %v1204_v2 }
   0xe   : > { %s1429_s18 = smov (!%p273_p4, %s1059_s18), 63 }
   0xf   : > { %s1060_s23 = sshll.u32 %s1429_s18, 2  ;;  %s1062_s10 = sshll.u32 %s1429_s18, 3 }
  0x10   : > { %s1303_s26 = scalar_lea.vmem %s1420_s0, %s1060_s23  ;;  %1119 = vmatpush3.bf16.msra.mxu0 %v1204_v2  ;;  %1172 = vmatpush3.bf16.msra.mxu1 %v1204_v2  ;;  %s1345_s19 = scalar_lea.vmem %s1423_s3, %s1062_s10 }
  0x11   : > { %v1210_v4 = vld [vmem:[%s1303_s26] sm:$0xff]   ;;  %1120 = vmatprep.subr.bf16.mxu0 %v1205_v3  ;;  %1165 = vmatprep.subr.bf16.mxu1 %v1205_v3  ;;  %v1212_v10 = vld [vmem:[%s1303_s26 + $0x8] sm:$0xff]   ;;  %v1214_v12 = vld [vmem:[%s1303_s26 + $0x10] sm:$0xff]  }
  0x12   : > { %v1211_v5 = vld [vmem:[%s1303_s26 + $0x40] sm:$0xff]   ;;  %1130 = vmatprep.mubr.bf16.mxu0 %v1210_v4  ;;  %v1213_v11 = vld [vmem:[%s1303_s26 + $0x48] sm:$0xff]   ;;  %v1215_v13 = vld [vmem:[%s1303_s26 + $0x50] sm:$0xff]  }
  0x13   : > { %1146 = vmatprep.mubr.bf16.mxu1 %v1211_v5  ;;  %v1216_v14 = vld [vmem:[%s1303_s26 + $0x18] sm:$0xff]   ;;  %v1218_v16 = vld [vmem:[%s1303_s26 + $0x20] sm:$0xff]   ;;  %v1220_v18 = vld [vmem:[%s1303_s26 + $0x28] sm:$0xff]  }
  0x14   : > { %1121 = vmatpush3.bf16.msra.mxu0 %v1205_v3  ;;  %1173 = vmatpush3.bf16.msra.mxu1 %v1205_v3  ;;  %v1217_v15 = vld [vmem:[%s1303_s26 + $0x58] sm:$0xff]   ;;  %v1219_v17 = vld [vmem:[%s1303_s26 + $0x60] sm:$0xff]   ;;  %v1221_v19 = vld [vmem:[%s1303_s26 + $0x68] sm:$0xff]  }
  0x15   : > { %1122 = vmatprep.subr.bf16.mxu0 %v1206_v6  ;;  %1166 = vmatprep.subr.bf16.mxu1 %v1206_v6  ;;  %v1222_v20 = vld [vmem:[%s1303_s26 + $0x30] sm:$0xff]   ;;  %v1224_v22 = vld [vmem:[%s1303_s26 + $0x38] sm:$0xff]  }
  0x16   : > { %v1223_v21 = vld [vmem:[%s1303_s26 + $0x70] sm:$0xff]   ;;  %v1225_v23 = vld [vmem:[%s1303_s26 + $0x78] sm:$0xff]  }
  0x18   : > { %1123 = vmatpush3.bf16.msra.mxu0 %v1206_v6  ;;  %1174 = vmatpush3.bf16.msra.mxu1 %v1206_v6 }
  0x19   : > { %1124 = vmatprep.subr.bf16.mxu0 %v1207_v7  ;;  %1167 = vmatprep.subr.bf16.mxu1 %v1207_v7 }
  0x1c   : > { %1125 = vmatpush3.bf16.msra.mxu0 %v1207_v7  ;;  %1175 = vmatpush3.bf16.msra.mxu1 %v1207_v7 }
  0x1d   : > { %1126 = vmatprep.subr.bf16.mxu0 %v1208_v8  ;;  %1168 = vmatprep.subr.bf16.mxu1 %v1208_v8 }
  0x20   : > { %1127 = vmatpush3.bf16.msra.mxu0 %v1208_v8  ;;  %1176 = vmatpush3.bf16.msra.mxu1 %v1208_v8 }
  0x21   : > { %1128 = vmatprep.subr.bf16.mxu0 %v1209_v9  ;;  %1169 = vmatprep.subr.bf16.mxu1 %v1209_v9 }
  0x24   : > { %1129 = vmatpush3.bf16.msra.mxu0 %v1209_v9  ;;  %1177 = vmatpush3.bf16.msra.mxu1 %v1209_v9 }
  0x27   : > { %1131 = vmatmul.mubr.bf16.vlgmr.msra.gmra.mrb[0].mxu0 %v1212_v10  ;;  %1147 = vmatmul.mubr.bf16.vlgmr.msra.gmra.mrb[0].mxu1 %v1213_v11 }
  0x28   : > { %1134 = vmatprep.mubr.bf16.mxu0 %v1214_v12  ;;  %1150 = vmatprep.mubr.bf16.mxu1 %v1215_v13 }
  0x2f   : > { %1135 = vmatmul.mubr.bf16.gmra.mrb[4].mxu0 %v1216_v14  ;;  %1151 = vmatmul.mubr.bf16.gmra.mrb[4].mxu1 %v1217_v15 }
  0x30   : > { %1138 = vmatprep.mubr.bf16.mxu0 %v1218_v16  ;;  %1154 = vmatprep.mubr.bf16.mxu1 %v1219_v17 }
  0x37   : > { %1139 = vmatmul.mubr.bf16.gmra.mrb[8].mxu0 %v1220_v18  ;;  %1155 = vmatmul.mubr.bf16.gmra.mrb[8].mxu1 %v1221_v19 }
  0x38   : > { %1142 = vmatprep.mubr.bf16.mxu0 %v1222_v20  ;;  %1158 = vmatprep.mubr.bf16.mxu1 %v1223_v21 }
  0x3f   : > { %1143 = vmatmul.mubr.bf16.gmra.mrb[12].mxu0 %v1224_v22  ;;  %1159 = vmatmul.mubr.bf16.gmra.mrb[12].mxu1 %v1225_v23 }
  0xfa   : > { %v1132_v25 = vpop.f32.mrb[0].mxu0  ;;  %v1148_v26 = vpop.f32.mrb[0].mxu1 }
  0xfb   : > { %v845_v27 = vadd.f32 %v1132_v25, %v1340_v24  ;;  %v861_v28 = vadd.f32 %v1148_v26, %v1340_v24  ;;  %v610_v29 = vpop.f32.mrb[1].mxu0  ;;  %v674_v30 = vpop.f32.mrb[1].mxu1 }
  0xfc   : > { %v843_v31 = vadd.f32 %v1340_v24, %v610_v29  ;;  %v859_v32 = vadd.f32 %v1340_v24, %v674_v30  ;;  %v1133_v33 = vpop.f32.mrb[2].mxu0  ;;  %v1149_v34 = vpop.f32.mrb[2].mxu1 }
  0xfd   : > { %877 = vst [vmem:[%s1345_s19 + $0x10] sm:$0xff] %v845_v27  ;;  %893 = vst [vmem:[%s1345_s19 + $0x90] sm:$0xff] %v861_v28  ;;  %v846_v35 = vadd.f32 %v1133_v33, %v1340_v24  ;;  %v862_v36 = vadd.f32 %v1149_v34, %v1340_v24  ;;  %v613_v37 = vpop.f32.mrb[3].mxu0  ;;  %v677_v38 = vpop.f32.mrb[3].mxu1 }
  0xfe   : > { %875 = vst [vmem:[%s1345_s19] sm:$0xff] %v843_v31  ;;  %891 = vst [vmem:[%s1345_s19 + $0x80] sm:$0xff] %v859_v32  ;;  %v844_v39 = vadd.f32 %v1340_v24, %v613_v37  ;;  %v860_v40 = vadd.f32 %v1340_v24, %v677_v38 }
  0xff   : > { %878 = vst [vmem:[%s1345_s19 + $0x18] sm:$0xff] %v846_v35  ;;  %894 = vst [vmem:[%s1345_s19 + $0x98] sm:$0xff] %v862_v36 }
 0x100   : > { %876 = vst [vmem:[%s1345_s19 + $0x8] sm:$0xff] %v844_v39  ;;  %892 = vst [vmem:[%s1345_s19 + $0x88] sm:$0xff] %v860_v40 }
 0x102   : > { %v1136_v41 = vpop.f32.mrb[4].mxu0  ;;  %v1152_v42 = vpop.f32.mrb[4].mxu1 }
 0x103   : > { %v849_v43 = vadd.f32 %v1136_v41, %v1340_v24  ;;  %v865_v44 = vadd.f32 %v1152_v42, %v1340_v24  ;;  %v626_v45 = vpop.f32.mrb[5].mxu0  ;;  %v690_v46 = vpop.f32.mrb[5].mxu1 }
 0x104   : > { %v847_v47 = vadd.f32 %v1340_v24, %v626_v45  ;;  %v863_v48 = vadd.f32 %v1340_v24, %v690_v46  ;;  %v1137_v49 = vpop.f32.mrb[6].mxu0  ;;  %v1153_v50 = vpop.f32.mrb[6].mxu1 }
 0x105   : > { %881 = vst [vmem:[%s1345_s19 + $0x30] sm:$0xff] %v849_v43  ;;  %897 = vst [vmem:[%s1345_s19 + $0xb0] sm:$0xff] %v865_v44  ;;  %v850_v51 = vadd.f32 %v1137_v49, %v1340_v24  ;;  %v866_v52 = vadd.f32 %v1153_v50, %v1340_v24  ;;  %v629_v53 = vpop.f32.mrb[7].mxu0  ;;  %v693_v54 = vpop.f32.mrb[7].mxu1 }
 0x106   : > { %879 = vst [vmem:[%s1345_s19 + $0x20] sm:$0xff] %v847_v47  ;;  %895 = vst [vmem:[%s1345_s19 + $0xa0] sm:$0xff] %v863_v48  ;;  %v848_v55 = vadd.f32 %v1340_v24, %v629_v53  ;;  %v864_v56 = vadd.f32 %v1340_v24, %v693_v54 }
 0x107   : > { %882 = vst [vmem:[%s1345_s19 + $0x38] sm:$0xff] %v850_v51  ;;  %898 = vst [vmem:[%s1345_s19 + $0xb8] sm:$0xff] %v866_v52 }
 0x108   : > { %880 = vst [vmem:[%s1345_s19 + $0x28] sm:$0xff] %v848_v55  ;;  %896 = vst [vmem:[%s1345_s19 + $0xa8] sm:$0xff] %v864_v56 }
 0x10a   : > { %v1140_v57 = vpop.f32.mrb[8].mxu0  ;;  %v1156_v58 = vpop.f32.mrb[8].mxu1 }
 0x10b   : > { %v853_v59 = vadd.f32 %v1140_v57, %v1340_v24  ;;  %v869_v60 = vadd.f32 %v1156_v58, %v1340_v24  ;;  %v642_v61 = vpop.f32.mrb[9].mxu0  ;;  %v706_v62 = vpop.f32.mrb[9].mxu1 }
 0x10c   : > { %v851_v63 = vadd.f32 %v1340_v24, %v642_v61  ;;  %v867_v0 = vadd.f32 %v1340_v24, %v706_v62  ;;  %v1141_v1 = vpop.f32.mrb[10].mxu0  ;;  %v1157_v2 = vpop.f32.mrb[10].mxu1 }
 0x10d   : > { %885 = vst [vmem:[%s1345_s19 + $0x50] sm:$0xff] %v853_v59  ;;  %901 = vst [vmem:[%s1345_s19 + $0xd0] sm:$0xff] %v869_v60  ;;  %v854_v3 = vadd.f32 %v1141_v1, %v1340_v24  ;;  %v870_v4 = vadd.f32 %v1157_v2, %v1340_v24  ;;  %v645_v5 = vpop.f32.mrb[11].mxu0  ;;  %v709_v6 = vpop.f32.mrb[11].mxu1 }
 0x10e   : > { %883 = vst [vmem:[%s1345_s19 + $0x40] sm:$0xff] %v851_v63  ;;  %899 = vst [vmem:[%s1345_s19 + $0xc0] sm:$0xff] %v867_v0  ;;  %v852_v7 = vadd.f32 %v1340_v24, %v645_v5  ;;  %v868_v8 = vadd.f32 %v1340_v24, %v709_v6 }
 0x10f   : > { %886 = vst [vmem:[%s1345_s19 + $0x58] sm:$0xff] %v854_v3  ;;  %902 = vst [vmem:[%s1345_s19 + $0xd8] sm:$0xff] %v870_v4 }
 0x110   : > { %884 = vst [vmem:[%s1345_s19 + $0x48] sm:$0xff] %v852_v7  ;;  %900 = vst [vmem:[%s1345_s19 + $0xc8] sm:$0xff] %v868_v8 }
 0x112   : > { %v1144_v9 = vpop.f32.mrb[12].mxu0  ;;  %v1160_v10 = vpop.f32.mrb[12].mxu1 }
 0x113   : > { %v857_v11 = vadd.f32 %v1144_v9, %v1340_v24  ;;  %v873_v12 = vadd.f32 %v1160_v10, %v1340_v24  ;;  %v658_v13 = vpop.f32.mrb[13].mxu0  ;;  %v722_v14 = vpop.f32.mrb[13].mxu1 }
 0x114   : > { %v855_v15 = vadd.f32 %v1340_v24, %v658_v13  ;;  %v871_v16 = vadd.f32 %v1340_v24, %v722_v14  ;;  %v1145_v17 = vpop.f32.mrb[14].mxu0  ;;  %v1161_v18 = vpop.f32.mrb[14].mxu1 }
 0x115   : > { %889 = vst [vmem:[%s1345_s19 + $0x70] sm:$0xff] %v857_v11  ;;  %905 = vst [vmem:[%s1345_s19 + $0xf0] sm:$0xff] %v873_v12  ;;  %v858_v19 = vadd.f32 %v1145_v17, %v1340_v24  ;;  %v874_v20 = vadd.f32 %v1161_v18, %v1340_v24  ;;  %v661_v21 = vpop.f32.mrb[15].mxu0  ;;  %v725_v22 = vpop.f32.mrb[15].mxu1 }
 0x116   : > { %887 = vst [vmem:[%s1345_s19 + $0x60] sm:$0xff] %v855_v15  ;;  %903 = vst [vmem:[%s1345_s19 + $0xe0] sm:$0xff] %v871_v16  ;;  %v856_v23 = vadd.f32 %v1340_v24, %v661_v21  ;;  %v872_v25 = vadd.f32 %v1340_v24, %v725_v22 }
 0x117   : > { %890 = vst [vmem:[%s1345_s19 + $0x78] sm:$0xff] %v858_v19  ;;  %906 = vst [vmem:[%s1345_s19 + $0xf8] sm:$0xff] %v874_v20 }
 0x118   : > { %888 = vst [vmem:[%s1345_s19 + $0x68] sm:$0xff] %v856_v23  ;;  %904 = vst [vmem:[%s1345_s19 + $0xe8] sm:$0xff] %v872_v25 }
 0x119 PF: > { %s13_s14 = sadd.s32 1, %s1248_s14   ;;  %s1424_s12 = smov %s1244_s13 }
 0x11a   : > { %p10_p5 = scmp.ge.s32.totalorder %s13_s14, 4   ;;  %s1425_s13 = smov %s1427_s15 }
 0x11c   :  { %12 = sbr.rel (!%p10_p5) target bundleno = 2 (0x2), region = 76 }

// kernel: _lambda_.26
= control target key start
LH: loop header
LB: loop body
LE: loop exit
PB: predicated region body
PF: predicated region fallthrough
CT: control target
= control target key end

     0   :  { %vm12_vm0 = vcmask 123904   ;;  %vm31_vm1 = vcmask 130048   ;;  %v132_v0 = vmov 0.0   ;;  %vm122_vm2 = vcmask 1040384   ;;  %s234_s0 = inlined_call_operand.vmem [shape: f32[128,16], index: 0, kind: input, shape index: {}]   ;;  %s235_s1 = inlined_call_operand.vmem [shape: f32[2,16], index: 1, kind: output, shape index: {}]  }
   0x1   :  { %13 = vst.msk [vmem:[%s235_s1] sm:$0x3] %vm12_vm0, %v132_v0  ;;  %v14_v1 = vld [vmem:[%s234_s0] sm:$0xff]  ;;  %v15_v2 = vld [vmem:[%s234_s0 + $0x8] sm:$0xff]  ;;  %v16_v3 = vld [vmem:[%s234_s0 + $0x10] sm:$0xff] }
   0x2   :  { %v32_v4 = vsel %vm31_vm1, %v14_v1, 0.0  ;;  %v33_v5 = vsel %vm31_vm1, %v15_v2, 0.0  ;;  %v35_v6 = vsel %vm31_vm1, %v16_v3, 0.0  ;;  %v17_v7 = vld [vmem:[%s234_s0 + $0x18] sm:$0xff]  ;;  %v18_v10 = vld [vmem:[%s234_s0 + $0x20] sm:$0xff]  ;;  %v19_v13 = vld [vmem:[%s234_s0 + $0x28] sm:$0xff]  ;;  %v69_v15 = vmul.f32 %v14_v1, %v14_v1 }
   0x3   :  { %v34_v8 = vadd.f32 %v33_v5, %v32_v4  ;;  %v37_v9 = vsel %vm31_vm1, %v17_v7, 0.0  ;;  %v39_v12 = vsel %vm31_vm1, %v18_v10, 0.0  ;;  %v70_v16 = vmul.f32 %v15_v2, %v15_v2  ;;  %v20_v19 = vld [vmem:[%s234_s0 + $0x30] sm:$0xff]  ;;  %v21_v24 = vld [vmem:[%s234_s0 + $0x38] sm:$0xff]  ;;  %v22_v31 = vld [vmem:[%s234_s0 + $0x40] sm:$0xff] }
   0x4   :  { %v71_v17 = vmul.f32 %v16_v3, %v16_v3  ;;  %v41_v18 = vsel %vm31_vm1, %v19_v13, 0.0  ;;  %v72_v21 = vmul.f32 %v17_v7, %v17_v7  ;;  %v43_v22 = vsel %vm31_vm1, %v20_v19, 0.0  ;;  %v23_v37 = vld [vmem:[%s234_s0 + $0x48] sm:$0xff]  ;;  %v24_v43 = vld [vmem:[%s234_s0 + $0x50] sm:$0xff]  ;;  %v25_v49 = vld [vmem:[%s234_s0 + $0x58] sm:$0xff] }
   0x5   :  { %v36_v11 = vadd.f32 %v35_v6, %v34_v8  ;;  %v73_v23 = vmul.f32 %v18_v10, %v18_v10  ;;  %v85_v26 = vsel %vm31_vm1, %v69_v15, 0.0  ;;  %v86_v27 = vsel %vm31_vm1, %v70_v16, 0.0  ;;  %v26_v55 = vld [vmem:[%s234_s0 + $0x60] sm:$0xff]  ;;  %v27_v61 = vld [vmem:[%s234_s0 + $0x68] sm:$0xff]  ;;  %v28_v3 = vld [vmem:[%s234_s0 + $0x70] sm:$0xff] }
   0x6   :  { %v88_v28 = vsel %vm31_vm1, %v71_v17, 0.0  ;;  %v45_v29 = vsel %vm31_vm1, %v21_v24, 0.0  ;;  %v87_v30 = vadd.f32 %v86_v27, %v85_v26  ;;  %v74_v33 = vmul.f32 %v19_v13, %v19_v13 }
   0x7   :  { %v38_v14 = vadd.f32 %v37_v9, %v36_v11  ;;  %v90_v34 = vsel %vm31_vm1, %v72_v21, 0.0  ;;  %v47_v35 = vsel %vm31_vm1, %v22_v31, 0.0  ;;  %v75_v39 = vmul.f32 %v20_v19, %v20_v19  ;;  %v29_v9 = vld [vmem:[%s234_s0 + $0x78] sm:$0xff] }
   0x8   :  { %v89_v36 = vadd.f32 %v88_v28, %v87_v30  ;;  %v92_v40 = vsel %vm31_vm1, %v73_v23, 0.0  ;;  %v49_v41 = vsel %vm31_vm1, %v23_v37, 0.0  ;;  %v76_v45 = vmul.f32 %v21_v24, %v21_v24 }
   0x9   :  { %v40_v20 = vadd.f32 %v39_v12, %v38_v14  ;;  %v94_v46 = vsel %vm31_vm1, %v74_v33, 0.0  ;;  %v51_v47 = vsel %vm31_vm1, %v24_v43, 0.0  ;;  %v77_v51 = vmul.f32 %v22_v31, %v22_v31 }
   0xa   :  { %v91_v42 = vadd.f32 %v90_v34, %v89_v36  ;;  %v96_v52 = vsel %vm31_vm1, %v75_v39, 0.0  ;;  %v53_v53 = vsel %vm31_vm1, %v25_v49, 0.0  ;;  %v78_v57 = vmul.f32 %v23_v37, %v23_v37 }
   0xb   :  { %v42_v25 = vadd.f32 %v41_v18, %v40_v20  ;;  %v98_v58 = vsel %vm31_vm1, %v76_v45, 0.0  ;;  %v55_v59 = vsel %vm31_vm1, %v26_v55, 0.0  ;;  %v79_v63 = vmul.f32 %v24_v43, %v24_v43 }
   0xc   :  { %v93_v48 = vadd.f32 %v92_v40, %v91_v42  ;;  %v100_v0 = vsel %vm31_vm1, %v77_v51, 0.0  ;;  %v57_v1 = vsel %vm31_vm1, %v27_v61, 0.0  ;;  %v80_v5 = vmul.f32 %v25_v49, %v25_v49  ;;  %v30_v42 = vld [vmem:[%s235_s1] sm:$0x3] }
   0xd   :  { %v44_v32 = vadd.f32 %v43_v22, %v42_v25  ;;  %v102_v6 = vsel %vm31_vm1, %v78_v57, 0.0  ;;  %v59_v7 = vsel %vm31_vm1, %v28_v3, 0.0  ;;  %v81_v11 = vmul.f32 %v26_v55, %v26_v55 }
   0xe   :  { %v95_v54 = vadd.f32 %v94_v46, %v93_v48  ;;  %v104_v12 = vsel %vm31_vm1, %v79_v63, 0.0  ;;  %v61_v13 = vsel %vm31_vm1, %v29_v9, 0.0  ;;  %v82_v16 = vmul.f32 %v27_v61, %v27_v61 }
   0xf   :  { %v46_v38 = vadd.f32 %v45_v29, %v44_v32  ;;  %v106_v17 = vsel %vm31_vm1, %v80_v5, 0.0  ;;  %v83_v20 = vmul.f32 %v28_v3, %v28_v3  ;;  %v108_v21 = vsel %vm31_vm1, %v81_v11, 0.0 }
  0x10   :  { %v97_v60 = vadd.f32 %v96_v52, %v95_v54  ;;  %v84_v24 = vmul.f32 %v29_v9, %v29_v9  ;;  %v110_v25 = vsel %vm31_vm1, %v82_v16, 0.0 }
  0x11   :  { %v48_v44 = vadd.f32 %v47_v35, %v46_v38  ;;  %v112_v28 = vsel %vm31_vm1, %v83_v20, 0.0 }
  0x12   :  { %v99_v2 = vadd.f32 %v98_v58, %v97_v60  ;;  %v114_v30 = vsel %vm31_vm1, %v84_v24, 0.0 }
  0x13   :  { %v50_v50 = vadd.f32 %v49_v41, %v48_v44 }
  0x14   :  { %v101_v8 = vadd.f32 %v100_v0, %v99_v2 }
  0x15   :  { %v52_v56 = vadd.f32 %v51_v47, %v50_v50 }
  0x16   :  { %v103_v14 = vadd.f32 %v102_v6, %v101_v8 }
  0x17   :  { %v54_v62 = vadd.f32 %v53_v53, %v52_v56 }
  0x18   :  { %v105_v18 = vadd.f32 %v104_v12, %v103_v14 }
  0x19   :  { %v56_v4 = vadd.f32 %v55_v59, %v54_v62 }
  0x1a   :  { %v107_v22 = vadd.f32 %v106_v17, %v105_v18 }
  0x1b   :  { %v58_v10 = vadd.f32 %v57_v1, %v56_v4 }
  0x1c   :  { %v109_v26 = vadd.f32 %v108_v21, %v107_v22 }
  0x1d   :  { %v60_v15 = vadd.f32 %v59_v7, %v58_v10 }
  0x1e   :  { %v111_v29 = vadd.f32 %v110_v25, %v109_v26 }
  0x1f   :  { %v62_v19 = vadd.f32 %v61_v13, %v60_v15 }
  0x20   :  { %v113_v32 = vadd.f32 %v112_v28, %v111_v29 }
  0x21   :  { %v63_v23 = vrot.slane %v62_v19, 4 }
  0x22   :  { %v115_v33 = vadd.f32 %v114_v30, %v113_v32 }
  0x23   :  { %v64_v27 = vadd.f32 %v63_v23, %v62_v19 }
  0x24   :  { %v116_v35 = vrot.slane %v115_v33, 4 }
  0x25   :  { %v65_v31 = vrot.slane %v64_v27, 2 }
  0x26   :  { %v117_v36 = vadd.f32 %v116_v35, %v115_v33 }
  0x27   :  { %v66_v34 = vadd.f32 %v65_v31, %v64_v27 }
  0x28   :  { %v118_v38 = vrot.slane %v117_v36, 2 }
  0x29   :  { %v67_v37 = vrot.slane %v66_v34, 1 }
  0x2a   :  { %v119_v39 = vadd.f32 %v118_v38, %v117_v36 }
  0x2b   :  { %v68_v40 = vadd.f32 %v67_v37, %v66_v34 }
  0x2c   :  { %v120_v41 = vrot.slane %v119_v39, 1 }
  0x2e   :  { %v121_v43 = vadd.f32 %v120_v41, %v119_v39 }
  0x30   :  { %v123_v44 = vsel %vm122_vm2, %v68_v40, %v121_v43 }
  0x31   :  { %v124_v45 = vadd.f32 %v123_v44, %v30_v42 }
  0x33   :  { %126 = vst.msk [vmem:[%s235_s1] sm:$0x3] %vm12_vm0, %v124_v45 }

// kernel: _lambda_.25
= control target key start
LH: loop header
LB: loop body
LE: loop exit
PB: predicated region body
PF: predicated region fallthrough
CT: control target
= control target key end

     0   :  { %s655_s1 = inlined_call_operand.vmem [shape: bf16[1,128,128], index: 1, kind: input, shape index: {}]   ;;  %s656_s0 = inlined_call_operand.vmem [shape: bf16[1,128,128], index: 0, kind: input, shape index: {}]   ;;  %s657_s2 = inlined_call_operand.vmem [shape: f32[1,1,128], index: 2, kind: input, shape index: {}]   ;;  %s658_s3 = inlined_call_operand.vmem [shape: f32[1,128,128], index: 3, kind: output, shape index: {}]  }
   0x1   :  { %v500_v0 = vld [vmem:[%s655_s1] sm:$0xff]   ;;  %v501_v1 = vld [vmem:[%s655_s1 + $0x8] sm:$0xff]   ;;  %v502_v2 = vld [vmem:[%s655_s1 + $0x10] sm:$0xff]  }
   0x2   :  { %452 = vmatprep.subr.bf16.mxu0 %v500_v0  ;;  %484 = vmatprep.subr.bf16.mxu1 %v500_v0  ;;  %v503_v3 = vld [vmem:[%s655_s1 + $0x18] sm:$0xff]   ;;  %v36_v4 = vld [vmem:[%s656_s0] sm:$0xf]  ;;  %v37_v5 = vld [vmem:[%s656_s0 + $0x4] sm:$0xf] }
   0x3   :  { %453 = vmatpush3.bf16.msra.mxu0 %v500_v0  ;;  %492 = vmatpush3.bf16.msra.mxu1 %v500_v0  ;;  %v44_v6 = vld [vmem:[%s656_s0 + $0x20] sm:$0xf]  ;;  %vm52_vm0 = vcmp.gt.bf16.partialorder %v36_v4, 0  ;;  %vm53_vm1 = vcmp.gt.bf16.partialorder %v37_v5, 0  ;;  %v68_v7 = vmul.bf16 1045249613, %v36_v4 }
   0x4   :  { %454 = vmatprep.subr.bf16.mxu0 %v501_v1  ;;  %485 = vmatprep.subr.bf16.mxu1 %v501_v1  ;;  %v69_v8 = vmul.bf16 1045249613, %v37_v5  ;;  %v45_v9 = vld [vmem:[%s656_s0 + $0x24] sm:$0xf]  ;;  %vm60_vm2 = vcmp.gt.bf16.partialorder %v44_v6, 0  ;;  %v505_v19 = vld [vmem:[%s655_s1 + $0x28] sm:$0xff]  }
   0x5   :  { %v76_v10 = vmul.bf16 1045249613, %v44_v6  ;;  %v84_v11 = vsel %vm52_vm0, %v36_v4, %v68_v7  ;;  %vm61_vm3 = vcmp.gt.bf16.partialorder %v45_v9, 0  ;;  %v77_v13 = vmul.bf16 1045249613, %v45_v9  ;;  %v504_v14 = vld [vmem:[%s655_s1 + $0x20] sm:$0xff]  }
   0x6   :  { %v85_v12 = vsel %vm53_vm1, %v37_v5, %v69_v8  ;;  %v38_v20 = vld [vmem:[%s656_s0 + $0x8] sm:$0xf]  ;;  %v39_v21 = vld [vmem:[%s656_s0 + $0xc] sm:$0xf]  ;;  %v506_v22 = vld [vmem:[%s655_s1 + $0x30] sm:$0xff]  }
   0x7   :  { %455 = vmatpush3.bf16.msra.mxu0 %v501_v1  ;;  %493 = vmatpush3.bf16.msra.mxu1 %v501_v1  ;;  %v419_v15 = vcombine.low %v84_v11, %v85_v12  ;;  %v92_v16 = vsel %vm60_vm2, %v44_v6, %v76_v10  ;;  %v93_v17 = vsel %vm61_vm3, %v45_v9, %v77_v13  ;;  %v46_v23 = vld [vmem:[%s656_s0 + $0x28] sm:$0xf]  ;;  %v47_v24 = vld [vmem:[%s656_s0 + $0x2c] sm:$0xf]  ;;  %v70_v25 = vmul.bf16 1045249613, %v38_v20 }
   0x8   :  { %456 = vmatprep.subr.bf16.mxu0 %v502_v2  ;;  %486 = vmatprep.subr.bf16.mxu1 %v502_v2  ;;  %v423_v18 = vcombine.low %v92_v16, %v93_v17  ;;  %v40_v26 = vld [vmem:[%s656_s0 + $0x10] sm:$0xf]  ;;  %v41_v27 = vld [vmem:[%s656_s0 + $0x14] sm:$0xf]  ;;  %vm54_vm4 = vcmp.gt.bf16.partialorder %v38_v20, 0  ;;  %vm55_vm5 = vcmp.gt.bf16.partialorder %v39_v21, 0 }
   0x9   :  { %468 = vmatprep.mubr.bf16.mxu0 %v419_v15  ;;  %v48_v28 = vld [vmem:[%s656_s0 + $0x30] sm:$0xf]  ;;  %v49_v29 = vld [vmem:[%s656_s0 + $0x34] sm:$0xf]  ;;  %v507_v30 = vld [vmem:[%s655_s1 + $0x38] sm:$0xff]   ;;  %vm62_vm6 = vcmp.gt.bf16.partialorder %v46_v23, 0  ;;  %v86_v38 = vsel %vm54_vm4, %v38_v20, %v70_v25 }
   0xa   :  { %476 = vmatprep.mubr.bf16.mxu1 %v423_v18  ;;  %v71_v31 = vmul.bf16 1045249613, %v39_v21  ;;  %vm63_vm7 = vcmp.gt.bf16.partialorder %v47_v24, 0  ;;  %v78_v32 = vmul.bf16 1045249613, %v46_v23  ;;  %vm56_vm8 = vcmp.gt.bf16.partialorder %v40_v26, 0 }
   0xb   :  { %457 = vmatpush3.bf16.msra.mxu0 %v502_v2  ;;  %494 = vmatpush3.bf16.msra.mxu1 %v502_v2  ;;  %v79_v33 = vmul.bf16 1045249613, %v47_v24  ;;  %v72_v34 = vmul.bf16 1045249613, %v40_v26  ;;  %v73_v35 = vmul.bf16 1045249613, %v41_v27 }
   0xc   :  { %458 = vmatprep.subr.bf16.mxu0 %v503_v3  ;;  %487 = vmatprep.subr.bf16.mxu1 %v503_v3  ;;  %vm57_vm9 = vcmp.gt.bf16.partialorder %v41_v27, 0  ;;  %v80_v36 = vmul.bf16 1045249613, %v48_v28  ;;  %v81_v37 = vmul.bf16 1045249613, %v49_v29  ;;  %vm64_vm10 = vcmp.gt.bf16.partialorder %v48_v28, 0 }
   0xd   :  { %vm65_vm11 = vcmp.gt.bf16.partialorder %v49_v29, 0  ;;  %v87_v39 = vsel %vm55_vm5, %v39_v21, %v71_v31  ;;  %v94_v40 = vsel %vm62_vm6, %v46_v23, %v78_v32  ;;  %v95_v41 = vsel %vm63_vm7, %v47_v24, %v79_v33  ;;  %v42_v44 = vld [vmem:[%s656_s0 + $0x18] sm:$0xf]  ;;  %v43_v47 = vld [vmem:[%s656_s0 + $0x1c] sm:$0xf] }
   0xe   :  { %v88_v42 = vsel %vm56_vm8, %v40_v26, %v72_v34  ;;  %v89_v43 = vsel %vm57_vm9, %v41_v27, %v73_v35  ;;  %v96_v45 = vsel %vm64_vm10, %v48_v28, %v80_v36  ;;  %v97_v46 = vsel %vm65_vm11, %v49_v29, %v81_v37  ;;  %v50_v48 = vld [vmem:[%s656_s0 + $0x38] sm:$0xf]  ;;  %v51_v49 = vld [vmem:[%s656_s0 + $0x3c] sm:$0xf]  ;;  %v435_v0 = vld [vmem:[%s657_s2] ss:$0 sm:$0xff] }
   0xf   :  { %459 = vmatpush3.bf16.msra.mxu0 %v503_v3  ;;  %495 = vmatpush3.bf16.msra.mxu1 %v503_v3  ;;  %v420_v50 = vcombine.low %v86_v38, %v87_v39  ;;  %v424_v51 = vcombine.low %v94_v40, %v95_v41  ;;  %v421_v52 = vcombine.low %v88_v42, %v89_v43  ;;  %vm58_vm12 = vcmp.gt.bf16.partialorder %v42_v44, 0 }
  0x10   :  { %460 = vmatprep.subr.bf16.mxu0 %v504_v14  ;;  %488 = vmatprep.subr.bf16.mxu1 %v504_v14  ;;  %v74_v53 = vmul.bf16 1045249613, %v42_v44  ;;  %v425_v54 = vcombine.low %v96_v45, %v97_v46  ;;  %v75_v55 = vmul.bf16 1045249613, %v43_v47  ;;  %v82_v56 = vmul.bf16 1045249613, %v50_v48 }
  0x11   :  { %v83_v57 = vmul.bf16 1045249613, %v51_v49  ;;  %vm59_vm13 = vcmp.gt.bf16.partialorder %v43_v47, 0  ;;  %vm66_vm14 = vcmp.gt.bf16.partialorder %v50_v48, 0  ;;  %vm67_vm15 = vcmp.gt.bf16.partialorder %v51_v49, 0 }
  0x12   :  { %v90_v58 = vsel %vm58_vm12, %v42_v44, %v74_v53  ;;  %v91_v59 = vsel %vm59_vm13, %v43_v47, %v75_v55  ;;  %v98_v60 = vsel %vm66_vm14, %v50_v48, %v82_v56 }
  0x13   :  { %461 = vmatpush3.bf16.msra.mxu0 %v504_v14  ;;  %496 = vmatpush3.bf16.msra.mxu1 %v504_v14  ;;  %v99_v61 = vsel %vm67_vm15, %v51_v49, %v83_v57  ;;  %v422_v62 = vcombine.low %v90_v58, %v91_v59 }
  0x14   :  { %462 = vmatprep.subr.bf16.mxu0 %v505_v19  ;;  %489 = vmatprep.subr.bf16.mxu1 %v505_v19  ;;  %v426_v63 = vcombine.low %v98_v60, %v99_v61 }
  0x17   :  { %463 = vmatpush3.bf16.msra.mxu0 %v505_v19  ;;  %497 = vmatpush3.bf16.msra.mxu1 %v505_v19 }
  0x18   :  { %464 = vmatprep.subr.bf16.mxu0 %v506_v22  ;;  %490 = vmatprep.subr.bf16.mxu1 %v506_v22 }
  0x1b   :  { %465 = vmatpush3.bf16.msra.mxu0 %v506_v22  ;;  %498 = vmatpush3.bf16.msra.mxu1 %v506_v22 }
  0x1c   :  { %466 = vmatprep.subr.bf16.mxu0 %v507_v30  ;;  %491 = vmatprep.subr.bf16.mxu1 %v507_v30 }
  0x1f   :  { %467 = vmatpush3.bf16.msra.mxu0 %v507_v30  ;;  %499 = vmatpush3.bf16.msra.mxu1 %v507_v30 }
  0x22   :  { %469 = vmatmul.mubr.bf16.vlgmr.msra.gmra.mrb[0].mxu0 %v420_v50  ;;  %477 = vmatmul.mubr.bf16.vlgmr.msra.gmra.mrb[0].mxu1 %v424_v51 }
  0x23   :  { %472 = vmatprep.mubr.bf16.mxu0 %v421_v52  ;;  %480 = vmatprep.mubr.bf16.mxu1 %v425_v54 }
  0x2a   :  { %473 = vmatmul.mubr.bf16.gmra.mrb[4].mxu0 %v422_v62  ;;  %481 = vmatmul.mubr.bf16.gmra.mrb[4].mxu1 %v426_v63 }
  0xf5   :  { %v470_v1 = vpop.f32.mrb[0].mxu0  ;;  %v478_v2 = vpop.f32.mrb[0].mxu1 }
  0xf6   :  { %v385_v3 = vadd.f32 %v470_v1, %v435_v0  ;;  %v393_v4 = vadd.f32 %v478_v2, %v435_v0  ;;  %v262_v5 = vpop.f32.mrb[1].mxu0  ;;  %v294_v6 = vpop.f32.mrb[1].mxu1 }
  0xf7   :  { %v383_v7 = vadd.f32 %v435_v0, %v262_v5  ;;  %v391_v8 = vadd.f32 %v435_v0, %v294_v6  ;;  %v471_v9 = vpop.f32.mrb[2].mxu0  ;;  %v479_v10 = vpop.f32.mrb[2].mxu1 }
  0xf8   :  { %401 = vst [vmem:[%s658_s3 + $0x10] sm:$0xff] %v385_v3  ;;  %409 = vst [vmem:[%s658_s3 + $0x50] sm:$0xff] %v393_v4  ;;  %v386_v11 = vadd.f32 %v471_v9, %v435_v0  ;;  %v394_v12 = vadd.f32 %v479_v10, %v435_v0  ;;  %v265_v13 = vpop.f32.mrb[3].mxu0  ;;  %v297_v14 = vpop.f32.mrb[3].mxu1 }
  0xf9   :  { %399 = vst [vmem:[%s658_s3] sm:$0xff] %v383_v7  ;;  %407 = vst [vmem:[%s658_s3 + $0x40] sm:$0xff] %v391_v8  ;;  %v384_v15 = vadd.f32 %v435_v0, %v265_v13  ;;  %v392_v16 = vadd.f32 %v435_v0, %v297_v14 }
  0xfa   :  { %402 = vst [vmem:[%s658_s3 + $0x18] sm:$0xff] %v386_v11  ;;  %410 = vst [vmem:[%s658_s3 + $0x58] sm:$0xff] %v394_v12 }
  0xfb   :  { %400 = vst [vmem:[%s658_s3 + $0x8] sm:$0xff] %v384_v15  ;;  %408 = vst [vmem:[%s658_s3 + $0x48] sm:$0xff] %v392_v16 }
  0xfd   :  { %v474_v17 = vpop.f32.mrb[4].mxu0  ;;  %v482_v18 = vpop.f32.mrb[4].mxu1 }
  0xfe   :  { %v389_v19 = vadd.f32 %v474_v17, %v435_v0  ;;  %v397_v20 = vadd.f32 %v482_v18, %v435_v0  ;;  %v278_v21 = vpop.f32.mrb[5].mxu0  ;;  %v310_v22 = vpop.f32.mrb[5].mxu1 }
  0xff   :  { %v387_v23 = vadd.f32 %v435_v0, %v278_v21  ;;  %v395_v24 = vadd.f32 %v435_v0, %v310_v22  ;;  %v475_v25 = vpop.f32.mrb[6].mxu0  ;;  %v483_v26 = vpop.f32.mrb[6].mxu1 }
 0x100   :  { %405 = vst [vmem:[%s658_s3 + $0x30] sm:$0xff] %v389_v19  ;;  %413 = vst [vmem:[%s658_s3 + $0x70] sm:$0xff] %v397_v20  ;;  %v390_v27 = vadd.f32 %v475_v25, %v435_v0  ;;  %v398_v28 = vadd.f32 %v483_v26, %v435_v0  ;;  %v281_v29 = vpop.f32.mrb[7].mxu0  ;;  %v313_v30 = vpop.f32.mrb[7].mxu1 }
 0x101   :  { %403 = vst [vmem:[%s658_s3 + $0x20] sm:$0xff] %v387_v23  ;;  %411 = vst [vmem:[%s658_s3 + $0x60] sm:$0xff] %v395_v24  ;;  %v388_v31 = vadd.f32 %v435_v0, %v281_v29  ;;  %v396_v32 = vadd.f32 %v435_v0, %v313_v30 }
 0x102   :  { %406 = vst [vmem:[%s658_s3 + $0x38] sm:$0xff] %v390_v27  ;;  %414 = vst [vmem:[%s658_s3 + $0x78] sm:$0xff] %v398_v28 }
 0x103   :  { %404 = vst [vmem:[%s658_s3 + $0x28] sm:$0xff] %v388_v31  ;;  %412 = vst [vmem:[%s658_s3 + $0x68] sm:$0xff] %v396_v32 }

// kernel: _lambda_.27
= control target key start
LH: loop header
LB: loop body
LE: loop exit
PB: predicated region body
PF: predicated region fallthrough
CT: control target
= control target key end

     0   :  { %v133_v7 = vmov 1966171168   ;;  %v32_v9 = vlaneseq  ;;  %vm109_vm0 = vcmask 130048   ;;  %s280_s1 = inlined_call_operand.vmem [shape: f32[2,16], index: 1, kind: input, shape index: {}]   ;;  %s281_s2 = inlined_call_operand.vmem [shape: f32[1,16], index: 2, kind: input, shape index: {}]   ;;  %s282_s0 = inlined_call_operand.vmem [shape: f32[128,16], index: 0, kind: input, shape index: {}]   ;;  %s283_s3 = inlined_call_operand.vmem [shape: f32[1,16], index: 3, kind: input, shape index: {}]   ;;  %s284_s4 = inlined_call_operand.vmem [shape: f32[128,16], index: 4, kind: output, shape index: {}]  }
   0x1   :  { %v17_v0 = vld [vmem:[%s280_s1] sm:$0x3]  ;;  %v30_v8 = vunpack.c.l.s4 %v133_v7  ;;  %v50_v22 = vld [vmem:[%s282_s0 + $0x8] sm:$0xff]  ;;  %v51_v23 = vld [vmem:[%s282_s0 + $0x10] sm:$0xff] }
   0x2   :  { %v18_v1 = vmul.f32 0.0078125, %v17_v0  ;;  %v33_v11 = vshrl.u32 %v32_v9, 7  ;;  %v25_v16 = vld [vmem:[%s281_s2] sm:$0x1]  ;;  %v52_v24 = vld [vmem:[%s282_s0 + $0x18] sm:$0xff]  ;;  %v54_v28 = vld [vmem:[%s282_s0 + $0x28] sm:$0xff] }
   0x3   :  { %v31_v10 = vunpack.c.0.s8 %v30_v8  ;;  %v46_v20 = vld [vmem:[%s283_s3] sm:$0x1]  ;;  %v55_v29 = vld [vmem:[%s282_s0 + $0x30] sm:$0xff]  ;;  %v56_v30 = vld [vmem:[%s282_s0 + $0x38] sm:$0xff] }
   0x4   :  { %v19_v2 = vmul.f32 %v18_v1, %v18_v1  ;;  %v68_v18 = vsub.s32 0, %v33_v11  ;;  %v49_v21 = vld [vmem:[%s282_s0] sm:$0xff]  ;;  %v58_v32 = vld [vmem:[%s282_s0 + $0x48] sm:$0xff]  ;;  %v59_v33 = vld [vmem:[%s282_s0 + $0x50] sm:$0xff] }
   0x5   :  { %v34_v12 = vsub.s32 %v31_v10, %v33_v11  ;;  %v53_v25 = vld [vmem:[%s282_s0 + $0x20] sm:$0xff]  ;;  %v60_v38 = vld [vmem:[%s282_s0 + $0x58] sm:$0xff]  ;;  %v62_v40 = vld [vmem:[%s282_s0 + $0x68] sm:$0xff] }
   0x6   :  { %v21_v3 = vrot.slane %v19_v2, 7  ;;  %v57_v31 = vld [vmem:[%s282_s0 + $0x40] sm:$0xff]  ;;  %v63_v57 = vld [vmem:[%s282_s0 + $0x70] sm:$0xff]  ;;  %v64_v58 = vld [vmem:[%s282_s0 + $0x78] sm:$0xff] }
   0x7   :  { %v61_v39 = vld [vmem:[%s282_s0 + $0x60] sm:$0xff] }
   0x8   :  { %v23_v4 = vsub.f32 %v18_v1, %v21_v3 }
   0xa   :  { %v24_v5 = vmax.f32 %v23_v4, 0.0 }
   0xc   :  { %v26_v6 = vadd.f32 1e-05, %v24_v5 }
   0xe   :  { %131 = vrsqrt.f32 %v26_v6 }
  0x18   :  { %v132_v13 = vpop.eup %131 }
  0x19   :  { %v35_v14 = vrot.slane %v132_v13, %v34_v12 }
  0x1b   :  { %v36_v15 = vcombine.high %v35_v14, %v35_v14 }
  0x1d   :  { %v43_v17 = vrot.slane %v36_v15, %v34_v12 }
  0x1f   :  { %v45_v19 = vmul.f32 %v43_v17, %v25_v16 }
  0x21   :  { %v47_v26 = vmul.f32 %v45_v19, %v18_v1  ;;  %v69_v27 = vrot.slane %v45_v19, %v68_v18 }
  0x23   :  { %v48_v34 = vsub.f32 %v46_v20, %v47_v26  ;;  %v71_v35 = vmul.f32 %v69_v27, %v49_v21  ;;  %v72_v36 = vmul.f32 %v69_v27, %v50_v22  ;;  %v73_v37 = vmul.f32 %v69_v27, %v51_v23 }
  0x24   :  { %v74_v41 = vmul.f32 %v69_v27, %v52_v24  ;;  %v75_v42 = vmul.f32 %v69_v27, %v53_v25  ;;  %v76_v43 = vmul.f32 %v69_v27, %v54_v28  ;;  %v77_v44 = vmul.f32 %v69_v27, %v55_v29 }
  0x25   :  { %v91_v45 = vrot.slane %v48_v34, %v68_v18  ;;  %v78_v46 = vmul.f32 %v69_v27, %v56_v30  ;;  %v79_v47 = vmul.f32 %v69_v27, %v57_v31  ;;  %v80_v48 = vmul.f32 %v69_v27, %v58_v32 }
  0x26   :  { %v81_v49 = vmul.f32 %v69_v27, %v59_v33  ;;  %v82_v50 = vmul.f32 %v69_v27, %v60_v38  ;;  %v83_v51 = vmul.f32 %v69_v27, %v61_v39  ;;  %v84_v52 = vmul.f32 %v69_v27, %v62_v40 }
  0x27   :  { %v93_v53 = vadd.f32 %v91_v45, %v71_v35  ;;  %v94_v54 = vadd.f32 %v91_v45, %v72_v36  ;;  %v95_v55 = vadd.f32 %v91_v45, %v73_v37  ;;  %v96_v56 = vadd.f32 %v91_v45, %v74_v41 }
  0x28   :  { %v97_v59 = vadd.f32 %v91_v45, %v75_v42  ;;  %v98_v60 = vadd.f32 %v91_v45, %v76_v43  ;;  %v99_v61 = vadd.f32 %v91_v45, %v77_v44  ;;  %v100_v62 = vadd.f32 %v91_v45, %v78_v46 }
  0x29   :  { %110 = vst.msk [vmem:[%s284_s4] sm:$0xff] %vm109_vm0, %v93_v53  ;;  %111 = vst.msk [vmem:[%s284_s4 + $0x8] sm:$0xff] %vm109_vm0, %v94_v54  ;;  %v101_v63 = vadd.f32 %v91_v45, %v79_v47  ;;  %v102_v0 = vadd.f32 %v91_v45, %v80_v48  ;;  %v103_v1 = vadd.f32 %v91_v45, %v81_v49 }
  0x2a   :  { %112 = vst.msk [vmem:[%s284_s4 + $0x10] sm:$0xff] %vm109_vm0, %v95_v55  ;;  %113 = vst.msk [vmem:[%s284_s4 + $0x18] sm:$0xff] %vm109_vm0, %v96_v56  ;;  %v104_v2 = vadd.f32 %v91_v45, %v82_v50  ;;  %v105_v3 = vadd.f32 %v91_v45, %v83_v51  ;;  %v106_v4 = vadd.f32 %v91_v45, %v84_v52 }
  0x2b   :  { %114 = vst.msk [vmem:[%s284_s4 + $0x20] sm:$0xff] %vm109_vm0, %v97_v59  ;;  %115 = vst.msk [vmem:[%s284_s4 + $0x28] sm:$0xff] %vm109_vm0, %v98_v60  ;;  %v85_v5 = vmul.f32 %v69_v27, %v63_v57  ;;  %v86_v6 = vmul.f32 %v69_v27, %v64_v58 }
  0x2c   :  { %116 = vst.msk [vmem:[%s284_s4 + $0x30] sm:$0xff] %vm109_vm0, %v99_v61  ;;  %117 = vst.msk [vmem:[%s284_s4 + $0x38] sm:$0xff] %vm109_vm0, %v100_v62 }
  0x2d   :  { %118 = vst.msk [vmem:[%s284_s4 + $0x40] sm:$0xff] %vm109_vm0, %v101_v63  ;;  %119 = vst.msk [vmem:[%s284_s4 + $0x48] sm:$0xff] %vm109_vm0, %v102_v0  ;;  %v107_v7 = vadd.f32 %v91_v45, %v85_v5  ;;  %v108_v8 = vadd.f32 %v91_v45, %v86_v6 }
  0x2e   :  { %120 = vst.msk [vmem:[%s284_s4 + $0x50] sm:$0xff] %vm109_vm0, %v103_v1  ;;  %121 = vst.msk [vmem:[%s284_s4 + $0x58] sm:$0xff] %vm109_vm0, %v104_v2 }
  0x2f   :  { %122 = vst.msk [vmem:[%s284_s4 + $0x60] sm:$0xff] %vm109_vm0, %v105_v3  ;;  %123 = vst.msk [vmem:[%s284_s4 + $0x68] sm:$0xff] %vm109_vm0, %v106_v4 }
  0x30   :  { %124 = vst.msk [vmem:[%s284_s4 + $0x70] sm:$0xff] %vm109_vm0, %v107_v7  ;;  %125 = vst.msk [vmem:[%s284_s4 + $0x78] sm:$0xff] %vm109_vm0, %v108_v8 }

// kernel: _lambda_.30
= control target key start
LH: loop header
LB: loop body
LE: loop exit
PB: predicated region body
PF: predicated region fallthrough
CT: control target
= control target key end

     0   :  { %v85_v7 = vmov 1966171168   ;;  %v32_v9 = vlaneseq  ;;  %vm73_vm0 = vcmask 261120   ;;  %s144_s1 = inlined_call_operand.vmem [shape: f32[2,32], index: 1, kind: input, shape index: {}]   ;;  %s145_s2 = inlined_call_operand.vmem [shape: f32[1,32], index: 2, kind: input, shape index: {}]   ;;  %s146_s3 = inlined_call_operand.vmem [shape: f32[1,32], index: 3, kind: input, shape index: {}]   ;;  %s147_s0 = inlined_call_operand.vmem [shape: f32[32,32], index: 0, kind: input, shape index: {}]   ;;  %s148_s4 = inlined_call_operand.vmem [shape: f32[32,32], index: 4, kind: output, shape index: {}]  }
   0x1   :  { %v17_v0 = vld [vmem:[%s144_s1] sm:$0x3]  ;;  %v30_v8 = vunpack.c.l.s4 %v85_v7  ;;  %v50_v22 = vld [vmem:[%s147_s0 + $0x8] sm:$0xff]  ;;  %v51_v23 = vld [vmem:[%s147_s0 + $0x10] sm:$0xff] }
   0x2   :  { %v18_v1 = vmul.f32 0.03125, %v17_v0  ;;  %v33_v11 = vshrl.u32 %v32_v9, 7  ;;  %v25_v16 = vld [vmem:[%s145_s2] sm:$0x1]  ;;  %v52_v26 = vld [vmem:[%s147_s0 + $0x18] sm:$0xff] }
   0x3   :  { %v31_v10 = vunpack.c.0.s8 %v30_v8  ;;  %v46_v20 = vld [vmem:[%s146_s3] sm:$0x1] }
   0x4   :  { %v19_v2 = vmul.f32 %v18_v1, %v18_v1  ;;  %v56_v18 = vsub.s32 0, %v33_v11  ;;  %v49_v21 = vld [vmem:[%s147_s0] sm:$0xff] }
   0x5   :  { %v34_v12 = vsub.s32 %v31_v10, %v33_v11 }
   0x6   :  { %v21_v3 = vrot.slane %v19_v2, 7 }
   0x8   :  { %v23_v4 = vsub.f32 %v18_v1, %v21_v3 }
   0xa   :  { %v24_v5 = vmax.f32 %v23_v4, 0.0 }
   0xc   :  { %v26_v6 = vadd.f32 1e-05, %v24_v5 }
   0xe   :  { %83 = vrsqrt.f32 %v26_v6 }
  0x18   :  { %v84_v13 = vpop.eup %83 }
  0x19   :  { %v35_v14 = vrot.slane %v84_v13, %v34_v12 }
  0x1b   :  { %v36_v15 = vcombine.high %v35_v14, %v35_v14 }
  0x1d   :  { %v43_v17 = vrot.slane %v36_v15, %v34_v12 }
  0x1f   :  { %v45_v19 = vmul.f32 %v43_v17, %v25_v16 }
  0x21   :  { %v47_v24 = vmul.f32 %v45_v19, %v18_v1  ;;  %v57_v25 = vrot.slane %v45_v19, %v56_v18 }
  0x23   :  { %v48_v27 = vsub.f32 %v46_v20, %v47_v24  ;;  %v59_v28 = vmul.f32 %v57_v25, %v49_v21  ;;  %v60_v29 = vmul.f32 %v57_v25, %v50_v22  ;;  %v61_v30 = vmul.f32 %v57_v25, %v51_v23 }
  0x24   :  { %v62_v31 = vmul.f32 %v57_v25, %v52_v26 }
  0x25   :  { %v67_v32 = vrot.slane %v48_v27, %v56_v18 }
  0x27   :  { %v69_v33 = vadd.f32 %v67_v32, %v59_v28  ;;  %v70_v34 = vadd.f32 %v67_v32, %v60_v29  ;;  %v71_v35 = vadd.f32 %v67_v32, %v61_v30  ;;  %v72_v36 = vadd.f32 %v67_v32, %v62_v31 }
  0x29   :  { %74 = vst.msk [vmem:[%s148_s4] sm:$0xff] %vm73_vm0, %v69_v33  ;;  %75 = vst.msk [vmem:[%s148_s4 + $0x8] sm:$0xff] %vm73_vm0, %v70_v34 }
  0x2a   :  { %76 = vst.msk [vmem:[%s148_s4 + $0x10] sm:$0xff] %vm73_vm0, %v71_v35  ;;  %77 = vst.msk [vmem:[%s148_s4 + $0x18] sm:$0xff] %vm73_vm0, %v72_v36 }

// kernel: _lambda_.29
= control target key start
LH: loop header
LB: loop body
LE: loop exit
PB: predicated region body
PF: predicated region fallthrough
CT: control target
= control target key end

     0   :  { %vm12_vm0 = vcmask 254976   ;;  %vm19_vm1 = vcmask 261120   ;;  %v60_v0 = vmov 0.0   ;;  %vm50_vm2 = vcmask 1040384   ;;  %s102_s0 = inlined_call_operand.vmem [shape: f32[32,32], index: 0, kind: input, shape index: {}]   ;;  %s103_s1 = inlined_call_operand.vmem [shape: f32[2,32], index: 1, kind: output, shape index: {}]  }
   0x1   :  { %13 = vst.msk [vmem:[%s103_s1] sm:$0x3] %vm12_vm0, %v60_v0  ;;  %v14_v1 = vld [vmem:[%s102_s0] sm:$0xff]  ;;  %v15_v2 = vld [vmem:[%s102_s0 + $0x8] sm:$0xff]  ;;  %v16_v3 = vld [vmem:[%s102_s0 + $0x10] sm:$0xff] }
   0x2   :  { %v17_v4 = vld [vmem:[%s102_s0 + $0x18] sm:$0xff]  ;;  %v20_v5 = vsel %vm19_vm1, %v14_v1, 0.0  ;;  %v21_v6 = vsel %vm19_vm1, %v15_v2, 0.0  ;;  %v23_v7 = vsel %vm19_vm1, %v16_v3, 0.0  ;;  %v33_v8 = vmul.f32 %v14_v1, %v14_v1 }
   0x3   :  { %v22_v9 = vadd.f32 %v21_v6, %v20_v5  ;;  %v34_v10 = vmul.f32 %v15_v2, %v15_v2  ;;  %v35_v11 = vmul.f32 %v16_v3, %v16_v3  ;;  %v25_v12 = vsel %vm19_vm1, %v17_v4, 0.0 }
   0x4   :  { %v36_v13 = vmul.f32 %v17_v4, %v17_v4  ;;  %v37_v14 = vsel %vm19_vm1, %v33_v8, 0.0 }
   0x5   :  { %v24_v15 = vadd.f32 %v23_v7, %v22_v9  ;;  %v38_v16 = vsel %vm19_vm1, %v34_v10, 0.0  ;;  %v40_v17 = vsel %vm19_vm1, %v35_v11, 0.0 }
   0x6   :  { %v39_v18 = vadd.f32 %v38_v16, %v37_v14  ;;  %v42_v20 = vsel %vm19_vm1, %v36_v13, 0.0 }
   0x7   :  { %v26_v19 = vadd.f32 %v25_v12, %v24_v15 }
   0x8   :  { %v41_v21 = vadd.f32 %v40_v17, %v39_v18  ;;  %v18_v34 = vld [vmem:[%s103_s1] sm:$0x3] }
   0x9   :  { %v27_v22 = vrot.slane %v26_v19, 4 }
   0xa   :  { %v43_v23 = vadd.f32 %v42_v20, %v41_v21 }
   0xb   :  { %v28_v24 = vadd.f32 %v27_v22, %v26_v19 }
   0xc   :  { %v44_v25 = vrot.slane %v43_v23, 4 }
   0xd   :  { %v29_v26 = vrot.slane %v28_v24, 2 }
   0xe   :  { %v45_v27 = vadd.f32 %v44_v25, %v43_v23 }
   0xf   :  { %v30_v28 = vadd.f32 %v29_v26, %v28_v24 }
  0x10   :  { %v46_v29 = vrot.slane %v45_v27, 2 }
  0x11   :  { %v31_v30 = vrot.slane %v30_v28, 1 }
  0x12   :  { %v47_v31 = vadd.f32 %v46_v29, %v45_v27 }
  0x13   :  { %v32_v32 = vadd.f32 %v31_v30, %v30_v28 }
  0x14   :  { %v48_v33 = vrot.slane %v47_v31, 1 }
  0x16   :  { %v49_v35 = vadd.f32 %v48_v33, %v47_v31 }
  0x18   :  { %v51_v36 = vsel %vm50_vm2, %v32_v32, %v49_v35 }
  0x19   :  { %v52_v37 = vadd.f32 %v51_v36, %v18_v34 }
  0x1b   :  { %54 = vst.msk [vmem:[%s103_s1] sm:$0x3] %vm12_vm0, %v52_v37 }

// kernel: _lambda_.28
= control target key start
LH: loop header
LB: loop body
LE: loop exit
PB: predicated region body
PF: predicated region fallthrough
CT: control target
= control target key end

     0   :  { %s451_s1 = inlined_call_operand.vmem [shape: bf16[1,256,128], index: 1, kind: input, shape index: {}]   ;;  %s452_s0 = inlined_call_operand.vmem [shape: bf16[1,32,256], index: 0, kind: input, shape index: {}]   ;;  %s453_s2 = inlined_call_operand.vmem [shape: f32[1,1,128], index: 2, kind: input, shape index: {}]   ;;  %s454_s3 = inlined_call_operand.vmem [shape: f32[1,32,128], index: 3, kind: output, shape index: {}]  }
   0x1   :  { %v340_v0 = vld [vmem:[%s451_s1 + $0x40] sm:$0xff]   ;;  %v342_v2 = vld [vmem:[%s451_s1 + $0x48] sm:$0xff]   ;;  %v344_v4 = vld [vmem:[%s451_s1 + $0x50] sm:$0xff]  }
   0x2   :  { %v341_v1 = vld [vmem:[%s451_s1] sm:$0xff]   ;;  %296 = vmatprep.subr.bf16.mxu0 %v340_v0  ;;  %324 = vmatprep.subr.bf16.mxu1 %v340_v0  ;;  %v343_v3 = vld [vmem:[%s451_s1 + $0x8] sm:$0xff]   ;;  %v345_v5 = vld [vmem:[%s451_s1 + $0x10] sm:$0xff]  }
   0x3   :  { %297 = vmatpush3.bf16.msra.mxu0 %v341_v1  ;;  %332 = vmatpush3.bf16.msra.mxu1 %v341_v1  ;;  %v346_v6 = vld [vmem:[%s451_s1 + $0x58] sm:$0xff]   ;;  %v348_v8 = vld [vmem:[%s451_s1 + $0x60] sm:$0xff]   ;;  %v350_v10 = vld [vmem:[%s451_s1 + $0x68] sm:$0xff]  }
   0x4   :  { %298 = vmatprep.subr.bf16.mxu0 %v342_v2  ;;  %325 = vmatprep.subr.bf16.mxu1 %v342_v2  ;;  %v347_v7 = vld [vmem:[%s451_s1 + $0x18] sm:$0xff]   ;;  %v349_v9 = vld [vmem:[%s451_s1 + $0x20] sm:$0xff]   ;;  %v25_v12 = vld [vmem:[%s452_s0 + $0x8] sm:$0xff] }
   0x5   :  { %v24_v11 = vld [vmem:[%s452_s0] sm:$0xff]  ;;  %v26_v13 = vld [vmem:[%s452_s0 + $0x10] sm:$0xff]  ;;  %vm29_vm1 = vcmp.gt.bf16.partialorder %v25_v12, 0  ;;  %v33_v15 = vmul.bf16 1045249613, %v25_v12  ;;  %v27_v16 = vld [vmem:[%s452_s0 + $0x18] sm:$0xff] }
   0x6   :  { %vm28_vm0 = vcmp.gt.bf16.partialorder %v24_v11, 0  ;;  %v32_v14 = vmul.bf16 1045249613, %v24_v11  ;;  %vm30_vm2 = vcmp.gt.bf16.partialorder %v26_v13, 0  ;;  %v34_v17 = vmul.bf16 1045249613, %v26_v13 }
   0x7   :  { %299 = vmatpush3.bf16.msra.mxu0 %v343_v3  ;;  %333 = vmatpush3.bf16.msra.mxu1 %v343_v3  ;;  %v351_v18 = vld [vmem:[%s451_s1 + $0x28] sm:$0xff]   ;;  %v37_v20 = vsel %vm29_vm1, %v25_v12, %v33_v15  ;;  %vm31_vm3 = vcmp.gt.bf16.partialorder %v27_v16, 0  ;;  %v35_v21 = vmul.bf16 1045249613, %v27_v16  ;;  %v352_v22 = vld [vmem:[%s451_s1 + $0x70] sm:$0xff]   ;;  %v354_v28 = vld [vmem:[%s451_s1 + $0x78] sm:$0xff]  }
   0x8   :  { %300 = vmatprep.subr.bf16.mxu0 %v344_v4  ;;  %326 = vmatprep.subr.bf16.mxu1 %v344_v4  ;;  %v36_v19 = vsel %vm28_vm0, %v24_v11, %v32_v14  ;;  %v38_v24 = vsel %vm30_vm2, %v26_v13, %v34_v17  ;;  %v353_v27 = vld [vmem:[%s451_s1 + $0x30] sm:$0xff]   ;;  %v355_v29 = vld [vmem:[%s451_s1 + $0x38] sm:$0xff]   ;;  %v295_v35 = vld [vmem:[%s453_s2] ss:$0 sm:$0xff] }
   0x9   :  { %v276_v23 = vcombine.high %v36_v19, %v37_v20  ;;  %v39_v25 = vsel %vm31_vm3, %v27_v16, %v35_v21  ;;  %v275_v30 = vcombine.low %v36_v19, %v37_v20 }
   0xa   :  { %v278_v26 = vcombine.high %v38_v24, %v39_v25  ;;  %v277_v31 = vcombine.low %v38_v24, %v39_v25 }
   0xb   :  { %301 = vmatpush3.bf16.msra.mxu0 %v345_v5  ;;  %334 = vmatpush3.bf16.msra.mxu1 %v345_v5 }
   0xc   :  { %302 = vmatprep.subr.bf16.mxu0 %v346_v6  ;;  %327 = vmatprep.subr.bf16.mxu1 %v346_v6 }
   0xd   :  { %224 = vmatprep.mubr.bf16.mxu0 %v276_v23  ;;  %232 = vmatprep.mubr.bf16.mxu1 %v278_v26 }
   0xf   :  { %303 = vmatpush3.bf16.msra.mxu0 %v347_v7  ;;  %335 = vmatpush3.bf16.msra.mxu1 %v347_v7 }
  0x10   :  { %304 = vmatprep.subr.bf16.mxu0 %v348_v8  ;;  %328 = vmatprep.subr.bf16.mxu1 %v348_v8 }
  0x13   :  { %305 = vmatpush3.bf16.msra.mxu0 %v349_v9  ;;  %336 = vmatpush3.bf16.msra.mxu1 %v349_v9 }
  0x14   :  { %306 = vmatprep.subr.bf16.mxu0 %v350_v10  ;;  %329 = vmatprep.subr.bf16.mxu1 %v350_v10 }
  0x17   :  { %307 = vmatpush3.bf16.msra.mxu0 %v351_v18  ;;  %337 = vmatpush3.bf16.msra.mxu1 %v351_v18 }
  0x18   :  { %308 = vmatprep.subr.bf16.mxu0 %v352_v22  ;;  %330 = vmatprep.subr.bf16.mxu1 %v352_v22 }
  0x1b   :  { %309 = vmatpush3.bf16.msra.mxu0 %v353_v27  ;;  %338 = vmatpush3.bf16.msra.mxu1 %v353_v27 }
  0x1c   :  { %310 = vmatprep.subr.bf16.mxu0 %v354_v28  ;;  %331 = vmatprep.subr.bf16.mxu1 %v354_v28 }
  0x1f   :  { %311 = vmatpush3.bf16.msra.mxu0 %v355_v29  ;;  %339 = vmatpush3.bf16.msra.mxu1 %v355_v29 }
  0x22   :  { %225 = vmatmul.mubr.bf16.vlgmr.msra.gmra.mrb[0].mxu0 %v275_v30  ;;  %233 = vmatmul.mubr.bf16.vlgmr.msra.gmra.mrb[0].mxu1 %v277_v31 }
  0xf5   :  { %v312_v32 = vpop.f32.mrb[0].mxu0  ;;  %v318_v33 = vpop.f32.mrb[0].mxu1 }
  0xf6   :  { %v313_v34 = vpop.f32.mrb[1].mxu0  ;;  %v319_v36 = vpop.f32.mrb[1].mxu1 }
  0xf7   :  { %v314_v37 = vadd.f32 %v313_v34, %v312_v32  ;;  %v320_v38 = vadd.f32 %v319_v36, %v318_v33  ;;  %v315_v39 = vpop.f32.mrb[2].mxu0  ;;  %v321_v40 = vpop.f32.mrb[2].mxu1 }
  0xf8   :  { %v316_v41 = vpop.f32.mrb[3].mxu0  ;;  %v322_v42 = vpop.f32.mrb[3].mxu1 }
  0xf9   :  { %v263_v43 = vadd.f32 %v314_v37, %v295_v35  ;;  %v265_v44 = vadd.f32 %v320_v38, %v295_v35  ;;  %v317_v45 = vadd.f32 %v316_v41, %v315_v39  ;;  %v323_v46 = vadd.f32 %v322_v42, %v321_v40 }
  0xfb   :  { %267 = vst [vmem:[%s454_s3] sm:$0xff] %v263_v43  ;;  %269 = vst [vmem:[%s454_s3 + $0x10] sm:$0xff] %v265_v44  ;;  %v264_v47 = vadd.f32 %v317_v45, %v295_v35  ;;  %v266_v48 = vadd.f32 %v323_v46, %v295_v35 }
  0xfd   :  { %268 = vst [vmem:[%s454_s3 + $0x8] sm:$0xff] %v264_v47  ;;  %270 = vst [vmem:[%s454_s3 + $0x18] sm:$0xff] %v266_v48 }

// kernel: _lambda_.32
= control target key start
LH: loop header
LB: loop body
LE: loop exit
PB: predicated region body
PF: predicated region fallthrough
CT: control target
= control target key end

     0   :  { %vm12_vm0 = vcmask 517120   ;;  %vm16_vm1 = vcmask 523264   ;;  %v42_v0 = vmov 0.0   ;;  %vm32_vm2 = vcmask 1040384   ;;  %s67_s0 = inlined_call_operand.vmem [shape: f32[8,64], index: 0, kind: input, shape index: {}]   ;;  %s68_s1 = inlined_call_operand.vmem [shape: f32[2,64], index: 1, kind: output, shape index: {}]  }
   0x1   :  { %13 = vst.msk [vmem:[%s68_s1] sm:$0x3] %vm12_vm0, %v42_v0  ;;  %v14_v1 = vld [vmem:[%s67_s0] sm:$0xff] }
   0x2   :  { %v17_v2 = vsel %vm16_vm1, %v14_v1, 0.0  ;;  %v24_v3 = vmul.f32 %v14_v1, %v14_v1 }
   0x3   :  { %v18_v4 = vrot.slane %v17_v2, 4 }
   0x4   :  { %v25_v5 = vsel %vm16_vm1, %v24_v3, 0.0 }
   0x5   :  { %v19_v6 = vadd.f32 %v18_v4, %v17_v2  ;;  %v26_v7 = vrot.slane %v25_v5, 4 }
   0x7   :  { %v20_v8 = vrot.slane %v19_v6, 2  ;;  %v27_v9 = vadd.f32 %v26_v7, %v25_v5 }
   0x8   :  { %v15_v16 = vld [vmem:[%s68_s1] sm:$0x3] }
   0x9   :  { %v21_v10 = vadd.f32 %v20_v8, %v19_v6  ;;  %v28_v11 = vrot.slane %v27_v9, 2 }
   0xb   :  { %v22_v12 = vrot.slane %v21_v10, 1  ;;  %v29_v13 = vadd.f32 %v28_v11, %v27_v9 }
   0xd   :  { %v23_v14 = vadd.f32 %v22_v12, %v21_v10  ;;  %v30_v15 = vrot.slane %v29_v13, 1 }
   0xf   :  { %v31_v17 = vadd.f32 %v30_v15, %v29_v13 }
  0x11   :  { %v33_v18 = vsel %vm32_vm2, %v23_v14, %v31_v17 }
  0x12   :  { %v34_v19 = vadd.f32 %v33_v18, %v15_v16 }
  0x14   :  { %36 = vst.msk [vmem:[%s68_s1] sm:$0x3] %vm12_vm0, %v34_v19 }

// kernel: _lambda_.33
= control target key start
LH: loop header
LB: loop body
LE: loop exit
PB: predicated region body
PF: predicated region fallthrough
CT: control target
= control target key end

     0   :  { %v73_v7 = vmov 1966171168   ;;  %v32_v9 = vlaneseq  ;;  %vm64_vm0 = vcmask 523264   ;;  %s114_s1 = inlined_call_operand.vmem [shape: f32[2,64], index: 1, kind: input, shape index: {}]   ;;  %s115_s2 = inlined_call_operand.vmem [shape: f32[1,64], index: 2, kind: input, shape index: {}]   ;;  %s116_s0 = inlined_call_operand.vmem [shape: f32[8,64], index: 0, kind: input, shape index: {}]   ;;  %s117_s3 = inlined_call_operand.vmem [shape: f32[1,64], index: 3, kind: input, shape index: {}]   ;;  %s118_s4 = inlined_call_operand.vmem [shape: f32[8,64], index: 4, kind: output, shape index: {}]  }
   0x1   :  { %v17_v0 = vld [vmem:[%s114_s1] sm:$0x3]  ;;  %v30_v8 = vunpack.c.l.s4 %v73_v7 }
   0x2   :  { %v18_v1 = vmul.f32 0.125, %v17_v0  ;;  %v33_v11 = vshrl.u32 %v32_v9, 7  ;;  %v25_v16 = vld [vmem:[%s115_s2] sm:$0x1] }
   0x3   :  { %v31_v10 = vunpack.c.0.s8 %v30_v8  ;;  %v46_v20 = vld [vmem:[%s117_s3] sm:$0x1] }
   0x4   :  { %v19_v2 = vmul.f32 %v18_v1, %v18_v1  ;;  %v53_v18 = vsub.s32 0, %v33_v11  ;;  %v49_v21 = vld [vmem:[%s116_s0] sm:$0xff] }
   0x5   :  { %v34_v12 = vsub.s32 %v31_v10, %v33_v11 }
   0x6   :  { %v21_v3 = vrot.slane %v19_v2, 7 }
   0x8   :  { %v23_v4 = vsub.f32 %v18_v1, %v21_v3 }
   0xa   :  { %v24_v5 = vmax.f32 %v23_v4, 0.0 }
   0xc   :  { %v26_v6 = vadd.f32 1e-05, %v24_v5 }
   0xe   :  { %71 = vrsqrt.f32 %v26_v6 }
  0x18   :  { %v72_v13 = vpop.eup %71 }
  0x19   :  { %v35_v14 = vrot.slane %v72_v13, %v34_v12 }
  0x1b   :  { %v36_v15 = vcombine.high %v35_v14, %v35_v14 }
  0x1d   :  { %v43_v17 = vrot.slane %v36_v15, %v34_v12 }
  0x1f   :  { %v45_v19 = vmul.f32 %v43_v17, %v25_v16 }
  0x21   :  { %v47_v22 = vmul.f32 %v45_v19, %v18_v1  ;;  %v54_v23 = vrot.slane %v45_v19, %v53_v18 }
  0x23   :  { %v48_v24 = vsub.f32 %v46_v20, %v47_v22  ;;  %v56_v25 = vmul.f32 %v54_v23, %v49_v21 }
  0x25   :  { %v61_v26 = vrot.slane %v48_v24, %v53_v18 }
  0x27   :  { %v63_v27 = vadd.f32 %v61_v26, %v56_v25 }
  0x29   :  { %65 = vst.msk [vmem:[%s118_s4] sm:$0xff] %vm64_vm0, %v63_v27 }

// kernel: _lambda_.31
= control target key start
LH: loop header
LB: loop body
LE: loop exit
PB: predicated region body
PF: predicated region fallthrough
CT: control target
= control target key end

     0   :  { %s672_s1 = inlined_call_operand.vmem [shape: bf16[1,512,128], index: 1, kind: input, shape index: {}]   ;;  %s673_s0 = inlined_call_operand.vmem [shape: bf16[1,16,512], index: 0, kind: input, shape index: {}]   ;;  %s674_s2 = inlined_call_operand.vmem [shape: f32[1,1,128], index: 2, kind: input, shape index: {}]   ;;  %s675_s3 = inlined_call_operand.vmem [shape: f32[1,16,128], index: 3, kind: output, shape index: {}]  }
   0x1   :  { %v503_v0 = vld [vmem:[%s672_s1 + $0x40] sm:$0xff]   ;;  %v507_v4 = vld [vmem:[%s672_s1 + $0x48] sm:$0xff]   ;;  %v511_v8 = vld [vmem:[%s672_s1 + $0x50] sm:$0xff]  }
   0x2   :  { %v504_v1 = vld [vmem:[%s672_s1 + $0xc0] sm:$0xff]   ;;  %459 = vmatprep.subr.bf16.mxu0 %v503_v0  ;;  %v508_v5 = vld [vmem:[%s672_s1 + $0xc8] sm:$0xff]   ;;  %v512_v9 = vld [vmem:[%s672_s1 + $0xd0] sm:$0xff]  }
   0x3   :  { %v505_v2 = vld [vmem:[%s672_s1] sm:$0xff]   ;;  %481 = vmatprep.subr.bf16.mxu1 %v504_v1  ;;  %v509_v6 = vld [vmem:[%s672_s1 + $0x8] sm:$0xff]   ;;  %v513_v10 = vld [vmem:[%s672_s1 + $0x10] sm:$0xff]  }
   0x4   :  { %v506_v3 = vld [vmem:[%s672_s1 + $0x80] sm:$0xff]   ;;  %460 = vmatpush3.bf16.msra.mxu0 %v505_v2  ;;  %v510_v7 = vld [vmem:[%s672_s1 + $0x88] sm:$0xff]   ;;  %v514_v11 = vld [vmem:[%s672_s1 + $0x90] sm:$0xff]  }
   0x5   :  { %482 = vmatpush3.bf16.msra.mxu1 %v506_v3  ;;  %461 = vmatprep.subr.bf16.mxu0 %v507_v4  ;;  %v515_v12 = vld [vmem:[%s672_s1 + $0x58] sm:$0xff]   ;;  %v519_v16 = vld [vmem:[%s672_s1 + $0x60] sm:$0xff]   ;;  %v523_v20 = vld [vmem:[%s672_s1 + $0x68] sm:$0xff]  }
   0x6   :  { %483 = vmatprep.subr.bf16.mxu1 %v508_v5  ;;  %v516_v13 = vld [vmem:[%s672_s1 + $0xd8] sm:$0xff]   ;;  %v520_v17 = vld [vmem:[%s672_s1 + $0xe0] sm:$0xff]   ;;  %v524_v21 = vld [vmem:[%s672_s1 + $0xe8] sm:$0xff]  }
   0x7   :  { %v517_v14 = vld [vmem:[%s672_s1 + $0x18] sm:$0xff]   ;;  %v521_v18 = vld [vmem:[%s672_s1 + $0x20] sm:$0xff]   ;;  %v525_v22 = vld [vmem:[%s672_s1 + $0x28] sm:$0xff]  }
   0x8   :  { %462 = vmatpush3.bf16.msra.mxu0 %v509_v6  ;;  %v518_v15 = vld [vmem:[%s672_s1 + $0x98] sm:$0xff]   ;;  %v522_v19 = vld [vmem:[%s672_s1 + $0xa0] sm:$0xff]   ;;  %v526_v23 = vld [vmem:[%s672_s1 + $0xa8] sm:$0xff]  }
   0x9   :  { %484 = vmatpush3.bf16.msra.mxu1 %v510_v7  ;;  %463 = vmatprep.subr.bf16.mxu0 %v511_v8  ;;  %v527_v24 = vld [vmem:[%s672_s1 + $0x70] sm:$0xff]   ;;  %v531_v28 = vld [vmem:[%s672_s1 + $0x78] sm:$0xff]   ;;  %v22_v32 = vld [vmem:[%s673_s0] sm:$0xff] }
   0xa   :  { %485 = vmatprep.subr.bf16.mxu1 %v512_v9  ;;  %v528_v25 = vld [vmem:[%s672_s1 + $0xf0] sm:$0xff]   ;;  %v532_v29 = vld [vmem:[%s672_s1 + $0xf8] sm:$0xff]   ;;  %v23_v34 = vld [vmem:[%s673_s0 + $0x8] sm:$0xff]  ;;  %vm26_vm0 = vcmp.gt.bf16.partialorder %v22_v32, 0  ;;  %v30_v35 = vmul.bf16 1045249613, %v22_v32 }
   0xb   :  { %v529_v26 = vld [vmem:[%s672_s1 + $0x30] sm:$0xff]   ;;  %v533_v30 = vld [vmem:[%s672_s1 + $0x38] sm:$0xff]   ;;  %vm27_vm2 = vcmp.gt.bf16.partialorder %v23_v34, 0  ;;  %v31_v38 = vmul.bf16 1045249613, %v23_v34 }
   0xc   :  { %464 = vmatpush3.bf16.msra.mxu0 %v513_v10  ;;  %v530_v27 = vld [vmem:[%s672_s1 + $0xb0] sm:$0xff]   ;;  %v534_v31 = vld [vmem:[%s672_s1 + $0xb8] sm:$0xff]   ;;  %v34_v39 = vsel %vm26_vm0, %v22_v32, %v30_v35  ;;  %v458_v58 = vld [vmem:[%s674_s2] ss:$0 sm:$0xff] }
   0xd   :  { %486 = vmatpush3.bf16.msra.mxu1 %v514_v11  ;;  %465 = vmatprep.subr.bf16.mxu0 %v515_v12  ;;  %v24_v33 = vld [vmem:[%s673_s0 + $0x10] sm:$0xff]  ;;  %v25_v37 = vld [vmem:[%s673_s0 + $0x18] sm:$0xff]  ;;  %v35_v44 = vsel %vm27_vm2, %v23_v34, %v31_v38 }
   0xe   :  { %487 = vmatprep.subr.bf16.mxu1 %v516_v13  ;;  %vm28_vm1 = vcmp.gt.bf16.partialorder %v24_v33, 0  ;;  %v32_v36 = vmul.bf16 1045249613, %v24_v33  ;;  %vm29_vm3 = vcmp.gt.bf16.partialorder %v25_v37, 0  ;;  %v33_v41 = vmul.bf16 1045249613, %v25_v37 }
  0x10   :  { %466 = vmatpush3.bf16.msra.mxu0 %v517_v14  ;;  %v36_v40 = vsel %vm28_vm1, %v24_v33, %v32_v36  ;;  %v37_v45 = vsel %vm29_vm3, %v25_v37, %v33_v41 }
  0x11   :  { %488 = vmatpush3.bf16.msra.mxu1 %v518_v15  ;;  %467 = vmatprep.subr.bf16.mxu0 %v519_v16  ;;  %v422_v42 = vcombine.low %v34_v39, %v36_v40  ;;  %v423_v43 = vcombine.high %v34_v39, %v36_v40  ;;  %v424_v46 = vcombine.low %v35_v44, %v37_v45 }
  0x12   :  { %489 = vmatprep.subr.bf16.mxu1 %v520_v17  ;;  %v425_v47 = vcombine.high %v35_v44, %v37_v45 }
  0x13   :  { %348 = vmatprep.mubr.bf16.mxu0 %v423_v43 }
  0x14   :  { %468 = vmatpush3.bf16.msra.mxu0 %v521_v18  ;;  %389 = vmatprep.mubr.bf16.mxu1 %v425_v47 }
  0x15   :  { %490 = vmatpush3.bf16.msra.mxu1 %v522_v19  ;;  %469 = vmatprep.subr.bf16.mxu0 %v523_v20 }
  0x16   :  { %491 = vmatprep.subr.bf16.mxu1 %v524_v21 }
  0x18   :  { %470 = vmatpush3.bf16.msra.mxu0 %v525_v22 }
  0x19   :  { %492 = vmatpush3.bf16.msra.mxu1 %v526_v23  ;;  %471 = vmatprep.subr.bf16.mxu0 %v527_v24 }
  0x1a   :  { %493 = vmatprep.subr.bf16.mxu1 %v528_v25 }
  0x1c   :  { %472 = vmatpush3.bf16.msra.mxu0 %v529_v26 }
  0x1d   :  { %494 = vmatpush3.bf16.msra.mxu1 %v530_v27  ;;  %473 = vmatprep.subr.bf16.mxu0 %v531_v28 }
  0x1e   :  { %495 = vmatprep.subr.bf16.mxu1 %v532_v29 }
  0x20   :  { %474 = vmatpush3.bf16.msra.mxu0 %v533_v30 }
  0x21   :  { %496 = vmatpush3.bf16.msra.mxu1 %v534_v31 }
  0x23   :  { %349 = vmatmul.mubr.bf16.vlgmr.msra.gmra.mrb[0].mxu0 %v422_v42 }
  0x24   :  { %390 = vmatmul.mubr.bf16.vlgmr.msra.gmra.mrb[0].mxu1 %v424_v46 }
  0xf6   :  { %v475_v48 = vpop.f32.mrb[0].mxu0 }
  0xf7   :  { %v476_v49 = vpop.f32.mrb[1].mxu0  ;;  %v497_v50 = vpop.f32.mrb[0].mxu1 }
  0xf8   :  { %v477_v51 = vadd.f32 %v476_v49, %v475_v48  ;;  %v478_v52 = vpop.f32.mrb[2].mxu0  ;;  %v498_v53 = vpop.f32.mrb[1].mxu1 }
  0xf9   :  { %v479_v54 = vpop.f32.mrb[3].mxu0  ;;  %v499_v55 = vadd.f32 %v498_v53, %v497_v50  ;;  %v500_v56 = vpop.f32.mrb[2].mxu1 }
  0xfa   :  { %v480_v57 = vadd.f32 %v479_v54, %v478_v52  ;;  %v501_v59 = vpop.f32.mrb[3].mxu1 }
  0xfb   :  { %v392_v60 = vadd.f32 %v499_v55, %v477_v51  ;;  %v502_v61 = vadd.f32 %v501_v59, %v500_v56 }
  0xfd   :  { %v414_v62 = vadd.f32 %v458_v58, %v392_v60  ;;  %v395_v63 = vadd.f32 %v502_v61, %v480_v57 }
  0xff   :  { %416 = vst [vmem:[%s675_s3] sm:$0xff] %v414_v62  ;;  %v415_v0 = vadd.f32 %v458_v58, %v395_v63 }
 0x101   :  { %417 = vst [vmem:[%s675_s3 + $0x8] sm:$0xff] %v415_v0 }

// kernel: _lambda_.34
= control target key start
LH: loop header
LB: loop body
LE: loop exit
PB: predicated region body
PF: predicated region fallthrough
CT: control target
= control target key end

     0   :  { %s1104_s12 = smov 0   ;;  %s1106_s13 = smov 0   ;;  %s1220_s0 = inlined_call_operand.vmem [shape: bf16[1,16,1024], index: 0, kind: input, shape index: {}]   ;;  %s1221_s1 = inlined_call_operand.vmem [shape: bf16[1,1024,128], index: 1, kind: input, shape index: {}]   ;;  %s1222_s2 = inlined_call_operand.vmem [shape: f32[1,1,128], index: 2, kind: input, shape index: {}]   ;;  %s1223_s3 = inlined_call_operand.vmem [shape: f32[1,16,128], index: 3, kind: output, shape index: {}]  }
   0x1   :  { %s1108_s14 = smov 0   ;;  %s1110_s15 = smov 0  }
   0x2   :  { %s1112_s16 = smov 0  }
   0x3 LB: > { %s28_s17 = sadd.s32 1, %s1077_s15  ;;  %p57_p1 = scmp.ne.s32.totalorder %s1069_s13, %s1065_s12  ;;  %s1081_s16 = sphi %s1112_s16, %s13_s16   ;;  %s1077_s15 = sphi %s1110_s15, %s1227_s15   ;;  %s1073_s14 = sphi %s1108_s14, %s1226_s14   ;;  %s1069_s13 = sphi %s1106_s13, %s1225_s13   ;;  %s1065_s12 = sphi %s1104_s12, %s1224_s12  }
   0x4   : > { %p29_p0 = scmp.ge.s32.totalorder %s28_s17, 2  ;;  %p58_p2 = scmp.eq.s32.totalorder %s1081_s16, 0 }
   0x5   : > { %s50_s19 = sadd.s32 1, %s1069_s13  ;;  %p874_p5 = scmp.ge.s32.totalorder %s1081_s16, 2 }
   0x6   : > { %s1229_s17 = smov (%p29_p0, %s28_s17), 0  ;;  %p59_p3 = por %p58_p2, %p57_p1 }
   0x7   : > { %s46_s18 = ssub.s32 %s1077_s15, %s1229_s17  ;;  %180 = sbr.rel (%p874_p5) target bundleno = 21 (0x15), region = 20 }
   0x8   : > { %p48_p4 = scmp.eq.s32.totalorder %s46_s18, 0 }
   0xa   : > { %s1139_s20 = scalar_select %p48_p4, %s1069_s13, %s50_s19  }
   0xe   : > { %183 = sbr.rel (!%p59_p3) target bundleno = 21 (0x15), region = 24  ;;  %s185_s21 = sand.u32 (%p59_p3), 1, %s1069_s13  }
   0xf   : > { %s925_s22 = sshll.u32 (%p59_p3), %s1077_s15, 4  ;;  %s875_s23 = sshll.u32 (%p59_p3), %s185_s21, 5 }
  0x10   : > { %s195_s26 = scalar_lea.vmem (%p59_p3), %s1220_s0, %s925_s22  ;;  %s187_s27 = scalar_lea.vmem (%p59_p3), [#allocation3], %s875_s23 }
  0x11   : > { %v208_v0 = vld [vmem:[%s195_s26] sm:$0xff] (%p59_p3)  ;;  %v210_v1 = vld [vmem:[%s195_s26 + $0x8] sm:$0xff] (%p59_p3) }
  0x12   : > { %v212_v2 = vld [vmem:[%s195_s26 + $0x20] sm:$0xff] (%p59_p3)  ;;  %209 = vst [vmem:[%s187_s27] sm:$0xff] (%p59_p3), %v208_v0  ;;  %211 = vst [vmem:[%s187_s27 + $0x8] sm:$0xff] (%p59_p3), %v210_v1  ;;  %v214_v3 = vld [vmem:[%s195_s26 + $0x28] sm:$0xff] (%p59_p3) }
  0x13   : > { %213 = vst [vmem:[%s187_s27 + $0x10] sm:$0xff] (%p59_p3), %v212_v2  ;;  %215 = vst [vmem:[%s187_s27 + $0x18] sm:$0xff] (%p59_p3), %v214_v3 }
  0x15 PF: > { %p878_p6 = scmp.ge.s32.totalorder %s1081_s16, 1  ;;  %p236_p7 = scmp.lt.s32.totalorder %s1081_s16, 3 }
  0x17   : > { %p237_p8 = pnand %p878_p6, %p236_p7 }
  0x18   : > { %s243_s28 = sand.u32 (!%p237_p8), 1, %s1065_s12   ;;  %s880_s29 = sshll.u32 (!%p237_p8), %s1073_s14, 6 }
  0x19   : > { %240 = sbr.rel (%p237_p8) target bundleno = 306 (0x132), region = 51  ;;  %s879_s30 = sshll.u32 (!%p237_p8), %s243_s28, 5 }
  0x1a   : > { %p296_p9 = scmp.lt.s32.totalorder (!%p237_p8), %s880_s29, 127  ;;  %s1156_s8 = scalar_lea.vmem (!%p237_p8), [#allocation3], %s879_s30 }
  0x1b   : > { %p882_p10 = scmp.ne.s32.totalorder (!%p237_p8), %s1073_s14, 0 }
  0x20   : > { %s1231_s29 = smov (!%p296_p9, %s880_s29), 127  ;;  %330 = sbr.rel (%p882_p10) target bundleno = 39 (0x27), region = 59 }
  0x21   : > { %s881_s4 = sshll.u32 %s1231_s29, 2  ;;  %v1083_v4 = vmov (!%p882_p10), 0.0  }
  0x22   : > { %s1154_s7 = scalar_lea.vmem %s1221_s1, %s881_s4  ;;  %331 = vst [vmem:[#allocation2] sm:$0xff] (!%p882_p10), %v1083_v4  ;;  %332 = vst [vmem:[#allocation2 + $0x8] sm:$0xff] (!%p882_p10), %v1083_v4 }
  0x27 PF: > { %v1011_v5 = vld [vmem:[%s1154_s7 + $0x40] sm:$0xff]   ;;  %v1015_v9 = vld [vmem:[%s1154_s7 + $0x48] sm:$0xff]   ;;  %v1019_v13 = vld [vmem:[%s1154_s7 + $0x50] sm:$0xff]   ;;  %p919_p11 = scmp.ne.s32.totalorder %s1073_s14, 1 }
  0x28   : > { %v1012_v6 = vld [vmem:[%s1154_s7 + $0xc0] sm:$0xff]   ;;  %926 = vmatprep.subr.bf16.mxu0 %v1011_v5  ;;  %v1016_v10 = vld [vmem:[%s1154_s7 + $0xc8] sm:$0xff]   ;;  %v1020_v14 = vld [vmem:[%s1154_s7 + $0xd0] sm:$0xff]  }
  0x29   : > { %v1013_v7 = vld [vmem:[%s1154_s7] sm:$0xff]   ;;  %948 = vmatprep.subr.bf16.mxu1 %v1012_v6  ;;  %v1017_v11 = vld [vmem:[%s1154_s7 + $0x8] sm:$0xff]   ;;  %v1021_v15 = vld [vmem:[%s1154_s7 + $0x10] sm:$0xff]  }
  0x2a   : > { %v1014_v8 = vld [vmem:[%s1154_s7 + $0x80] sm:$0xff]   ;;  %927 = vmatpush3.bf16.msra.mxu0 %v1013_v7  ;;  %v1018_v12 = vld [vmem:[%s1154_s7 + $0x88] sm:$0xff]   ;;  %v1022_v16 = vld [vmem:[%s1154_s7 + $0x90] sm:$0xff]  }
  0x2b   : > { %949 = vmatpush3.bf16.msra.mxu1 %v1014_v8  ;;  %928 = vmatprep.subr.bf16.mxu0 %v1015_v9  ;;  %v1023_v17 = vld [vmem:[%s1154_s7 + $0x58] sm:$0xff]   ;;  %v1027_v21 = vld [vmem:[%s1154_s7 + $0x60] sm:$0xff]   ;;  %v1031_v25 = vld [vmem:[%s1154_s7 + $0x68] sm:$0xff]  }
  0x2c   : > { %950 = vmatprep.subr.bf16.mxu1 %v1016_v10  ;;  %v1024_v18 = vld [vmem:[%s1154_s7 + $0xd8] sm:$0xff]   ;;  %v1028_v22 = vld [vmem:[%s1154_s7 + $0xe0] sm:$0xff]   ;;  %v1032_v26 = vld [vmem:[%s1154_s7 + $0xe8] sm:$0xff]  }
  0x2d   : > { %v1025_v19 = vld [vmem:[%s1154_s7 + $0x18] sm:$0xff]   ;;  %v1029_v23 = vld [vmem:[%s1154_s7 + $0x20] sm:$0xff]   ;;  %v1033_v27 = vld [vmem:[%s1154_s7 + $0x28] sm:$0xff]  }
  0x2e   : > { %929 = vmatpush3.bf16.msra.mxu0 %v1017_v11  ;;  %v1026_v20 = vld [vmem:[%s1154_s7 + $0x98] sm:$0xff]   ;;  %v1030_v24 = vld [vmem:[%s1154_s7 + $0xa0] sm:$0xff]   ;;  %v1034_v28 = vld [vmem:[%s1154_s7 + $0xa8] sm:$0xff]  }
  0x2f   : > { %951 = vmatpush3.bf16.msra.mxu1 %v1018_v12  ;;  %930 = vmatprep.subr.bf16.mxu0 %v1019_v13  ;;  %v1035_v29 = vld [vmem:[%s1154_s7 + $0x70] sm:$0xff]   ;;  %v1039_v33 = vld [vmem:[%s1154_s7 + $0x78] sm:$0xff]   ;;  %v335_v38 = vld [vmem:[%s1156_s8 + $0x10] sm:$0xff] }
  0x30   : > { %952 = vmatprep.subr.bf16.mxu1 %v1020_v14  ;;  %v1036_v30 = vld [vmem:[%s1154_s7 + $0xf0] sm:$0xff]   ;;  %v1040_v34 = vld [vmem:[%s1154_s7 + $0xf8] sm:$0xff]   ;;  %vm339_vm1 = vcmp.gt.bf16.partialorder %v335_v38, 0  ;;  %v343_v41 = vmul.bf16 1045249613, %v335_v38  ;;  %v336_v42 = vld [vmem:[%s1156_s8 + $0x18] sm:$0xff] }
  0x31   : > { %v1037_v31 = vld [vmem:[%s1154_s7 + $0x30] sm:$0xff]   ;;  %v1041_v35 = vld [vmem:[%s1154_s7 + $0x38] sm:$0xff]   ;;  %vm340_vm3 = vcmp.gt.bf16.partialorder %v336_v42, 0  ;;  %v344_v46 = vmul.bf16 1045249613, %v336_v42  ;;  %v349_v63 = vld [vmem:[#allocation2] sm:$0xff] }
  0x32   : > { %931 = vmatpush3.bf16.msra.mxu0 %v1021_v15  ;;  %v1038_v32 = vld [vmem:[%s1154_s7 + $0xb0] sm:$0xff]   ;;  %v1042_v36 = vld [vmem:[%s1154_s7 + $0xb8] sm:$0xff]   ;;  %v347_v45 = vsel %vm339_vm1, %v335_v38, %v343_v41  ;;  %v350_v3 = vld [vmem:[#allocation2 + $0x8] sm:$0xff] }
  0x33   : > { %953 = vmatpush3.bf16.msra.mxu1 %v1022_v16  ;;  %932 = vmatprep.subr.bf16.mxu0 %v1023_v17  ;;  %v333_v37 = vld [vmem:[%s1156_s8] sm:$0xff]  ;;  %v334_v39 = vld [vmem:[%s1156_s8 + $0x8] sm:$0xff]  ;;  %v348_v50 = vsel %vm340_vm3, %v336_v42, %v344_v46  ;;  %v920_v8 = vld [vmem:[%s1222_s2] ss:$0 sm:$0xff] (!%p919_p11) }
  0x34   : > { %954 = vmatprep.subr.bf16.mxu1 %v1024_v18  ;;  %vm337_vm0 = vcmp.gt.bf16.partialorder %v333_v37, 0  ;;  %v341_v40 = vmul.bf16 1045249613, %v333_v37  ;;  %vm338_vm2 = vcmp.gt.bf16.partialorder %v334_v39, 0  ;;  %v342_v43 = vmul.bf16 1045249613, %v334_v39 }
  0x36   : > { %933 = vmatpush3.bf16.msra.mxu0 %v1025_v19  ;;  %v345_v44 = vsel %vm337_vm0, %v333_v37, %v341_v40  ;;  %v346_v49 = vsel %vm338_vm2, %v334_v39, %v342_v43 }
  0x37   : > { %955 = vmatpush3.bf16.msra.mxu1 %v1026_v20  ;;  %934 = vmatprep.subr.bf16.mxu0 %v1027_v21  ;;  %v883_v47 = vcombine.low %v345_v44, %v347_v45  ;;  %v884_v48 = vcombine.high %v345_v44, %v347_v45  ;;  %v885_v51 = vcombine.low %v346_v49, %v348_v50 }
  0x38   : > { %956 = vmatprep.subr.bf16.mxu1 %v1028_v22  ;;  %v886_v52 = vcombine.high %v346_v49, %v348_v50 }
  0x39   : > { %659 = vmatprep.mubr.bf16.mxu0 %v884_v48 }
  0x3a   : > { %935 = vmatpush3.bf16.msra.mxu0 %v1029_v23  ;;  %700 = vmatprep.mubr.bf16.mxu1 %v886_v52 }
  0x3b   : > { %957 = vmatpush3.bf16.msra.mxu1 %v1030_v24  ;;  %936 = vmatprep.subr.bf16.mxu0 %v1031_v25 }
  0x3c   : > { %958 = vmatprep.subr.bf16.mxu1 %v1032_v26 }
  0x3e   : > { %937 = vmatpush3.bf16.msra.mxu0 %v1033_v27 }
  0x3f   : > { %959 = vmatpush3.bf16.msra.mxu1 %v1034_v28  ;;  %938 = vmatprep.subr.bf16.mxu0 %v1035_v29 }
  0x40   : > { %960 = vmatprep.subr.bf16.mxu1 %v1036_v30 }
  0x42   : > { %939 = vmatpush3.bf16.msra.mxu0 %v1037_v31 }
  0x43   : > { %961 = vmatpush3.bf16.msra.mxu1 %v1038_v32  ;;  %940 = vmatprep.subr.bf16.mxu0 %v1039_v33 }
  0x44   : > { %962 = vmatprep.subr.bf16.mxu1 %v1040_v34 }
  0x46   : > { %941 = vmatpush3.bf16.msra.mxu0 %v1041_v35 }
  0x47   : > { %963 = vmatpush3.bf16.msra.mxu1 %v1042_v36 }
  0x49   : > { %660 = vmatmul.mubr.bf16.vlgmr.msra.gmra.mrb[0].mxu0 %v883_v47 }
  0x4a   : > { %701 = vmatmul.mubr.bf16.vlgmr.msra.gmra.mrb[0].mxu1 %v885_v51 }
 0x11c   : > { %v942_v53 = vpop.f32.mrb[0].mxu0 }
 0x11d   : > { %v943_v54 = vpop.f32.mrb[1].mxu0  ;;  %v964_v55 = vpop.f32.mrb[0].mxu1 }
 0x11e   : > { %v944_v56 = vadd.f32 %v943_v54, %v942_v53  ;;  %v945_v57 = vpop.f32.mrb[2].mxu0  ;;  %v965_v58 = vpop.f32.mrb[1].mxu1 }
 0x11f   : > { %v946_v59 = vpop.f32.mrb[3].mxu0  ;;  %v966_v60 = vadd.f32 %v965_v58, %v964_v55  ;;  %v967_v61 = vpop.f32.mrb[2].mxu1 }
 0x120   : > { %v947_v62 = vadd.f32 %v946_v59, %v945_v57  ;;  %v968_v0 = vpop.f32.mrb[3].mxu1 }
 0x121   : > { %v703_v1 = vadd.f32 %v966_v60, %v944_v56  ;;  %v969_v2 = vadd.f32 %v968_v0, %v967_v61  ;;  %716 = sbr.rel (%p919_p11) target bundleno = 306 (0x132), region = 63 }
 0x123   : > { %v709_v4 = vadd.f32 %v703_v1, %v349_v63  ;;  %v706_v5 = vadd.f32 %v969_v2, %v947_v62 }
 0x125   : > { %711 = vst [vmem:[#allocation2] sm:$0xff] %v709_v4  ;;  %v710_v6 = vadd.f32 %v706_v5, %v350_v3 }
 0x127   : > { %712 = vst [vmem:[#allocation2 + $0x8] sm:$0xff] %v710_v6 }
 0x12c   : > { %v717_v7 = vld [vmem:[#allocation2] sm:$0xff] }
 0x12d   : > { %v726_v10 = vadd.f32 %v920_v8, %v717_v7 }
 0x12e   : > { %v718_v9 = vld [vmem:[#allocation2 + $0x8] sm:$0xff] }
 0x12f   : > { %v727_v11 = vadd.f32 %v920_v8, %v718_v9  ;;  %728 = vst [vmem:[%s1223_s3] sm:$0xff] %v726_v10 }
 0x131   : > { %729 = vst [vmem:[%s1223_s3 + $0x8] sm:$0xff] %v727_v11 }
 0x132 PF: > { %s13_s16 = sadd.s32 1, %s1081_s16   ;;  %s1224_s12 = smov %s1069_s13 }
 0x133   : > { %p10_p12 = scmp.ge.s32.totalorder %s13_s16, 4   ;;  %s1225_s13 = smov %s1139_s20 }
 0x134   : > { %s1226_s14 = smov %s1077_s15  ;;  %s1227_s15 = smov %s1229_s17 }
 0x135   :  { %12 = sbr.rel (!%p10_p12) target bundleno = 3 (0x3), region = 104 }

// kernel: _lambda_.35
= control target key start
LH: loop header
LB: loop body
LE: loop exit
PB: predicated region body
PF: predicated region fallthrough
CT: control target
= control target key end

     0   :  { %s820_s12 = smov 0   ;;  %s822_s13 = smov 0   ;;  %s886_s0 = inlined_call_operand.vmem [shape: bf16[4,16,256], index: 0, kind: input, shape index: {}]   ;;  %s887_s1 = inlined_call_operand.vmem [shape: bf16[4,256,128], index: 1, kind: input, shape index: {}]   ;;  %s888_s2 = inlined_call_operand.vmem [shape: f32[4,1,128], index: 2, kind: input, shape index: {}]   ;;  %s889_s3 = inlined_call_operand.vmem [shape: f32[4,16,128], index: 3, kind: output, shape index: {}]  }
   0x1   :  { %s824_s14 = smov 0  }
   0x2 LB: > { %s39_s15 = sadd.s32 1, %s793_s13  ;;  %p681_p0 = scmp.ge.s32.totalorder %s797_s14, 1  ;;  %s797_s14 = sphi %s824_s14, %s13_s14   ;;  %s793_s13 = sphi %s822_s13, %s891_s13   ;;  %s789_s12 = sphi %s820_s12, %s890_s12  }
   0x3   : > { %p41_p1 = scmp.ge.s32.totalorder %s39_s15, 4  ;;  %p217_p2 = scmp.lt.s32.totalorder %s797_s14, 5 }
   0x5   : > { %s893_s15 = smov (%p41_p1, %s39_s15), 0  ;;  %p218_p3 = pnand %p681_p0, %p217_p2 }
   0x6   : > { %p277_p4 = scmp.lt.s32.totalorder (!%p218_p3), %s789_s12, 3  ;;  %v799_v13 = vmov (!%p218_p3), 0  }
   0x7   : > { %221 = sbr.rel (%p218_p3) target bundleno = 270 (0x10e), region = 32 }
   0xe   : > { %s895_s12 = smov (!%p277_p4, %s789_s12), 3 }
   0xf   : > { %s710_s16 = sshll.u32 %s895_s12, 7  ;;  %s709_s20 = sshll.u32 %s895_s12, 4 }
  0x10   : > { %s844_s19 = scalar_lea.vmem %s887_s1, %s710_s16  ;;  %s288_s23 = scalar_lea.vmem %s886_s0, %s709_s20 }
  0x11   : > { %v759_v0 = vld [vmem:[%s844_s19 + $0x40] sm:$0xff]   ;;  %v761_v2 = vld [vmem:[%s844_s19 + $0x48] sm:$0xff]   ;;  %v763_v4 = vld [vmem:[%s844_s19 + $0x50] sm:$0xff]   ;;  %s309_s26 = scalar_lea.vmem %s888_s2, %s895_s12  ;;  %s321_s29 = scalar_lea.vmem %s889_s3, %s709_s20 }
  0x12   : > { %v760_v1 = vld [vmem:[%s844_s19] sm:$0xff]   ;;  %712 = vmatprep.subr.bf16.mxu0 %v759_v0  ;;  %v762_v3 = vld [vmem:[%s844_s19 + $0x8] sm:$0xff]   ;;  %v764_v5 = vld [vmem:[%s844_s19 + $0x10] sm:$0xff]  }
  0x13   : > { %713 = vmatpush3.bf16.msra.mxu0 %v760_v1  ;;  %v765_v6 = vld [vmem:[%s844_s19 + $0x58] sm:$0xff]   ;;  %v767_v8 = vld [vmem:[%s844_s19 + $0x60] sm:$0xff]   ;;  %v769_v10 = vld [vmem:[%s844_s19 + $0x68] sm:$0xff]  }
  0x14   : > { %714 = vmatprep.subr.bf16.mxu0 %v761_v2  ;;  %v766_v7 = vld [vmem:[%s844_s19 + $0x18] sm:$0xff]   ;;  %v768_v9 = vld [vmem:[%s844_s19 + $0x20] sm:$0xff]   ;;  %v331_v12 = vld [vmem:[%s288_s23 + $0x8] sm:$0xff] }
  0x15   : > { %v330_v11 = vld [vmem:[%s288_s23] sm:$0xff]  ;;  %v333_v15 = vmax.bf16 %v799_v13, %v331_v12  ;;  %v770_v16 = vld [vmem:[%s844_s19 + $0x28] sm:$0xff]   ;;  %v771_v18 = vld [vmem:[%s844_s19 + $0x70] sm:$0xff]  }
  0x16   : > { %v332_v14 = vmax.bf16 %v799_v13, %v330_v11  ;;  %v772_v19 = vld [vmem:[%s844_s19 + $0x30] sm:$0xff]   ;;  %v773_v20 = vld [vmem:[%s844_s19 + $0x78] sm:$0xff]   ;;  %v706_v25 = vld [vmem:[%s309_s26] ss:$0 sm:$0xff] }
  0x17   : > { %715 = vmatpush3.bf16.msra.mxu0 %v762_v3  ;;  %v774_v21 = vld [vmem:[%s844_s19 + $0x38] sm:$0xff]  }
  0x18   : > { %716 = vmatprep.subr.bf16.mxu0 %v763_v4  ;;  %v689_v17 = vcombine.high %v332_v14, %v333_v15  ;;  %v688_v22 = vcombine.low %v332_v14, %v333_v15 }
  0x1a   : > { %506 = vmatprep.mubr.bf16.mxu0 %v689_v17 }
  0x1b   : > { %717 = vmatpush3.bf16.msra.mxu0 %v764_v5 }
  0x1c   : > { %718 = vmatprep.subr.bf16.mxu0 %v765_v6 }
  0x1f   : > { %719 = vmatpush3.bf16.msra.mxu0 %v766_v7 }
  0x20   : > { %720 = vmatprep.subr.bf16.mxu0 %v767_v8 }
  0x23   : > { %721 = vmatpush3.bf16.msra.mxu0 %v768_v9 }
  0x24   : > { %722 = vmatprep.subr.bf16.mxu0 %v769_v10 }
  0x27   : > { %723 = vmatpush3.bf16.msra.mxu0 %v770_v16 }
  0x28   : > { %724 = vmatprep.subr.bf16.mxu0 %v771_v18 }
  0x2b   : > { %725 = vmatpush3.bf16.msra.mxu0 %v772_v19 }
  0x2c   : > { %726 = vmatprep.subr.bf16.mxu0 %v773_v20 }
  0x2f   : > { %727 = vmatpush3.bf16.msra.mxu0 %v774_v21 }
  0x32   : > { %507 = vmatmul.mubr.bf16.vlgmr.msra.gmra.mrb[0].mxu0 %v688_v22 }
 0x105   : > { %v728_v23 = vpop.f32.mrb[0].mxu0 }
 0x106   : > { %v729_v24 = vpop.f32.mrb[1].mxu0 }
 0x107   : > { %v730_v26 = vadd.f32 %v729_v24, %v728_v23  ;;  %v731_v27 = vpop.f32.mrb[2].mxu0 }
 0x108   : > { %v732_v28 = vpop.f32.mrb[3].mxu0 }
 0x109   : > { %v531_v29 = vadd.f32 %v730_v26, %v706_v25  ;;  %v733_v30 = vadd.f32 %v732_v28, %v731_v27 }
 0x10b   : > { %533 = vst [vmem:[%s321_s29] sm:$0xff] %v531_v29  ;;  %v532_v31 = vadd.f32 %v733_v30, %v706_v25 }
 0x10d   : > { %534 = vst [vmem:[%s321_s29 + $0x8] sm:$0xff] %v532_v31 }
 0x10e PF: > { %s13_s14 = sadd.s32 1, %s797_s14   ;;  %s890_s12 = smov %s793_s13 }
 0x10f   : > { %p10_p5 = scmp.ge.s32.totalorder %s13_s14, 6   ;;  %s891_s13 = smov %s893_s15 }
 0x111   :  { %12 = sbr.rel (!%p10_p5) target bundleno = 2 (0x2), region = 76 }

// kernel: _lambda_.38
= control target key start
LH: loop header
LB: loop body
LE: loop exit
PB: predicated region body
PF: predicated region fallthrough
CT: control target
= control target key end

     0   :  { %s1059_s12 = smov 0   ;;  %s1061_s13 = smov 0   ;;  %s1138_s0 = inlined_call_operand.vmem [shape: bf16[4,16,512], index: 0, kind: input, shape index: {}]   ;;  %s1139_s1 = inlined_call_operand.vmem [shape: bf16[4,512,128], index: 1, kind: input, shape index: {}]   ;;  %s1140_s2 = inlined_call_operand.vmem [shape: f32[4,1,128], index: 2, kind: input, shape index: {}]   ;;  %s1141_s3 = inlined_call_operand.vmem [shape: f32[4,16,128], index: 3, kind: output, shape index: {}]  }
   0x1   :  { %s1063_s14 = smov 0  }
   0x2 LB: > { %s39_s15 = sadd.s32 1, %s1032_s13  ;;  %p864_p0 = scmp.ge.s32.totalorder %s1036_s14, 1  ;;  %s1036_s14 = sphi %s1063_s14, %s13_s14   ;;  %s1032_s13 = sphi %s1061_s13, %s1143_s13   ;;  %s1028_s12 = sphi %s1059_s12, %s1142_s12  }
   0x3   : > { %p41_p1 = scmp.ge.s32.totalorder %s39_s15, 4  ;;  %p217_p2 = scmp.lt.s32.totalorder %s1036_s14, 5 }
   0x5   : > { %s1145_s15 = smov (%p41_p1, %s39_s15), 0  ;;  %p218_p3 = pnand %p864_p0, %p217_p2 }
   0x6   : > { %p277_p4 = scmp.lt.s32.totalorder (!%p218_p3), %s1028_s12, 3  ;;  %v1038_v35 = vmov (!%p218_p3), 0  }
   0x7   : > { %221 = sbr.rel (%p218_p3) target bundleno = 274 (0x112), region = 32 }
   0xe   : > { %s1147_s12 = smov (!%p277_p4, %s1028_s12), 3 }
   0xf   : > { %s911_s16 = sshll.u32 %s1147_s12, 8  ;;  %s910_s20 = sshll.u32 %s1147_s12, 5 }
  0x10   : > { %s1083_s19 = scalar_lea.vmem %s1139_s1, %s911_s16  ;;  %s288_s23 = scalar_lea.vmem %s1138_s0, %s910_s20 }
  0x11   : > { %v982_v0 = vld [vmem:[%s1083_s19 + $0x40] sm:$0xff]   ;;  %v986_v4 = vld [vmem:[%s1083_s19 + $0x48] sm:$0xff]   ;;  %v990_v8 = vld [vmem:[%s1083_s19 + $0x50] sm:$0xff]   ;;  %s309_s26 = scalar_lea.vmem %s1140_s2, %s1147_s12  ;;  %s912_s27 = sshll.u32 %s1147_s12, 4 }
  0x12   : > { %v983_v1 = vld [vmem:[%s1083_s19 + $0xc0] sm:$0xff]   ;;  %913 = vmatprep.subr.bf16.mxu0 %v982_v0  ;;  %v987_v5 = vld [vmem:[%s1083_s19 + $0xc8] sm:$0xff]   ;;  %v991_v9 = vld [vmem:[%s1083_s19 + $0xd0] sm:$0xff]   ;;  %s321_s30 = scalar_lea.vmem %s1141_s3, %s912_s27 }
  0x13   : > { %v984_v2 = vld [vmem:[%s1083_s19] sm:$0xff]   ;;  %935 = vmatprep.subr.bf16.mxu1 %v983_v1  ;;  %v988_v6 = vld [vmem:[%s1083_s19 + $0x8] sm:$0xff]   ;;  %v992_v10 = vld [vmem:[%s1083_s19 + $0x10] sm:$0xff]  }
  0x14   : > { %v985_v3 = vld [vmem:[%s1083_s19 + $0x80] sm:$0xff]   ;;  %914 = vmatpush3.bf16.msra.mxu0 %v984_v2  ;;  %v989_v7 = vld [vmem:[%s1083_s19 + $0x88] sm:$0xff]   ;;  %v993_v11 = vld [vmem:[%s1083_s19 + $0x90] sm:$0xff]  }
  0x15   : > { %936 = vmatpush3.bf16.msra.mxu1 %v985_v3  ;;  %915 = vmatprep.subr.bf16.mxu0 %v986_v4  ;;  %v994_v12 = vld [vmem:[%s1083_s19 + $0x58] sm:$0xff]   ;;  %v998_v16 = vld [vmem:[%s1083_s19 + $0x60] sm:$0xff]   ;;  %v1002_v20 = vld [vmem:[%s1083_s19 + $0x68] sm:$0xff]  }
  0x16   : > { %937 = vmatprep.subr.bf16.mxu1 %v987_v5  ;;  %v995_v13 = vld [vmem:[%s1083_s19 + $0xd8] sm:$0xff]   ;;  %v999_v17 = vld [vmem:[%s1083_s19 + $0xe0] sm:$0xff]   ;;  %v1003_v21 = vld [vmem:[%s1083_s19 + $0xe8] sm:$0xff]  }
  0x17   : > { %v996_v14 = vld [vmem:[%s1083_s19 + $0x18] sm:$0xff]   ;;  %v1000_v18 = vld [vmem:[%s1083_s19 + $0x20] sm:$0xff]   ;;  %v1004_v22 = vld [vmem:[%s1083_s19 + $0x28] sm:$0xff]  }
  0x18   : > { %916 = vmatpush3.bf16.msra.mxu0 %v988_v6  ;;  %v997_v15 = vld [vmem:[%s1083_s19 + $0x98] sm:$0xff]   ;;  %v1001_v19 = vld [vmem:[%s1083_s19 + $0xa0] sm:$0xff]   ;;  %v1005_v23 = vld [vmem:[%s1083_s19 + $0xa8] sm:$0xff]  }
  0x19   : > { %938 = vmatpush3.bf16.msra.mxu1 %v989_v7  ;;  %917 = vmatprep.subr.bf16.mxu0 %v990_v8  ;;  %v1006_v24 = vld [vmem:[%s1083_s19 + $0x70] sm:$0xff]   ;;  %v1010_v28 = vld [vmem:[%s1083_s19 + $0x78] sm:$0xff]   ;;  %v330_v32 = vld [vmem:[%s288_s23] sm:$0xff] }
  0x1a   : > { %939 = vmatprep.subr.bf16.mxu1 %v991_v9  ;;  %v1007_v25 = vld [vmem:[%s1083_s19 + $0xf0] sm:$0xff]   ;;  %v1011_v29 = vld [vmem:[%s1083_s19 + $0xf8] sm:$0xff]   ;;  %v331_v34 = vld [vmem:[%s288_s23 + $0x8] sm:$0xff]  ;;  %v334_v36 = vmax.bf16 %v1038_v35, %v330_v32 }
  0x1b   : > { %v1008_v26 = vld [vmem:[%s1083_s19 + $0x30] sm:$0xff]   ;;  %v1012_v30 = vld [vmem:[%s1083_s19 + $0x38] sm:$0xff]   ;;  %v335_v39 = vmax.bf16 %v1038_v35, %v331_v34  ;;  %v907_v54 = vld [vmem:[%s309_s26] ss:$0 sm:$0xff] }
  0x1c   : > { %918 = vmatpush3.bf16.msra.mxu0 %v992_v10  ;;  %v1009_v27 = vld [vmem:[%s1083_s19 + $0xb0] sm:$0xff]   ;;  %v1013_v31 = vld [vmem:[%s1083_s19 + $0xb8] sm:$0xff]  }
  0x1d   : > { %940 = vmatpush3.bf16.msra.mxu1 %v993_v11  ;;  %919 = vmatprep.subr.bf16.mxu0 %v994_v12  ;;  %v332_v33 = vld [vmem:[%s288_s23 + $0x10] sm:$0xff]  ;;  %v333_v38 = vld [vmem:[%s288_s23 + $0x18] sm:$0xff] }
  0x1e   : > { %941 = vmatprep.subr.bf16.mxu1 %v995_v13  ;;  %v336_v37 = vmax.bf16 %v1038_v35, %v332_v33  ;;  %v337_v40 = vmax.bf16 %v1038_v35, %v333_v38 }
  0x20   : > { %920 = vmatpush3.bf16.msra.mxu0 %v996_v14  ;;  %v872_v41 = vcombine.high %v334_v36, %v336_v37  ;;  %v871_v42 = vcombine.low %v334_v36, %v336_v37  ;;  %v874_v43 = vcombine.high %v335_v39, %v337_v40  ;;  %v873_v44 = vcombine.low %v335_v39, %v337_v40 }
  0x21   : > { %942 = vmatpush3.bf16.msra.mxu1 %v997_v15  ;;  %921 = vmatprep.subr.bf16.mxu0 %v998_v16 }
  0x22   : > { %943 = vmatprep.subr.bf16.mxu1 %v999_v17  ;;  %648 = vmatprep.mubr.bf16.mxu0 %v872_v41 }
  0x23   : > { %689 = vmatprep.mubr.bf16.mxu1 %v874_v43 }
  0x24   : > { %922 = vmatpush3.bf16.msra.mxu0 %v1000_v18 }
  0x25   : > { %944 = vmatpush3.bf16.msra.mxu1 %v1001_v19  ;;  %923 = vmatprep.subr.bf16.mxu0 %v1002_v20 }
  0x26   : > { %945 = vmatprep.subr.bf16.mxu1 %v1003_v21 }
  0x28   : > { %924 = vmatpush3.bf16.msra.mxu0 %v1004_v22 }
  0x29   : > { %946 = vmatpush3.bf16.msra.mxu1 %v1005_v23  ;;  %925 = vmatprep.subr.bf16.mxu0 %v1006_v24 }
  0x2a   : > { %947 = vmatprep.subr.bf16.mxu1 %v1007_v25 }
  0x2c   : > { %926 = vmatpush3.bf16.msra.mxu0 %v1008_v26 }
  0x2d   : > { %948 = vmatpush3.bf16.msra.mxu1 %v1009_v27  ;;  %927 = vmatprep.subr.bf16.mxu0 %v1010_v28 }
  0x2e   : > { %949 = vmatprep.subr.bf16.mxu1 %v1011_v29 }
  0x30   : > { %928 = vmatpush3.bf16.msra.mxu0 %v1012_v30 }
  0x31   : > { %950 = vmatpush3.bf16.msra.mxu1 %v1013_v31 }
  0x33   : > { %649 = vmatmul.mubr.bf16.vlgmr.msra.gmra.mrb[0].mxu0 %v871_v42 }
  0x34   : > { %690 = vmatmul.mubr.bf16.vlgmr.msra.gmra.mrb[0].mxu1 %v873_v44 }
 0x106   : > { %v929_v45 = vpop.f32.mrb[0].mxu0 }
 0x107   : > { %v951_v46 = vpop.f32.mrb[0].mxu1  ;;  %v930_v47 = vpop.f32.mrb[1].mxu0 }
 0x108   : > { %v931_v48 = vadd.f32 %v930_v47, %v929_v45  ;;  %v952_v49 = vpop.f32.mrb[1].mxu1  ;;  %v932_v50 = vpop.f32.mrb[2].mxu0 }
 0x109   : > { %v953_v51 = vadd.f32 %v952_v49, %v951_v46  ;;  %v954_v52 = vpop.f32.mrb[2].mxu1  ;;  %v933_v53 = vpop.f32.mrb[3].mxu0 }
 0x10a   : > { %v934_v55 = vadd.f32 %v933_v53, %v932_v50  ;;  %v955_v56 = vpop.f32.mrb[3].mxu1 }
 0x10b   : > { %v692_v57 = vadd.f32 %v953_v51, %v931_v48  ;;  %v956_v58 = vadd.f32 %v955_v56, %v954_v52 }
 0x10d   : > { %v714_v59 = vadd.f32 %v907_v54, %v692_v57  ;;  %v695_v60 = vadd.f32 %v956_v58, %v934_v55 }
 0x10f   : > { %716 = vst [vmem:[%s321_s30] sm:$0xff] %v714_v59  ;;  %v715_v61 = vadd.f32 %v907_v54, %v695_v60 }
 0x111   : > { %717 = vst [vmem:[%s321_s30 + $0x8] sm:$0xff] %v715_v61 }
 0x112 PF: > { %s13_s14 = sadd.s32 1, %s1036_s14   ;;  %s1142_s12 = smov %s1032_s13 }
 0x113   : > { %p10_p5 = scmp.ge.s32.totalorder %s13_s14, 6   ;;  %s1143_s13 = smov %s1145_s15 }
 0x115   :  { %12 = sbr.rel (!%p10_p5) target bundleno = 2 (0x2), region = 76 }

// kernel: _lambda_.41
= control target key start
LH: loop header
LB: loop body
LE: loop exit
PB: predicated region body
PF: predicated region fallthrough
CT: control target
= control target key end

     0   :  { %s880_s12 = smov 0   ;;  %s882_s13 = smov 0   ;;  %s946_s0 = inlined_call_operand.vmem [shape: bf16[4,32,256], index: 0, kind: input, shape index: {}]   ;;  %s947_s1 = inlined_call_operand.vmem [shape: bf16[4,256,128], index: 1, kind: input, shape index: {}]   ;;  %s948_s2 = inlined_call_operand.vmem [shape: f32[4,1,128], index: 2, kind: input, shape index: {}]   ;;  %s949_s3 = inlined_call_operand.vmem [shape: f32[4,32,128], index: 3, kind: output, shape index: {}]  }
   0x1   :  { %s884_s14 = smov 0  }
   0x2 LB: > { %s39_s15 = sadd.s32 1, %s853_s13  ;;  %p717_p0 = scmp.ge.s32.totalorder %s857_s14, 1  ;;  %s857_s14 = sphi %s884_s14, %s13_s14   ;;  %s853_s13 = sphi %s882_s13, %s951_s13   ;;  %s849_s12 = sphi %s880_s12, %s950_s12  }
   0x3   : > { %p41_p1 = scmp.ge.s32.totalorder %s39_s15, 4  ;;  %p217_p2 = scmp.lt.s32.totalorder %s857_s14, 5 }
   0x5   : > { %s953_s15 = smov (%p41_p1, %s39_s15), 0  ;;  %p218_p3 = pnand %p717_p0, %p217_p2 }
   0x6   : > { %p277_p4 = scmp.lt.s32.totalorder (!%p218_p3), %s849_s12, 3  ;;  %v859_v14 = vmov (!%p218_p3), 0  }
   0x7   : > { %221 = sbr.rel (%p218_p3) target bundleno = 270 (0x10e), region = 32 }
   0xe   : > { %s955_s12 = smov (!%p277_p4, %s849_s12), 3 }
   0xf   : > { %s748_s16 = sshll.u32 %s955_s12, 7  ;;  %s747_s20 = sshll.u32 %s955_s12, 5 }
  0x10   : > { %s904_s19 = scalar_lea.vmem %s947_s1, %s748_s16  ;;  %s288_s23 = scalar_lea.vmem %s946_s0, %s747_s20 }
  0x11   : > { %v819_v0 = vld [vmem:[%s904_s19 + $0x40] sm:$0xff]   ;;  %v821_v2 = vld [vmem:[%s904_s19 + $0x48] sm:$0xff]   ;;  %v823_v4 = vld [vmem:[%s904_s19 + $0x50] sm:$0xff]   ;;  %s309_s26 = scalar_lea.vmem %s948_s2, %s955_s12  ;;  %s321_s29 = scalar_lea.vmem %s949_s3, %s747_s20 }
  0x12   : > { %v820_v1 = vld [vmem:[%s904_s19] sm:$0xff]   ;;  %750 = vmatprep.subr.bf16.mxu0 %v819_v0  ;;  %778 = vmatprep.subr.bf16.mxu1 %v819_v0  ;;  %v822_v3 = vld [vmem:[%s904_s19 + $0x8] sm:$0xff]   ;;  %v824_v5 = vld [vmem:[%s904_s19 + $0x10] sm:$0xff]  }
  0x13   : > { %751 = vmatpush3.bf16.msra.mxu0 %v820_v1  ;;  %786 = vmatpush3.bf16.msra.mxu1 %v820_v1  ;;  %v825_v6 = vld [vmem:[%s904_s19 + $0x58] sm:$0xff]   ;;  %v827_v8 = vld [vmem:[%s904_s19 + $0x60] sm:$0xff]   ;;  %v829_v10 = vld [vmem:[%s904_s19 + $0x68] sm:$0xff]  }
  0x14   : > { %752 = vmatprep.subr.bf16.mxu0 %v821_v2  ;;  %779 = vmatprep.subr.bf16.mxu1 %v821_v2  ;;  %v826_v7 = vld [vmem:[%s904_s19 + $0x18] sm:$0xff]   ;;  %v828_v9 = vld [vmem:[%s904_s19 + $0x20] sm:$0xff]   ;;  %v333_v12 = vld [vmem:[%s288_s23 + $0x8] sm:$0xff] }
  0x15   : > { %v332_v11 = vld [vmem:[%s288_s23] sm:$0xff]  ;;  %v334_v13 = vld [vmem:[%s288_s23 + $0x10] sm:$0xff]  ;;  %v337_v16 = vmax.bf16 %v859_v14, %v333_v12  ;;  %v335_v17 = vld [vmem:[%s288_s23 + $0x18] sm:$0xff] }
  0x16   : > { %v336_v15 = vmax.bf16 %v859_v14, %v332_v11  ;;  %v338_v18 = vmax.bf16 %v859_v14, %v334_v13  ;;  %v339_v19 = vmax.bf16 %v859_v14, %v335_v17  ;;  %v830_v20 = vld [vmem:[%s904_s19 + $0x28] sm:$0xff]   ;;  %v831_v22 = vld [vmem:[%s904_s19 + $0x70] sm:$0xff]   ;;  %v833_v25 = vld [vmem:[%s904_s19 + $0x78] sm:$0xff]  }
  0x17   : > { %753 = vmatpush3.bf16.msra.mxu0 %v822_v3  ;;  %787 = vmatpush3.bf16.msra.mxu1 %v822_v3  ;;  %v832_v24 = vld [vmem:[%s904_s19 + $0x30] sm:$0xff]   ;;  %v834_v26 = vld [vmem:[%s904_s19 + $0x38] sm:$0xff]   ;;  %v744_v32 = vld [vmem:[%s309_s26] ss:$0 sm:$0xff] }
  0x18   : > { %754 = vmatprep.subr.bf16.mxu0 %v823_v4  ;;  %780 = vmatprep.subr.bf16.mxu1 %v823_v4  ;;  %v725_v21 = vcombine.high %v336_v15, %v337_v16  ;;  %v727_v23 = vcombine.high %v338_v18, %v339_v19  ;;  %v724_v27 = vcombine.low %v336_v15, %v337_v16 }
  0x19   : > { %v726_v28 = vcombine.low %v338_v18, %v339_v19 }
  0x1a   : > { %524 = vmatprep.mubr.bf16.mxu0 %v725_v21  ;;  %532 = vmatprep.mubr.bf16.mxu1 %v727_v23 }
  0x1b   : > { %755 = vmatpush3.bf16.msra.mxu0 %v824_v5  ;;  %788 = vmatpush3.bf16.msra.mxu1 %v824_v5 }
  0x1c   : > { %756 = vmatprep.subr.bf16.mxu0 %v825_v6  ;;  %781 = vmatprep.subr.bf16.mxu1 %v825_v6 }
  0x1f   : > { %757 = vmatpush3.bf16.msra.mxu0 %v826_v7  ;;  %789 = vmatpush3.bf16.msra.mxu1 %v826_v7 }
  0x20   : > { %758 = vmatprep.subr.bf16.mxu0 %v827_v8  ;;  %782 = vmatprep.subr.bf16.mxu1 %v827_v8 }
  0x23   : > { %759 = vmatpush3.bf16.msra.mxu0 %v828_v9  ;;  %790 = vmatpush3.bf16.msra.mxu1 %v828_v9 }
  0x24   : > { %760 = vmatprep.subr.bf16.mxu0 %v829_v10  ;;  %783 = vmatprep.subr.bf16.mxu1 %v829_v10 }
  0x27   : > { %761 = vmatpush3.bf16.msra.mxu0 %v830_v20  ;;  %791 = vmatpush3.bf16.msra.mxu1 %v830_v20 }
  0x28   : > { %762 = vmatprep.subr.bf16.mxu0 %v831_v22  ;;  %784 = vmatprep.subr.bf16.mxu1 %v831_v22 }
  0x2b   : > { %763 = vmatpush3.bf16.msra.mxu0 %v832_v24  ;;  %792 = vmatpush3.bf16.msra.mxu1 %v832_v24 }
  0x2c   : > { %764 = vmatprep.subr.bf16.mxu0 %v833_v25  ;;  %785 = vmatprep.subr.bf16.mxu1 %v833_v25 }
  0x2f   : > { %765 = vmatpush3.bf16.msra.mxu0 %v834_v26  ;;  %793 = vmatpush3.bf16.msra.mxu1 %v834_v26 }
  0x32   : > { %525 = vmatmul.mubr.bf16.vlgmr.msra.gmra.mrb[0].mxu0 %v724_v27  ;;  %533 = vmatmul.mubr.bf16.vlgmr.msra.gmra.mrb[0].mxu1 %v726_v28 }
 0x105   : > { %v766_v29 = vpop.f32.mrb[0].mxu0  ;;  %v772_v30 = vpop.f32.mrb[0].mxu1 }
 0x106   : > { %v767_v31 = vpop.f32.mrb[1].mxu0  ;;  %v773_v33 = vpop.f32.mrb[1].mxu1 }
 0x107   : > { %v768_v34 = vadd.f32 %v767_v31, %v766_v29  ;;  %v774_v35 = vadd.f32 %v773_v33, %v772_v30  ;;  %v769_v36 = vpop.f32.mrb[2].mxu0  ;;  %v775_v37 = vpop.f32.mrb[2].mxu1 }
 0x108   : > { %v770_v38 = vpop.f32.mrb[3].mxu0  ;;  %v776_v39 = vpop.f32.mrb[3].mxu1 }
 0x109   : > { %v563_v40 = vadd.f32 %v768_v34, %v744_v32  ;;  %v565_v41 = vadd.f32 %v774_v35, %v744_v32  ;;  %v771_v42 = vadd.f32 %v770_v38, %v769_v36  ;;  %v777_v43 = vadd.f32 %v776_v39, %v775_v37 }
 0x10b   : > { %567 = vst [vmem:[%s321_s29] sm:$0xff] %v563_v40  ;;  %569 = vst [vmem:[%s321_s29 + $0x10] sm:$0xff] %v565_v41  ;;  %v564_v44 = vadd.f32 %v771_v42, %v744_v32  ;;  %v566_v45 = vadd.f32 %v777_v43, %v744_v32 }
 0x10d   : > { %568 = vst [vmem:[%s321_s29 + $0x8] sm:$0xff] %v564_v44  ;;  %570 = vst [vmem:[%s321_s29 + $0x18] sm:$0xff] %v566_v45 }
 0x10e PF: > { %s13_s14 = sadd.s32 1, %s857_s14   ;;  %s950_s12 = smov %s853_s13 }
 0x10f   : > { %p10_p5 = scmp.ge.s32.totalorder %s13_s14, 6   ;;  %s951_s13 = smov %s953_s15 }
 0x111   :  { %12 = sbr.rel (!%p10_p5) target bundleno = 2 (0x2), region = 76 }

// kernel: _lambda_.44
= control target key start
LH: loop header
LB: loop body
LE: loop exit
PB: predicated region body
PF: predicated region fallthrough
CT: control target
= control target key end

     0   :  { %s997_s12 = smov 0   ;;  %s999_s13 = smov 0   ;;  %s1103_s0 = inlined_call_operand.vmem [shape: bf16[4,128,128], index: 0, kind: input, shape index: {}]   ;;  %s1104_s1 = inlined_call_operand.vmem [shape: bf16[4,128,128], index: 1, kind: input, shape index: {}]   ;;  %s1105_s2 = inlined_call_operand.vmem [shape: f32[4,1,128], index: 2, kind: input, shape index: {}]   ;;  %s1106_s3 = inlined_call_operand.vmem [shape: f32[4,128,128], index: 3, kind: output, shape index: {}]  }
   0x1   :  { %s1001_s14 = smov 0  }
   0x2 LB: > { %s39_s15 = sadd.s32 1, %s970_s13  ;;  %p826_p0 = scmp.ge.s32.totalorder %s974_s14, 1  ;;  %s974_s14 = sphi %s1001_s14, %s13_s14   ;;  %s970_s13 = sphi %s999_s13, %s1108_s13   ;;  %s966_s12 = sphi %s997_s12, %s1107_s12  }
   0x3   : > { %p41_p1 = scmp.ge.s32.totalorder %s39_s15, 4  ;;  %p214_p2 = scmp.lt.s32.totalorder %s974_s14, 5 }
   0x5   : > { %s1110_s15 = smov (%p41_p1, %s39_s15), 0  ;;  %p215_p3 = pnand %p826_p0, %p214_p2 }
   0x6   : > { %p271_p4 = scmp.lt.s32.totalorder (!%p215_p3), %s966_s12, 3  ;;  %v976_v7 = vmov (!%p215_p3), 0  }
   0x7   : > { %218 = sbr.rel (%p215_p3) target bundleno = 276 (0x114), region = 32 }
   0xe   : > { %s1112_s12 = smov (!%p271_p4, %s966_s12), 3 }
   0xf   : > { %s852_s16 = sshll.u32 %s1112_s12, 6  ;;  %s301_s25 = scalar_lea.vmem %s1105_s2, %s1112_s12 }
  0x10   : > { %s1021_s19 = scalar_lea.vmem %s1104_s1, %s852_s16  ;;  %s1029_s22 = scalar_lea.vmem %s1103_s0, %s852_s16  ;;  %v849_v49 = vld [vmem:[%s301_s25] ss:$0 sm:$0xff] }
  0x11   : > { %v944_v0 = vld [vmem:[%s1021_s19] sm:$0xff]   ;;  %v945_v1 = vld [vmem:[%s1021_s19 + $0x8] sm:$0xff]   ;;  %v946_v2 = vld [vmem:[%s1021_s19 + $0x10] sm:$0xff]   ;;  %s854_s26 = sshll.u32 %s1112_s12, 7 }
  0x12   : > { %871 = vmatprep.subr.bf16.mxu0 %v944_v0  ;;  %903 = vmatprep.subr.bf16.mxu1 %v944_v0  ;;  %v947_v3 = vld [vmem:[%s1021_s19 + $0x18] sm:$0xff]   ;;  %v336_v4 = vld [vmem:[%s1029_s22] sm:$0xf]  ;;  %v337_v5 = vld [vmem:[%s1029_s22 + $0x4] sm:$0xf]  ;;  %s1076_s29 = scalar_lea.vmem %s1106_s3, %s854_s26 }
  0x13   : > { %872 = vmatpush3.bf16.msra.mxu0 %v944_v0  ;;  %911 = vmatpush3.bf16.msra.mxu1 %v944_v0  ;;  %v344_v6 = vld [vmem:[%s1029_s22 + $0x20] sm:$0xf]  ;;  %v352_v8 = vmax.bf16 %v976_v7, %v336_v4  ;;  %v353_v9 = vmax.bf16 %v976_v7, %v337_v5  ;;  %v345_v10 = vld [vmem:[%s1029_s22 + $0x24] sm:$0xf]  ;;  %v949_v16 = vld [vmem:[%s1021_s19 + $0x28] sm:$0xff]  }
  0x14   : > { %873 = vmatprep.subr.bf16.mxu0 %v945_v1  ;;  %904 = vmatprep.subr.bf16.mxu1 %v945_v1  ;;  %v360_v11 = vmax.bf16 %v976_v7, %v344_v6  ;;  %v361_v12 = vmax.bf16 %v976_v7, %v345_v10  ;;  %v948_v14 = vld [vmem:[%s1021_s19 + $0x20] sm:$0xff]   ;;  %v950_v17 = vld [vmem:[%s1021_s19 + $0x30] sm:$0xff]   ;;  %v951_v18 = vld [vmem:[%s1021_s19 + $0x38] sm:$0xff]  }
  0x15   : > { %v833_v13 = vcombine.low %v352_v8, %v353_v9  ;;  %v338_v19 = vld [vmem:[%s1029_s22 + $0x8] sm:$0xf]  ;;  %v339_v20 = vld [vmem:[%s1029_s22 + $0xc] sm:$0xf]  ;;  %v340_v23 = vld [vmem:[%s1029_s22 + $0x10] sm:$0xf] }
  0x16   : > { %v837_v15 = vcombine.low %v360_v11, %v361_v12  ;;  %v346_v21 = vld [vmem:[%s1029_s22 + $0x28] sm:$0xf]  ;;  %v347_v22 = vld [vmem:[%s1029_s22 + $0x2c] sm:$0xf]  ;;  %v341_v24 = vld [vmem:[%s1029_s22 + $0x14] sm:$0xf]  ;;  %v354_v27 = vmax.bf16 %v976_v7, %v338_v19  ;;  %v355_v28 = vmax.bf16 %v976_v7, %v339_v20  ;;  %v356_v31 = vmax.bf16 %v976_v7, %v340_v23 }
  0x17   : > { %874 = vmatpush3.bf16.msra.mxu0 %v945_v1  ;;  %912 = vmatpush3.bf16.msra.mxu1 %v945_v1  ;;  %v348_v25 = vld [vmem:[%s1029_s22 + $0x30] sm:$0xf]  ;;  %v349_v26 = vld [vmem:[%s1029_s22 + $0x34] sm:$0xf]  ;;  %v362_v29 = vmax.bf16 %v976_v7, %v346_v21  ;;  %v363_v30 = vmax.bf16 %v976_v7, %v347_v22  ;;  %v357_v32 = vmax.bf16 %v976_v7, %v341_v24  ;;  %v342_v37 = vld [vmem:[%s1029_s22 + $0x18] sm:$0xf] }
  0x18   : > { %875 = vmatprep.subr.bf16.mxu0 %v946_v2  ;;  %905 = vmatprep.subr.bf16.mxu1 %v946_v2  ;;  %v364_v33 = vmax.bf16 %v976_v7, %v348_v25  ;;  %v365_v34 = vmax.bf16 %v976_v7, %v349_v26  ;;  %v834_v35 = vcombine.low %v354_v27, %v355_v28  ;;  %v343_v40 = vld [vmem:[%s1029_s22 + $0x1c] sm:$0xf]  ;;  %v350_v41 = vld [vmem:[%s1029_s22 + $0x38] sm:$0xf] }
  0x19   : > { %887 = vmatprep.mubr.bf16.mxu0 %v833_v13  ;;  %895 = vmatprep.mubr.bf16.mxu1 %v837_v15  ;;  %v838_v36 = vcombine.low %v362_v29, %v363_v30  ;;  %v835_v38 = vcombine.low %v356_v31, %v357_v32  ;;  %v351_v42 = vld [vmem:[%s1029_s22 + $0x3c] sm:$0xf]  ;;  %v358_v43 = vmax.bf16 %v976_v7, %v342_v37 }
  0x1a   : > { %v839_v39 = vcombine.low %v364_v33, %v365_v34  ;;  %v359_v44 = vmax.bf16 %v976_v7, %v343_v40  ;;  %v366_v45 = vmax.bf16 %v976_v7, %v350_v41  ;;  %v367_v46 = vmax.bf16 %v976_v7, %v351_v42 }
  0x1b   : > { %876 = vmatpush3.bf16.msra.mxu0 %v946_v2  ;;  %913 = vmatpush3.bf16.msra.mxu1 %v946_v2 }
  0x1c   : > { %877 = vmatprep.subr.bf16.mxu0 %v947_v3  ;;  %906 = vmatprep.subr.bf16.mxu1 %v947_v3  ;;  %v836_v47 = vcombine.low %v358_v43, %v359_v44  ;;  %v840_v48 = vcombine.low %v366_v45, %v367_v46 }
  0x1f   : > { %878 = vmatpush3.bf16.msra.mxu0 %v947_v3  ;;  %914 = vmatpush3.bf16.msra.mxu1 %v947_v3 }
  0x20   : > { %879 = vmatprep.subr.bf16.mxu0 %v948_v14  ;;  %907 = vmatprep.subr.bf16.mxu1 %v948_v14 }
  0x23   : > { %880 = vmatpush3.bf16.msra.mxu0 %v948_v14  ;;  %915 = vmatpush3.bf16.msra.mxu1 %v948_v14 }
  0x24   : > { %881 = vmatprep.subr.bf16.mxu0 %v949_v16  ;;  %908 = vmatprep.subr.bf16.mxu1 %v949_v16 }
  0x27   : > { %882 = vmatpush3.bf16.msra.mxu0 %v949_v16  ;;  %916 = vmatpush3.bf16.msra.mxu1 %v949_v16 }
  0x28   : > { %883 = vmatprep.subr.bf16.mxu0 %v950_v17  ;;  %909 = vmatprep.subr.bf16.mxu1 %v950_v17 }
  0x2b   : > { %884 = vmatpush3.bf16.msra.mxu0 %v950_v17  ;;  %917 = vmatpush3.bf16.msra.mxu1 %v950_v17 }
  0x2c   : > { %885 = vmatprep.subr.bf16.mxu0 %v951_v18  ;;  %910 = vmatprep.subr.bf16.mxu1 %v951_v18 }
  0x2f   : > { %886 = vmatpush3.bf16.msra.mxu0 %v951_v18  ;;  %918 = vmatpush3.bf16.msra.mxu1 %v951_v18 }
  0x32   : > { %888 = vmatmul.mubr.bf16.vlgmr.msra.gmra.mrb[0].mxu0 %v834_v35  ;;  %896 = vmatmul.mubr.bf16.vlgmr.msra.gmra.mrb[0].mxu1 %v838_v36 }
  0x33   : > { %891 = vmatprep.mubr.bf16.mxu0 %v835_v38  ;;  %899 = vmatprep.mubr.bf16.mxu1 %v839_v39 }
  0x3a   : > { %892 = vmatmul.mubr.bf16.gmra.mrb[4].mxu0 %v836_v47  ;;  %900 = vmatmul.mubr.bf16.gmra.mrb[4].mxu1 %v840_v48 }
 0x105   : > { %v889_v50 = vpop.f32.mrb[0].mxu0  ;;  %v897_v51 = vpop.f32.mrb[0].mxu1 }
 0x106   : > { %v653_v52 = vadd.f32 %v889_v50, %v849_v49  ;;  %v661_v53 = vadd.f32 %v897_v51, %v849_v49  ;;  %v530_v54 = vpop.f32.mrb[1].mxu0  ;;  %v562_v55 = vpop.f32.mrb[1].mxu1 }
 0x107   : > { %v651_v56 = vadd.f32 %v849_v49, %v530_v54  ;;  %v659_v57 = vadd.f32 %v849_v49, %v562_v55  ;;  %v890_v58 = vpop.f32.mrb[2].mxu0  ;;  %v898_v59 = vpop.f32.mrb[2].mxu1 }
 0x108   : > { %669 = vst [vmem:[%s1076_s29 + $0x10] sm:$0xff] %v653_v52  ;;  %677 = vst [vmem:[%s1076_s29 + $0x50] sm:$0xff] %v661_v53  ;;  %v654_v60 = vadd.f32 %v890_v58, %v849_v49  ;;  %v662_v61 = vadd.f32 %v898_v59, %v849_v49  ;;  %v533_v62 = vpop.f32.mrb[3].mxu0  ;;  %v565_v63 = vpop.f32.mrb[3].mxu1 }
 0x109   : > { %667 = vst [vmem:[%s1076_s29] sm:$0xff] %v651_v56  ;;  %675 = vst [vmem:[%s1076_s29 + $0x40] sm:$0xff] %v659_v57  ;;  %v652_v0 = vadd.f32 %v849_v49, %v533_v62  ;;  %v660_v1 = vadd.f32 %v849_v49, %v565_v63 }
 0x10a   : > { %670 = vst [vmem:[%s1076_s29 + $0x18] sm:$0xff] %v654_v60  ;;  %678 = vst [vmem:[%s1076_s29 + $0x58] sm:$0xff] %v662_v61 }
 0x10b   : > { %668 = vst [vmem:[%s1076_s29 + $0x8] sm:$0xff] %v652_v0  ;;  %676 = vst [vmem:[%s1076_s29 + $0x48] sm:$0xff] %v660_v1 }
 0x10d   : > { %v893_v2 = vpop.f32.mrb[4].mxu0  ;;  %v901_v3 = vpop.f32.mrb[4].mxu1 }
 0x10e   : > { %v657_v4 = vadd.f32 %v893_v2, %v849_v49  ;;  %v665_v5 = vadd.f32 %v901_v3, %v849_v49  ;;  %v546_v6 = vpop.f32.mrb[5].mxu0  ;;  %v578_v7 = vpop.f32.mrb[5].mxu1 }
 0x10f   : > { %v655_v8 = vadd.f32 %v849_v49, %v546_v6  ;;  %v663_v9 = vadd.f32 %v849_v49, %v578_v7  ;;  %v894_v10 = vpop.f32.mrb[6].mxu0  ;;  %v902_v11 = vpop.f32.mrb[6].mxu1 }
 0x110   : > { %673 = vst [vmem:[%s1076_s29 + $0x30] sm:$0xff] %v657_v4  ;;  %681 = vst [vmem:[%s1076_s29 + $0x70] sm:$0xff] %v665_v5  ;;  %v658_v12 = vadd.f32 %v894_v10, %v849_v49  ;;  %v666_v13 = vadd.f32 %v902_v11, %v849_v49  ;;  %v549_v14 = vpop.f32.mrb[7].mxu0  ;;  %v581_v15 = vpop.f32.mrb[7].mxu1 }
 0x111   : > { %671 = vst [vmem:[%s1076_s29 + $0x20] sm:$0xff] %v655_v8  ;;  %679 = vst [vmem:[%s1076_s29 + $0x60] sm:$0xff] %v663_v9  ;;  %v656_v16 = vadd.f32 %v849_v49, %v549_v14  ;;  %v664_v17 = vadd.f32 %v849_v49, %v581_v15 }
 0x112   : > { %674 = vst [vmem:[%s1076_s29 + $0x38] sm:$0xff] %v658_v12  ;;  %682 = vst [vmem:[%s1076_s29 + $0x78] sm:$0xff] %v666_v13 }
 0x113   : > { %672 = vst [vmem:[%s1076_s29 + $0x28] sm:$0xff] %v656_v16  ;;  %680 = vst [vmem:[%s1076_s29 + $0x68] sm:$0xff] %v664_v17 }
 0x114 PF: > { %s13_s14 = sadd.s32 1, %s974_s14   ;;  %s1107_s12 = smov %s970_s13 }
 0x115   : > { %p10_p5 = scmp.ge.s32.totalorder %s13_s14, 6   ;;  %s1108_s13 = smov %s1110_s15 }
 0x117   :  { %12 = sbr.rel (!%p10_p5) target bundleno = 2 (0x2), region = 76 }

// kernel: _lambda_.45
= control target key start
LH: loop header
LB: loop body
LE: loop exit
PB: predicated region body
PF: predicated region fallthrough
CT: control target
= control target key end

     0   :  { %vm12_vm0 = vcmask 58368   ;;  %vm79_vm1 = vcmask 64512   ;;  %v420_v0 = vmov 0.0   ;;  %vm410_vm2 = vcmask 1040384   ;;  %s1294_s0 = inlined_call_operand.vmem [shape: f32[512,8], index: 0, kind: input, shape index: {}]   ;;  %s1295_s1 = inlined_call_operand.vmem [shape: f32[2,8], index: 1, kind: output, shape index: {}]  }
   0x1   :  { %13 = vst.msk [vmem:[%s1295_s1] sm:$0x3] %vm12_vm0, %v420_v0  ;;  %v438_v1 = vld [vmem:[%s1294_s0] sm:$0xff]  ;;  %v443_v2 = vld [vmem:[%s1294_s0 + $0x8] sm:$0xff]  ;;  %v448_v3 = vld [vmem:[%s1294_s0 + $0x10] sm:$0xff] }
   0x2   :  { %v80_v4 = vsel %vm79_vm1, %v438_v1, 0.0  ;;  %v81_v5 = vsel %vm79_vm1, %v443_v2, 0.0  ;;  %v83_v6 = vsel %vm79_vm1, %v448_v3, 0.0  ;;  %v459_v7 = vld [vmem:[%s1294_s0 + $0x18] sm:$0xff]  ;;  %v466_v10 = vld [vmem:[%s1294_s0 + $0x20] sm:$0xff]  ;;  %v473_v13 = vld [vmem:[%s1294_s0 + $0x28] sm:$0xff] }
   0x3   :  { %v82_v8 = vadd.f32 %v81_v5, %v80_v4  ;;  %v85_v9 = vsel %vm79_vm1, %v459_v7, 0.0  ;;  %v87_v12 = vsel %vm79_vm1, %v466_v10, 0.0  ;;  %v89_v15 = vsel %vm79_vm1, %v473_v13, 0.0  ;;  %v480_v16 = vld [vmem:[%s1294_s0 + $0x30] sm:$0xff]  ;;  %v485_v18 = vld [vmem:[%s1294_s0 + $0x38] sm:$0xff]  ;;  %v490_v19 = vld [vmem:[%s1294_s0 + $0x40] sm:$0xff] }
   0x4   :  { %v91_v20 = vsel %vm79_vm1, %v480_v16, 0.0  ;;  %v497_v21 = vld [vmem:[%s1294_s0 + $0x48] sm:$0xff]  ;;  %v502_v22 = vld [vmem:[%s1294_s0 + $0x50] sm:$0xff]  ;;  %v507_v23 = vld [vmem:[%s1294_s0 + $0x58] sm:$0xff]  ;;  %v93_v25 = vsel %vm79_vm1, %v485_v18, 0.0  ;;  %v95_v26 = vsel %vm79_vm1, %v490_v19, 0.0 }
   0x5   :  { %v84_v11 = vadd.f32 %v83_v6, %v82_v8  ;;  %v516_v27 = vld [vmem:[%s1294_s0 + $0x108] sm:$0xff]  ;;  %v521_v28 = vld [vmem:[%s1294_s0 + $0x110] sm:$0xff]  ;;  %v526_v29 = vld [vmem:[%s1294_s0 + $0x118] sm:$0xff]  ;;  %v97_v30 = vsel %vm79_vm1, %v497_v21, 0.0  ;;  %v99_v31 = vsel %vm79_vm1, %v502_v22, 0.0  ;;  %v534_v32 = vsel %vm79_vm1, %v507_v23, 0.0 }
   0x6   :  { %v539_v33 = vld [vmem:[%s1294_s0 + $0x120] sm:$0xff]  ;;  %v544_v34 = vld [vmem:[%s1294_s0 + $0x128] sm:$0xff]  ;;  %v549_v35 = vld [vmem:[%s1294_s0 + $0x130] sm:$0xff]  ;;  %v553_v37 = vsel %vm79_vm1, %v516_v27, 0.0  ;;  %v557_v38 = vsel %vm79_vm1, %v521_v28, 0.0  ;;  %v561_v39 = vsel %vm79_vm1, %v526_v29, 0.0 }
   0x7   :  { %v86_v14 = vadd.f32 %v85_v9, %v84_v11  ;;  %1314 = vst [vmem:[#allocation2_spill] sm:$0xff] %v553_v37  ;;  %1315 = vst [vmem:[#allocation3_spill] sm:$0xff] %v557_v38  ;;  %v566_v40 = vld [vmem:[%s1294_s0 + $0x138] sm:$0xff]  ;;  %v571_v41 = vld [vmem:[%s1294_s0 + $0x140] sm:$0xff]  ;;  %v580_v43 = vsel %vm79_vm1, %v539_v33, 0.0  ;;  %v584_v44 = vsel %vm79_vm1, %v544_v34, 0.0  ;;  %v215_v37 = vmul.f32 %v448_v3, %v448_v3 }
   0x8   :  { %1316 = vst [vmem:[#allocation4_spill] sm:$0xff] %v561_v39  ;;  %v576_v42 = vld [vmem:[%s1294_s0 + $0x148] sm:$0xff]  ;;  %1317 = vst [vmem:[#allocation5_spill] sm:$0xff] %v580_v43  ;;  %v588_v45 = vsel %vm79_vm1, %v549_v35, 0.0  ;;  %v593_v46 = vld [vmem:[%s1294_s0 + $0x150] sm:$0xff]  ;;  %v607_v50 = vsel %vm79_vm1, %v566_v40, 0.0 }
   0x9   :  { %v88_v17 = vadd.f32 %v87_v12, %v86_v14  ;;  %1318 = vst [vmem:[#allocation6_spill] sm:$0xff] %v584_v44  ;;  %1319 = vst [vmem:[#allocation7_spill] sm:$0xff] %v588_v45  ;;  %v598_v47 = vld [vmem:[%s1294_s0 + $0x158] sm:$0xff]  ;;  %v603_v48 = vld [vmem:[%s1294_s0 + $0x160] sm:$0xff]  ;;  %v611_v51 = vsel %vm79_vm1, %v571_v41, 0.0  ;;  %v615_v52 = vsel %vm79_vm1, %v576_v42, 0.0 }
   0xa   :  { %1320 = vst [vmem:[#allocation8_spill] sm:$0xff] %v607_v50  ;;  %1321 = vst [vmem:[#allocation9_spill] sm:$0xff] %v611_v51  ;;  %v620_v53 = vld [vmem:[%s1294_s0 + $0x168] sm:$0xff]  ;;  %v625_v54 = vld [vmem:[%s1294_s0 + $0x170] sm:$0xff]  ;;  %v634_v56 = vsel %vm79_vm1, %v593_v46, 0.0  ;;  %v638_v57 = vsel %vm79_vm1, %v598_v47, 0.0 }
   0xb   :  { %v90_v24 = vadd.f32 %v89_v15, %v88_v17  ;;  %1322 = vst [vmem:[#allocation10_spill] sm:$0xff] %v615_v52  ;;  %v630_v55 = vld [vmem:[%s1294_s0 + $0x178] sm:$0xff]  ;;  %1323 = vst [vmem:[#allocation11_spill] sm:$0xff] %v634_v56  ;;  %v642_v58 = vsel %vm79_vm1, %v603_v48, 0.0  ;;  %v647_v59 = vld [vmem:[%s1294_s0 + $0x180] sm:$0xff]  ;;  %v661_v63 = vsel %vm79_vm1, %v620_v53, 0.0 }
   0xc   :  { %1324 = vst [vmem:[#allocation12_spill] sm:$0xff] %v638_v57  ;;  %1325 = vst [vmem:[#allocation13_spill] sm:$0xff] %v642_v58  ;;  %v652_v60 = vld [vmem:[%s1294_s0 + $0x188] sm:$0xff]  ;;  %v657_v61 = vld [vmem:[%s1294_s0 + $0x190] sm:$0xff]  ;;  %v665_v0 = vsel %vm79_vm1, %v625_v54, 0.0  ;;  %v669_v4 = vsel %vm79_vm1, %v630_v55, 0.0 }
   0xd   :  { %v92_v36 = vadd.f32 %v91_v20, %v90_v24  ;;  %1326 = vst [vmem:[#allocation14_spill] sm:$0xff] %v661_v63  ;;  %1327 = vst [vmem:[#allocation15_spill] sm:$0xff] %v665_v0  ;;  %v674_v5 = vld [vmem:[%s1294_s0 + $0x198] sm:$0xff]  ;;  %v679_v6 = vld [vmem:[%s1294_s0 + $0x1a0] sm:$0xff]  ;;  %v688_v9 = vsel %vm79_vm1, %v647_v59, 0.0  ;;  %v692_v11 = vsel %vm79_vm1, %v652_v60, 0.0 }
   0xe   :  { %1328 = vst [vmem:[#allocation16_spill] sm:$0xff] %v669_v4  ;;  %v684_v8 = vld [vmem:[%s1294_s0 + $0x1a8] sm:$0xff]  ;;  %1329 = vst [vmem:[#allocation17_spill] sm:$0xff] %v688_v9  ;;  %v696_v12 = vsel %vm79_vm1, %v657_v61, 0.0  ;;  %v701_v14 = vld [vmem:[%s1294_s0 + $0x60] sm:$0xff] }
   0xf   :  { %v94_v49 = vadd.f32 %v93_v25, %v92_v36  ;;  %1330 = vst [vmem:[#allocation18_spill] sm:$0xff] %v692_v11  ;;  %1331 = vst [vmem:[#allocation19_spill] sm:$0xff] %v696_v12  ;;  %v706_v15 = vld [vmem:[%s1294_s0 + $0x1b0] sm:$0xff]  ;;  %v711_v17 = vld [vmem:[%s1294_s0 + $0x1b8] sm:$0xff]  ;;  %v720_v25 = vsel %vm79_vm1, %v674_v5, 0.0  ;;  %v728_v36 = vsel %vm79_vm1, %v684_v8, 0.0 }
  0x10   :  { %v716_v20 = vld [vmem:[%s1294_s0 + $0x1c0] sm:$0xff]  ;;  %1332 = vst [vmem:[#allocation20_spill] sm:$0xff] %v720_v25  ;;  %1334 = vst [vmem:[#allocation22_spill] sm:$0xff] %v728_v36  ;;  %v751_v36 = vsel %vm79_vm1, %v711_v17, 0.0  ;;  %v765_v11 = vld [vmem:[%s1294_s0 + $0x1e8] sm:$0xff] }
  0x11   :  { %v96_v62 = vadd.f32 %v95_v26, %v94_v49  ;;  %v724_v26 = vsel %vm79_vm1, %v679_v6, 0.0  ;;  %v733_v49 = vld [vmem:[%s1294_s0 + $0x1c8] sm:$0xff]  ;;  %1336 = vst [vmem:[#allocation24_spill] sm:$0xff] %v751_v36  ;;  %v755_v25 = vsel %vm79_vm1, %v716_v20, 0.0  ;;  %v760_v12 = vld [vmem:[%s1294_s0 + $0x1e0] sm:$0xff]  ;;  %v787_v0 = vld [vmem:[%s1294_s0 + $0x1f8] sm:$0xff] }
  0x12   :  { %1333 = vst [vmem:[#allocation21_spill] sm:$0xff] %v724_v26  ;;  %v747_v26 = vsel %vm79_vm1, %v706_v15, 0.0  ;;  %1337 = vst [vmem:[#allocation25_spill] sm:$0xff] %v755_v25  ;;  %v774_v9 = vsel %vm79_vm1, %v733_v49, 0.0  ;;  %v809_v58 = vsel %vm79_vm1, %v787_v0, 0.0  ;;  %v838_v56 = vld [vmem:[%s1294_s0 + $0x90] sm:$0xff] }
  0x13   :  { %v98_v24 = vadd.f32 %v97_v30, %v96_v62  ;;  %v738_v30 = vld [vmem:[%s1294_s0 + $0x1d0] sm:$0xff]  ;;  %v743_v62 = vld [vmem:[%s1294_s0 + $0x1d8] sm:$0xff]  ;;  %1335 = vst [vmem:[#allocation23_spill] sm:$0xff] %v747_v26  ;;  %1339 = vst [vmem:[#allocation27_spill] sm:$0xff] %v774_v9  ;;  %v797_v9 = vsel %vm79_vm1, %v765_v11, 0.0 }
  0x14   :  { %v770_v26 = vld [vmem:[%s1294_s0 + $0x1f0] sm:$0xff]  ;;  %v778_v25 = vsel %vm79_vm1, %v738_v30, 0.0  ;;  %v782_v4 = vsel %vm79_vm1, %v743_v62, 0.0  ;;  %1342 = vst [vmem:[#allocation30_spill] sm:$0xff] %v787_v0  ;;  %1344 = vst [vmem:[#allocation32_spill] sm:$0xff] %v797_v9  ;;  %v843_v52 = vld [vmem:[%s1294_s0 + $0x98] sm:$0xff] }
  0x15   :  { %1338 = vst [vmem:[#allocation26_spill] sm:$0xff] %v770_v26  ;;  %v100_v36 = vadd.f32 %v99_v31, %v98_v24  ;;  %1340 = vst [vmem:[#allocation28_spill] sm:$0xff] %v778_v25  ;;  %v103_v31 = vsel %vm79_vm1, %v701_v14, 0.0  ;;  %v793_v24 = vsel %vm79_vm1, %v760_v12, 0.0  ;;  %v801_v25 = vsel %vm79_vm1, %v770_v26, 0.0  ;;  %v28_v9 = vld [vmem:[%s1294_s0 + $0x70] sm:$0xff] }
  0x16   :  { %1341 = vst [vmem:[#allocation29_spill] sm:$0xff] %v782_v4  ;;  %1343 = vst [vmem:[#allocation31_spill] sm:$0xff] %v793_v24  ;;  %v27_v4 = vld [vmem:[%s1294_s0 + $0x68] sm:$0xff]  ;;  %v848_v51 = vld [vmem:[%s1294_s0 + $0xa0] sm:$0xff]  ;;  %v117_v39 = vsel %vm79_vm1, %v843_v52, 0.0 }
  0x17   :  { %1345 = vst [vmem:[#allocation33_spill] sm:$0xff] %v801_v25  ;;  %v102_v63 = vadd.f32 %v534_v32, %v100_v36  ;;  %1346 = vst [vmem:[#allocation34_spill] sm:$0xff] %v809_v58  ;;  %v105_v24 = vsel %vm79_vm1, %v27_v4, 0.0  ;;  %v818_v25 = vld [vmem:[%s1294_s0 + $0x78] sm:$0xff]  ;;  %v823_v32 = vld [vmem:[%s1294_s0 + $0x80] sm:$0xff]  ;;  %v107_v58 = vsel %vm79_vm1, %v28_v9, 0.0 }
  0x18   :  { %1347 = vst [vmem:[#allocation35_spill] sm:$0xff] %v818_v25  ;;  %1348 = vst [vmem:[#allocation36_spill] sm:$0xff] %v823_v32  ;;  %v828_v36 = vld [vmem:[%s1294_s0 + $0x88] sm:$0xff]  ;;  %v864_v43 = vld [vmem:[%s1294_s0 + $0xb0] sm:$0xff]  ;;  %v119_v38 = vsel %vm79_vm1, %v848_v51, 0.0 }
  0x19   :  { %v104_v57 = vadd.f32 %v103_v31, %v102_v63  ;;  %1349 = vst [vmem:[#allocation37_spill] sm:$0xff] %v828_v36  ;;  %v213_v63 = vmul.f32 %v438_v1, %v438_v1  ;;  %v214_v31 = vmul.f32 %v443_v2, %v443_v2  ;;  %1350 = vst [vmem:[#allocation38_spill] sm:$0xff] %v838_v56  ;;  %v109_v1 = vsel %vm79_vm1, %v818_v25, 0.0  ;;  %v859_v44 = vld [vmem:[%s1294_s0 + $0xa8] sm:$0xff]  ;;  %v905_v0 = vld [vmem:[%s1294_s0 + $0xd8] sm:$0xff] }
  0x1a   :  { %1351 = vst [vmem:[#allocation39_spill] sm:$0xff] %v843_v52  ;;  %1352 = vst [vmem:[#allocation40_spill] sm:$0xff] %v848_v51  ;;  %v111_v2 = vsel %vm79_vm1, %v823_v32, 0.0  ;;  %v113_v45 = vsel %vm79_vm1, %v828_v36, 0.0  ;;  %v882_v36 = vld [vmem:[%s1294_s0 + $0xc0] sm:$0xff]  ;;  %v887_v32 = vld [vmem:[%s1294_s0 + $0xc8] sm:$0xff]  ;;  %v216_v25 = vmul.f32 %v459_v7, %v459_v7 }
  0x1b   :  { %v106_v50 = vadd.f32 %v105_v24, %v104_v57  ;;  %1353 = vst [vmem:[#allocation41_spill] sm:$0xff] %v859_v44  ;;  %1354 = vst [vmem:[#allocation42_spill] sm:$0xff] %v864_v43  ;;  %v869_v57 = vld [vmem:[%s1294_s0 + $0xb8] sm:$0xff]  ;;  %v115_v24 = vsel %vm79_vm1, %v838_v56, 0.0  ;;  %v892_v52 = vld [vmem:[%s1294_s0 + $0xd0] sm:$0xff]  ;;  %v121_v51 = vsel %vm79_vm1, %v859_v44, 0.0 }
  0x1c   :  { %1355 = vst [vmem:[#allocation43_spill] sm:$0xff] %v869_v57  ;;  %1356 = vst [vmem:[#allocation44_spill] sm:$0xff] %v882_v36  ;;  %v898_v3 = vsel %vm79_vm1, %v864_v43, 0.0  ;;  %v910_v26 = vld [vmem:[%s1294_s0 + $0xe0] sm:$0xff]  ;;  %v922_v7 = vsel %vm79_vm1, %v887_v32, 0.0  ;;  %v926_v43 = vsel %vm79_vm1, %v892_v52, 0.0 }
  0x1d   :  { %1357 = vst [vmem:[#allocation45_spill] sm:$0xff] %v887_v32  ;;  %1358 = vst [vmem:[#allocation46_spill] sm:$0xff] %v892_v52  ;;  %v108_v56 = vadd.f32 %v107_v58, %v106_v50  ;;  %v914_v50 = vsel %vm79_vm1, %v869_v57, 0.0  ;;  %v918_v58 = vsel %vm79_vm1, %v882_v36, 0.0  ;;  %v931_v44 = vld [vmem:[%s1294_s0 + $0xe8] sm:$0xff]  ;;  %v936_v57 = vld [vmem:[%s1294_s0 + $0xf0] sm:$0xff]  ;;  %v217_v52 = vmul.f32 %v466_v10, %v466_v10 }
  0x1e   :  { %1359 = vst [vmem:[#allocation47_spill] sm:$0xff] %v905_v0  ;;  %1360 = vst [vmem:[#allocation48_spill] sm:$0xff] %v910_v26  ;;  %v944_v32 = vsel %vm79_vm1, %v910_v26, 0.0  ;;  %v220_v26 = vmul.f32 %v485_v18, %v485_v18  ;;  %v221_v10 = vmul.f32 %v490_v19, %v490_v19  ;;  %v246_v18 = vmul.f32 %v516_v27, %v516_v27 }
  0x1f   :  { %1361 = vst [vmem:[#allocation49_spill] sm:$0xff] %v918_v58  ;;  %1362 = vst [vmem:[#allocation50_spill] sm:$0xff] %v922_v7  ;;  %v110_v36 = vadd.f32 %v109_v1, %v108_v56  ;;  %v940_v58 = vsel %vm79_vm1, %v905_v0, 0.0  ;;  %v954_v7 = vsel %vm79_vm1, %v936_v57, 0.0  ;;  %v218_v56 = vmul.f32 %v473_v13, %v473_v13 }
  0x20   :  { %1363 = vst [vmem:[#allocation51_spill] sm:$0xff] %v926_v43  ;;  %1364 = vst [vmem:[#allocation52_spill] sm:$0xff] %v931_v44  ;;  %v950_v43 = vsel %vm79_vm1, %v931_v44, 0.0  ;;  %v219_v1 = vmul.f32 %v480_v16, %v480_v16  ;;  %v222_v44 = vmul.f32 %v497_v21, %v497_v21  ;;  %v225_v13 = vmul.f32 %v701_v14, %v701_v14 }
  0x21   :  { %1365 = vst [vmem:[#allocation53_spill] sm:$0xff] %v936_v57  ;;  %1366 = vst [vmem:[#allocation54_spill] sm:$0xff] %v954_v7  ;;  %v112_v0 = vadd.f32 %v111_v2, %v110_v36  ;;  %v223_v57 = vmul.f32 %v502_v22, %v502_v22  ;;  %v224_v7 = vmul.f32 %v507_v23, %v507_v23 }
  0x22   :  { %v972_v16 = vmul.f32 %v27_v4, %v27_v4  ;;  %v974_v2 = vmul.f32 %v28_v9, %v28_v9  ;;  %v247_v19 = vmul.f32 %v521_v28, %v521_v28  ;;  %v248_v21 = vmul.f32 %v526_v29, %v526_v29 }
  0x23   :  { %v114_v36 = vadd.f32 %v113_v45, %v112_v0  ;;  %v249_v22 = vmul.f32 %v539_v33, %v539_v33  ;;  %v250_v23 = vmul.f32 %v544_v34, %v544_v34  ;;  %v251_v45 = vmul.f32 %v549_v35, %v549_v35 }
  0x24   :  { %v252_v4 = vmul.f32 %v566_v40, %v566_v40  ;;  %v253_v27 = vmul.f32 %v571_v41, %v571_v41  ;;  %v254_v28 = vmul.f32 %v576_v42, %v576_v42  ;;  %v255_v29 = vmul.f32 %v593_v46, %v593_v46 }
  0x25   :  { %v116_v0 = vadd.f32 %v115_v24, %v114_v36  ;;  %v256_v33 = vmul.f32 %v598_v47, %v598_v47  ;;  %v277_v34 = vsel %vm79_vm1, %v213_v63, 0.0  ;;  %v278_v35 = vsel %vm79_vm1, %v214_v31, 0.0 }
  0x26   :  { %v257_v40 = vmul.f32 %v603_v48, %v603_v48  ;;  %v279_v14 = vadd.f32 %v278_v35, %v277_v34  ;;  %v280_v41 = vsel %vm79_vm1, %v215_v37, 0.0  ;;  %v258_v42 = vmul.f32 %v620_v53, %v620_v53  ;;  %v1368_v34 = vld [vmem:[#allocation30_spill] sm:$0xff] }
  0x27   :  { %v118_v9 = vadd.f32 %v117_v39, %v116_v0  ;;  %v259_v46 = vmul.f32 %v625_v54, %v625_v54  ;;  %v260_v47 = vmul.f32 %v630_v55, %v630_v55  ;;  %v282_v63 = vsel %vm79_vm1, %v216_v25, 0.0  ;;  %v1367_v0 = vld [vmem:[#allocation26_spill] sm:$0xff] }
  0x28   :  { %v261_v39 = vmul.f32 %v647_v59, %v647_v59  ;;  %v262_v48 = vmul.f32 %v652_v60, %v652_v60  ;;  %v281_v31 = vadd.f32 %v280_v41, %v279_v14  ;;  %v263_v37 = vmul.f32 %v657_v61, %v657_v61  ;;  %v1369_v41 = vld [vmem:[#allocation49_spill] sm:$0xff] }
  0x29   :  { %v120_v24 = vadd.f32 %v119_v38, %v118_v9  ;;  %v264_v53 = vmul.f32 %v674_v5, %v674_v5  ;;  %v265_v54 = vmul.f32 %v679_v6, %v679_v6  ;;  %v284_v55 = vsel %vm79_vm1, %v217_v52, 0.0 }
  0x2a   :  { %v266_v38 = vmul.f32 %v684_v8, %v684_v8  ;;  %v267_v59 = vmul.f32 %v706_v15, %v706_v15  ;;  %v283_v60 = vadd.f32 %v282_v63, %v281_v31  ;;  %v268_v36 = vmul.f32 %v711_v17, %v711_v17 }
  0x2b   :  { %v122_v25 = vadd.f32 %v121_v51, %v120_v24  ;;  %v269_v61 = vmul.f32 %v716_v20, %v716_v20  ;;  %v270_v5 = vmul.f32 %v733_v49, %v733_v49  ;;  %v286_v6 = vsel %vm79_vm1, %v218_v56, 0.0 }
  0x2c   :  { %v271_v52 = vmul.f32 %v738_v30, %v738_v30  ;;  %v272_v8 = vmul.f32 %v743_v62, %v743_v62  ;;  %v285_v15 = vadd.f32 %v284_v55, %v283_v60  ;;  %v273_v17 = vmul.f32 %v760_v12, %v760_v12 }
  0x2d   :  { %v124_v51 = vadd.f32 %v898_v3, %v122_v25  ;;  %v274_v20 = vmul.f32 %v765_v11, %v765_v11  ;;  %v275_v49 = vmul.f32 %v1367_v0, %v1367_v0  ;;  %v288_v56 = vsel %vm79_vm1, %v219_v1, 0.0  ;;  %v1371_v25 = vld [vmem:[#allocation51_spill] sm:$0xff] }
  0x2e   :  { %v276_v30 = vmul.f32 %v1368_v34, %v1368_v34  ;;  %v287_v35 = vadd.f32 %v286_v6, %v285_v15  ;;  %v290_v62 = vsel %vm79_vm1, %v220_v26, 0.0  ;;  %v292_v9 = vsel %vm79_vm1, %v221_v10, 0.0  ;;  %v1373_v34 = vld [vmem:[#allocation54_spill] sm:$0xff] }
  0x2f   :  { %v126_v3 = vadd.f32 %v914_v50, %v124_v51  ;;  %v294_v12 = vsel %vm79_vm1, %v222_v44, 0.0  ;;  %v296_v14 = vsel %vm79_vm1, %v223_v57, 0.0  ;;  %v298_v11 = vsel %vm79_vm1, %v224_v7, 0.0  ;;  %v1370_v7 = vld [vmem:[#allocation50_spill] sm:$0xff] }
  0x30   :  { %v289_v24 = vadd.f32 %v288_v56, %v287_v35  ;;  %v300_v1 = vsel %vm79_vm1, %v225_v13, 0.0  ;;  %v1055_v50 = vsel %vm79_vm1, %v246_v18, 0.0  ;;  %v1058_v31 = vsel %vm79_vm1, %v247_v19, 0.0  ;;  %v1372_v56 = vld [vmem:[#allocation35_spill] sm:$0xff] }
  0x31   :  { %v128_v63 = vadd.f32 %v1369_v41, %v126_v3  ;;  %v1061_v26 = vsel %vm79_vm1, %v248_v21, 0.0  ;;  %v1064_v44 = vsel %vm79_vm1, %v249_v22, 0.0  ;;  %v1067_v57 = vsel %vm79_vm1, %v250_v23, 0.0 }
  0x32   :  { %v291_v55 = vadd.f32 %v290_v62, %v289_v24  ;;  %v1071_v13 = vsel %vm79_vm1, %v251_v45, 0.0  ;;  %v1074_v18 = vsel %vm79_vm1, %v252_v4, 0.0  ;;  %v1077_v19 = vsel %vm79_vm1, %v253_v27, 0.0  ;;  %v1374_v62 = vld [vmem:[#allocation36_spill] sm:$0xff] }
  0x33   :  { %v130_v10 = vadd.f32 %v1370_v7, %v128_v63  ;;  %v1080_v21 = vsel %vm79_vm1, %v254_v28, 0.0  ;;  %v1083_v22 = vsel %vm79_vm1, %v255_v29, 0.0  ;;  %v1086_v23 = vsel %vm79_vm1, %v256_v33, 0.0 }
  0x34   :  { %v293_v6 = vadd.f32 %v292_v9, %v291_v55  ;;  %v1090_v45 = vsel %vm79_vm1, %v257_v40, 0.0  ;;  %v1093_v4 = vsel %vm79_vm1, %v258_v42, 0.0  ;;  %v1096_v27 = vsel %vm79_vm1, %v259_v46, 0.0 }
  0x35   :  { %v132_v60 = vadd.f32 %v1371_v25, %v130_v10  ;;  %v1099_v28 = vsel %vm79_vm1, %v260_v47, 0.0  ;;  %v1102_v29 = vsel %vm79_vm1, %v261_v39, 0.0  ;;  %v1105_v33 = vsel %vm79_vm1, %v262_v48, 0.0  ;;  %v1376_v10 = vld [vmem:[#allocation38_spill] sm:$0xff] }
  0x36   :  { %v295_v15 = vadd.f32 %v294_v12, %v293_v6  ;;  %v1109_v40 = vsel %vm79_vm1, %v263_v37, 0.0  ;;  %v1112_v42 = vsel %vm79_vm1, %v264_v53, 0.0  ;;  %v1115_v46 = vsel %vm79_vm1, %v265_v54, 0.0  ;;  %v1377_v25 = vld [vmem:[#allocation2_spill] sm:$0xff] }
  0x37   :  { %v134_v51 = vadd.f32 %v940_v58, %v132_v60  ;;  %v1118_v47 = vsel %vm79_vm1, %v266_v38, 0.0  ;;  %v1121_v39 = vsel %vm79_vm1, %v267_v59, 0.0  ;;  %v1124_v48 = vsel %vm79_vm1, %v268_v36, 0.0 }
  0x38   :  { %v297_v0 = vadd.f32 %v296_v14, %v295_v15  ;;  %v1128_v37 = vsel %vm79_vm1, %v269_v61, 0.0  ;;  %v1131_v53 = vsel %vm79_vm1, %v270_v5, 0.0  ;;  %v1134_v54 = vsel %vm79_vm1, %v271_v52, 0.0 }
  0x39   :  { %v136_v58 = vadd.f32 %v944_v32, %v134_v51  ;;  %v1137_v38 = vsel %vm79_vm1, %v272_v8, 0.0  ;;  %v1140_v59 = vsel %vm79_vm1, %v273_v17, 0.0  ;;  %v1143_v36 = vsel %vm79_vm1, %v274_v20, 0.0  ;;  %v1148_v32 = vld [vmem:[%s1294_s0 + $0xf8] sm:$0xff]  ;;  %v1378_v51 = vld [vmem:[#allocation39_spill] sm:$0xff] }
  0x3a   :  { %v299_v5 = vadd.f32 %v298_v11, %v297_v0  ;;  %v1152_v52 = vsel %vm79_vm1, %v275_v49, 0.0  ;;  %v1155_v8 = vsel %vm79_vm1, %v276_v30, 0.0  ;;  %v141_v17 = vsel %vm79_vm1, %v1148_v32, 0.0 }
  0x3b   :  { %v138_v61 = vadd.f32 %v950_v43, %v136_v58  ;;  %v228_v20 = vmul.f32 %v1372_v56, %v1372_v56  ;;  %v302_v3 = vsel %vm79_vm1, %v972_v16, 0.0  ;;  %v1166_v43 = vld [vmem:[%s1294_s0 + $0x100] sm:$0xff]  ;;  %v229_v9 = vmul.f32 %v1374_v62, %v1374_v62  ;;  %v1375_v16 = vld [vmem:[#allocation37_spill] sm:$0xff]  ;;  %v1379_v58 = vld [vmem:[#allocation3_spill] sm:$0xff] }
  0x3c   :  { %v301_v35 = vadd.f32 %v300_v1, %v299_v5  ;;  %v143_v30 = vsel %vm79_vm1, %v1166_v43, 0.0  ;;  %v304_v12 = vsel %vm79_vm1, %v974_v2, 0.0  ;;  %v230_v41 = vmul.f32 %v1375_v16, %v1375_v16  ;;  %v1380_v5 = vld [vmem:[#allocation40_spill] sm:$0xff]  ;;  %v1383_v62 = vld [vmem:[#allocation5_spill] sm:$0xff] }
  0x3d   :  { %v140_v49 = vadd.f32 %v1373_v34, %v138_v61  ;;  %v306_v63 = vsel %vm79_vm1, %v228_v20, 0.0  ;;  %v231_v1 = vmul.f32 %v1376_v10, %v1376_v10  ;;  %v308_v55 = vsel %vm79_vm1, %v229_v9, 0.0  ;;  %v1381_v20 = vld [vmem:[#allocation4_spill] sm:$0xff] }
  0x3e   :  { %v303_v11 = vadd.f32 %v302_v3, %v301_v35  ;;  %v232_v2 = vmul.f32 %v1378_v51, %v1378_v51  ;;  %v310_v15 = vsel %vm79_vm1, %v230_v41, 0.0  ;;  %v1385_v41 = vld [vmem:[#allocation6_spill] sm:$0xff] }
  0x3f   :  { %v142_v14 = vadd.f32 %v141_v17, %v140_v49  ;;  %v233_v17 = vmul.f32 %v1380_v5, %v1380_v5  ;;  %v312_v56 = vsel %vm79_vm1, %v231_v1, 0.0  ;;  %v1382_v49 = vld [vmem:[#allocation41_spill] sm:$0xff] }
  0x40   :  { %v305_v7 = vadd.f32 %v304_v12, %v303_v11  ;;  %v234_v35 = vmul.f32 %v1382_v49, %v1382_v49 }
  0x41   :  { %v144_v24 = vadd.f32 %v143_v30, %v142_v14  ;;  %v314_v30 = vsel %vm79_vm1, %v232_v2, 0.0  ;;  %v1384_v14 = vld [vmem:[#allocation42_spill] sm:$0xff]  ;;  %v316_v16 = vsel %vm79_vm1, %v233_v17, 0.0 }
  0x42   :  { %v307_v6 = vadd.f32 %v306_v63, %v305_v7  ;;  %v235_v11 = vmul.f32 %v1384_v14, %v1384_v14  ;;  %v1386_v7 = vld [vmem:[#allocation43_spill] sm:$0xff]  ;;  %v318_v1 = vsel %vm79_vm1, %v234_v35, 0.0 }
  0x43   :  { %v146_v60 = vadd.f32 %v1377_v25, %v144_v24  ;;  %v236_v10 = vmul.f32 %v1386_v7, %v1386_v7 }
  0x44   :  { %v309_v61 = vadd.f32 %v308_v55, %v307_v6  ;;  %v1387_v55 = vld [vmem:[#allocation7_spill] sm:$0xff]  ;;  %v1388_v6 = vld [vmem:[#allocation44_spill] sm:$0xff]  ;;  %v320_v2 = vsel %vm79_vm1, %v235_v11, 0.0 }
  0x45   :  { %v148_v0 = vadd.f32 %v1379_v58, %v146_v60  ;;  %v237_v51 = vmul.f32 %v1388_v6, %v1388_v6  ;;  %v322_v17 = vsel %vm79_vm1, %v236_v10, 0.0 }
  0x46   :  { %v311_v34 = vadd.f32 %v310_v15, %v309_v61  ;;  %v1389_v15 = vld [vmem:[#allocation8_spill] sm:$0xff]  ;;  %v1390_v61 = vld [vmem:[#allocation45_spill] sm:$0xff] }
  0x47   :  { %v150_v3 = vadd.f32 %v1381_v20, %v148_v0  ;;  %v238_v5 = vmul.f32 %v1390_v61, %v1390_v61  ;;  %v324_v35 = vsel %vm79_vm1, %v237_v51, 0.0 }
  0x48   :  { %v313_v12 = vadd.f32 %v312_v56, %v311_v34  ;;  %v1391_v56 = vld [vmem:[#allocation9_spill] sm:$0xff]  ;;  %v1392_v34 = vld [vmem:[#allocation46_spill] sm:$0xff] }
  0x49   :  { %v152_v9 = vadd.f32 %v1383_v62, %v150_v3  ;;  %v239_v49 = vmul.f32 %v1392_v34, %v1392_v34  ;;  %v326_v11 = vsel %vm79_vm1, %v238_v5, 0.0 }
  0x4a   :  { %v315_v24 = vadd.f32 %v314_v30, %v313_v12  ;;  %v1393_v30 = vld [vmem:[#allocation10_spill] sm:$0xff]  ;;  %v1394_v12 = vld [vmem:[#allocation47_spill] sm:$0xff] }
  0x4b   :  { %v154_v63 = vadd.f32 %v1385_v41, %v152_v9  ;;  %v240_v14 = vmul.f32 %v1394_v12, %v1394_v12  ;;  %v328_v10 = vsel %vm79_vm1, %v239_v49, 0.0  ;;  %v1402_v49 = vld [vmem:[#allocation15_spill] sm:$0xff]  ;;  %v1403_v12 = vld [vmem:[#allocation16_spill] sm:$0xff] }
  0x4c   :  { %v317_v60 = vadd.f32 %v316_v16, %v315_v24  ;;  %v1395_v16 = vld [vmem:[#allocation11_spill] sm:$0xff]  ;;  %v1396_v24 = vld [vmem:[#allocation48_spill] sm:$0xff] }
  0x4d   :  { %v156_v25 = vadd.f32 %v1387_v55, %v154_v63  ;;  %v241_v7 = vmul.f32 %v1396_v24, %v1396_v24  ;;  %v330_v51 = vsel %vm79_vm1, %v240_v14, 0.0 }
  0x4e   :  { %v319_v0 = vadd.f32 %v318_v1, %v317_v60  ;;  %v1397_v1 = vld [vmem:[#allocation12_spill] sm:$0xff] }
  0x4f   :  { %v158_v58 = vadd.f32 %v1389_v15, %v156_v25  ;;  %v1398_v60 = vld [vmem:[#allocation52_spill] sm:$0xff]  ;;  %v332_v5 = vsel %vm79_vm1, %v241_v7, 0.0  ;;  %v1405_v7 = vld [vmem:[#allocation18_spill] sm:$0xff] }
  0x50   :  { %v321_v3 = vadd.f32 %v320_v2, %v319_v0  ;;  %v242_v6 = vmul.f32 %v1398_v60, %v1398_v60  ;;  %v1399_v2 = vld [vmem:[#allocation13_spill] sm:$0xff] }
  0x51   :  { %v160_v20 = vadd.f32 %v1391_v56, %v158_v58  ;;  %v1400_v0 = vld [vmem:[#allocation53_spill] sm:$0xff] }
  0x52   :  { %v323_v9 = vadd.f32 %v322_v17, %v321_v3  ;;  %v243_v61 = vmul.f32 %v1400_v0, %v1400_v0  ;;  %v1401_v17 = vld [vmem:[#allocation14_spill] sm:$0xff]  ;;  %v244_v3 = vmul.f32 %v1148_v32, %v1148_v32  ;;  %v334_v34 = vsel %vm79_vm1, %v242_v6, 0.0  ;;  %v1407_v6 = vld [vmem:[#allocation20_spill] sm:$0xff] }
  0x53   :  { %v162_v62 = vadd.f32 %v1393_v30, %v160_v20  ;;  %v1409_v0 = vld [vmem:[#allocation22_spill] sm:$0xff] }
  0x54   :  { %v325_v63 = vadd.f32 %v324_v35, %v323_v9  ;;  %v336_v9 = vsel %vm79_vm1, %v243_v61, 0.0 }
  0x55   :  { %v164_v41 = vadd.f32 %v1395_v16, %v162_v62  ;;  %v245_v62 = vmul.f32 %v1166_v43, %v1166_v43  ;;  %v338_v16 = vsel %vm79_vm1, %v244_v3, 0.0  ;;  %v1411_v3 = vld [vmem:[#allocation24_spill] sm:$0xff] }
  0x56   :  { %v327_v25 = vadd.f32 %v326_v11, %v325_v63 }
  0x57   :  { %v166_v55 = vadd.f32 %v1397_v1, %v164_v41  ;;  %v1404_v41 = vld [vmem:[#allocation17_spill] sm:$0xff]  ;;  %v340_v32 = vsel %vm79_vm1, %v245_v62, 0.0  ;;  %v1413_v62 = vld [vmem:[#allocation27_spill] sm:$0xff] }
  0x58   :  { %v329_v58 = vadd.f32 %v328_v10, %v327_v25 }
  0x59   :  { %v168_v15 = vadd.f32 %v1399_v2, %v166_v55  ;;  %v1406_v55 = vld [vmem:[#allocation19_spill] sm:$0xff]  ;;  %v1408_v2 = vld [vmem:[#allocation21_spill] sm:$0xff] }
  0x5a   :  { %v331_v20 = vadd.f32 %v330_v51, %v329_v58 }
  0x5b   :  { %v170_v56 = vadd.f32 %v1401_v17, %v168_v15  ;;  %v1410_v17 = vld [vmem:[#allocation23_spill] sm:$0xff] }
  0x5c   :  { %v333_v30 = vadd.f32 %v332_v5, %v331_v20 }
  0x5d   :  { %v172_v35 = vadd.f32 %v1402_v49, %v170_v56 }
  0x5e   :  { %v335_v11 = vadd.f32 %v334_v34, %v333_v30 }
  0x5f   :  { %v174_v14 = vadd.f32 %v1403_v12, %v172_v35  ;;  %v1412_v35 = vld [vmem:[#allocation25_spill] sm:$0xff]  ;;  %v1414_v12 = vld [vmem:[#allocation28_spill] sm:$0xff] }
  0x60   :  { %v337_v24 = vadd.f32 %v336_v9, %v335_v11  ;;  %v1415_v11 = vld [vmem:[#allocation29_spill] sm:$0xff] }
  0x61   :  { %v176_v63 = vadd.f32 %v1404_v41, %v174_v14  ;;  %v1416_v41 = vld [vmem:[#allocation31_spill] sm:$0xff] }
  0x62   :  { %v339_v1 = vadd.f32 %v338_v16, %v337_v24  ;;  %v1417_v24 = vld [vmem:[#allocation32_spill] sm:$0xff] }
  0x63   :  { %v178_v10 = vadd.f32 %v1405_v7, %v176_v63  ;;  %v1418_v7 = vld [vmem:[#allocation33_spill] sm:$0xff] }
  0x64   :  { %v341_v60 = vadd.f32 %v340_v32, %v339_v1  ;;  %v1419_v1 = vld [vmem:[#allocation34_spill] sm:$0xff] }
  0x65   :  { %v180_v25 = vadd.f32 %v1406_v55, %v178_v10 }
  0x66   :  { %v343_v51 = vadd.f32 %v1055_v50, %v341_v60 }
  0x67   :  { %v182_v43 = vadd.f32 %v1407_v6, %v180_v25 }
  0x68   :  { %v345_v58 = vadd.f32 %v1058_v31, %v343_v51 }
  0x69   :  { %v184_v15 = vadd.f32 %v1408_v2, %v182_v43 }
  0x6a   :  { %v347_v5 = vadd.f32 %v1061_v26, %v345_v58 }
  0x6b   :  { %v186_v61 = vadd.f32 %v1409_v0, %v184_v15 }
  0x6c   :  { %v349_v20 = vadd.f32 %v1064_v44, %v347_v5 }
  0x6d   :  { %v188_v56 = vadd.f32 %v1410_v17, %v186_v61 }
  0x6e   :  { %v351_v49 = vadd.f32 %v1067_v57, %v349_v20 }
  0x6f   :  { %v190_v34 = vadd.f32 %v1411_v3, %v188_v56 }
  0x70   :  { %v353_v50 = vadd.f32 %v1071_v13, %v351_v49 }
  0x71   :  { %v192_v30 = vadd.f32 %v1412_v35, %v190_v34 }
  0x72   :  { %v355_v31 = vadd.f32 %v1074_v18, %v353_v50 }
  0x73   :  { %v194_v9 = vadd.f32 %v1413_v62, %v192_v30 }
  0x74   :  { %v357_v26 = vadd.f32 %v1077_v19, %v355_v31 }
  0x75   :  { %v196_v14 = vadd.f32 %v1414_v12, %v194_v9 }
  0x76   :  { %v359_v44 = vadd.f32 %v1080_v21, %v357_v26 }
  0x77   :  { %v198_v16 = vadd.f32 %v1415_v11, %v196_v14 }
  0x78   :  { %v361_v57 = vadd.f32 %v1083_v22, %v359_v44 }
  0x79   :  { %v200_v63 = vadd.f32 %v1416_v41, %v198_v16 }
  0x7a   :  { %v363_v13 = vadd.f32 %v1086_v23, %v361_v57 }
  0x7b   :  { %v202_v32 = vadd.f32 %v1417_v24, %v200_v63 }
  0x7c   :  { %v365_v18 = vadd.f32 %v1090_v45, %v363_v13 }
  0x7d   :  { %v204_v10 = vadd.f32 %v1418_v7, %v202_v32 }
  0x7e   :  { %v367_v19 = vadd.f32 %v1093_v4, %v365_v18 }
  0x7f   :  { %v206_v55 = vadd.f32 %v1419_v1, %v204_v10 }
  0x80   :  { %v369_v25 = vadd.f32 %v1096_v27, %v367_v19 }
  0x81   :  { %v207_v2 = vrot.slane %v206_v55, 4 }
  0x82   :  { %v371_v21 = vadd.f32 %v1099_v28, %v369_v25 }
  0x84   :  { %v373_v60 = vadd.f32 %v1102_v29, %v371_v21 }
  0x86   :  { %v375_v22 = vadd.f32 %v1105_v33, %v373_v60 }
  0x88   :  { %v377_v6 = vadd.f32 %v1109_v40, %v375_v22  ;;  %v208_v40 = vadd.f32 %v207_v2, %v206_v55 }
  0x8a   :  { %v379_v23 = vadd.f32 %v1112_v42, %v377_v6  ;;  %v209_v15 = vrot.slane %v208_v40, 2 }
  0x8c   :  { %v381_v43 = vadd.f32 %v1115_v46, %v379_v23 }
  0x8e   :  { %v383_v45 = vadd.f32 %v1118_v47, %v381_v43 }
  0x90   :  { %v385_v51 = vadd.f32 %v1121_v39, %v383_v45 }
  0x92   :  { %v387_v4 = vadd.f32 %v1124_v48, %v385_v51  ;;  %v210_v48 = vadd.f32 %v209_v15, %v208_v40 }
  0x94   :  { %v389_v27 = vadd.f32 %v1128_v37, %v387_v4  ;;  %v211_v0 = vrot.slane %v210_v48, 1 }
  0x96   :  { %v391_v28 = vadd.f32 %v1131_v53, %v389_v27  ;;  %v212_v5 = vadd.f32 %v211_v0, %v210_v48 }
  0x98   :  { %v393_v29 = vadd.f32 %v1134_v54, %v391_v28 }
  0x9a   :  { %v395_v33 = vadd.f32 %v1137_v38, %v393_v29  ;;  %v78_v38 = vld [vmem:[%s1295_s1] sm:$0x3] }
  0x9c   :  { %v397_v42 = vadd.f32 %v1140_v59, %v395_v33 }
  0x9e   :  { %v399_v46 = vadd.f32 %v1143_v36, %v397_v42 }
  0xa0   :  { %v401_v47 = vadd.f32 %v1152_v52, %v399_v46 }
  0xa2   :  { %v403_v39 = vadd.f32 %v1155_v8, %v401_v47 }
  0xa4   :  { %v404_v58 = vrot.slane %v403_v39, 4 }
  0xa6   :  { %v405_v37 = vadd.f32 %v404_v58, %v403_v39 }
  0xa8   :  { %v406_v53 = vrot.slane %v405_v37, 2 }
  0xaa   :  { %v407_v61 = vadd.f32 %v406_v53, %v405_v37 }
  0xac   :  { %v408_v54 = vrot.slane %v407_v61, 1 }
  0xae   :  { %v409_v59 = vadd.f32 %v408_v54, %v407_v61 }
  0xb0   :  { %v411_v36 = vsel %vm410_vm2, %v212_v5, %v409_v59 }
  0xb1   :  { %v412_v17 = vadd.f32 %v411_v36, %v78_v38 }
  0xb3   :  { %414 = vst.msk [vmem:[%s1295_s1] sm:$0x3] %vm12_vm0, %v412_v17 }

// kernel: _lambda_.46
= control target key start
LH: loop header
LB: loop body
LE: loop exit
PB: predicated region body
PF: predicated region fallthrough
CT: control target
= control target key end

     0   :  { %v325_v7 = vmov 1966171168   ;;  %v32_v9 = vlaneseq  ;;  %vm253_vm0 = vcmask 64512   ;;  %s940_s1 = inlined_call_operand.vmem [shape: f32[2,8], index: 1, kind: input, shape index: {}]   ;;  %s941_s2 = inlined_call_operand.vmem [shape: f32[1,8], index: 2, kind: input, shape index: {}]   ;;  %s942_s0 = inlined_call_operand.vmem [shape: f32[512,8], index: 0, kind: input, shape index: {}]   ;;  %s943_s3 = inlined_call_operand.vmem [shape: f32[1,8], index: 3, kind: input, shape index: {}]   ;;  %s944_s4 = inlined_call_operand.vmem [shape: f32[512,8], index: 4, kind: output, shape index: {}]  }
   0x1   :  { %v17_v0 = vld [vmem:[%s940_s1] sm:$0x3]  ;;  %v30_v8 = vunpack.c.l.s4 %v325_v7  ;;  %v50_v22 = vld [vmem:[%s942_s0 + $0x8] sm:$0xff]  ;;  %v51_v23 = vld [vmem:[%s942_s0 + $0x10] sm:$0xff] }
   0x2   :  { %v18_v1 = vmul.f32 0.001953125, %v17_v0  ;;  %v33_v11 = vshrl.u32 %v32_v9, 7  ;;  %v25_v16 = vld [vmem:[%s941_s2] sm:$0x1]  ;;  %v52_v24 = vld [vmem:[%s942_s0 + $0x18] sm:$0xff]  ;;  %v54_v28 = vld [vmem:[%s942_s0 + $0x28] sm:$0xff] }
   0x3   :  { %v31_v10 = vunpack.c.0.s8 %v30_v8  ;;  %v46_v20 = vld [vmem:[%s943_s3] sm:$0x1]  ;;  %v55_v29 = vld [vmem:[%s942_s0 + $0x30] sm:$0xff]  ;;  %v56_v30 = vld [vmem:[%s942_s0 + $0x38] sm:$0xff] }
   0x4   :  { %v19_v2 = vmul.f32 %v18_v1, %v18_v1  ;;  %v116_v18 = vsub.s32 0, %v33_v11  ;;  %v49_v21 = vld [vmem:[%s942_s0] sm:$0xff]  ;;  %v58_v32 = vld [vmem:[%s942_s0 + $0x48] sm:$0xff]  ;;  %v59_v33 = vld [vmem:[%s942_s0 + $0x50] sm:$0xff] }
   0x5   :  { %v34_v12 = vsub.s32 %v31_v10, %v33_v11  ;;  %v53_v25 = vld [vmem:[%s942_s0 + $0x20] sm:$0xff]  ;;  %v60_v38 = vld [vmem:[%s942_s0 + $0x58] sm:$0xff]  ;;  %v62_v40 = vld [vmem:[%s942_s0 + $0x68] sm:$0xff] }
   0x6   :  { %v21_v3 = vrot.slane %v19_v2, 7  ;;  %v57_v31 = vld [vmem:[%s942_s0 + $0x40] sm:$0xff]  ;;  %v63_v57 = vld [vmem:[%s942_s0 + $0x70] sm:$0xff]  ;;  %v64_v58 = vld [vmem:[%s942_s0 + $0x78] sm:$0xff] }
   0x7   :  { %v61_v39 = vld [vmem:[%s942_s0 + $0x60] sm:$0xff]  ;;  %v66_v0 = vld [vmem:[%s942_s0 + $0x88] sm:$0xff]  ;;  %v68_v2 = vld [vmem:[%s942_s0 + $0x98] sm:$0xff] }
   0x8   :  { %v23_v4 = vsub.f32 %v18_v1, %v21_v3  ;;  %v65_v59 = vld [vmem:[%s942_s0 + $0x80] sm:$0xff]  ;;  %v70_v8 = vld [vmem:[%s942_s0 + $0xa8] sm:$0xff] }
   0x9   :  { %v69_v7 = vld [vmem:[%s942_s0 + $0xa0] sm:$0xff] }
   0xa   :  { %v24_v5 = vmax.f32 %v23_v4, 0.0 }
   0xc   :  { %v26_v6 = vadd.f32 1e-05, %v24_v5 }
   0xe   :  { %323 = vrsqrt.f32 %v26_v6 }
  0x18   :  { %v324_v13 = vpop.eup %323 }
  0x19   :  { %v35_v14 = vrot.slane %v324_v13, %v34_v12 }
  0x1b   :  { %v36_v15 = vcombine.high %v35_v14, %v35_v14 }
  0x1d   :  { %v43_v17 = vrot.slane %v36_v15, %v34_v12 }
  0x1f   :  { %v45_v19 = vmul.f32 %v43_v17, %v25_v16  ;;  %v71_v17 = vld [vmem:[%s942_s0 + $0xb0] sm:$0xff] }
  0x21   :  { %v47_v26 = vmul.f32 %v45_v19, %v18_v1  ;;  %v375_v27 = vrot.slane %v45_v19, %v116_v18  ;;  %v67_v1 = vld [vmem:[%s942_s0 + $0x90] sm:$0xff]  ;;  %v73_v19 = vld [vmem:[%s942_s0 + $0xc0] sm:$0xff] }
  0x23   :  { %v48_v34 = vsub.f32 %v46_v20, %v47_v26  ;;  %v119_v35 = vmul.f32 %v375_v27, %v49_v21  ;;  %v120_v36 = vmul.f32 %v375_v27, %v50_v22  ;;  %v121_v37 = vmul.f32 %v375_v27, %v51_v23  ;;  %v76_v26 = vld [vmem:[%s942_s0 + $0xd8] sm:$0xff] }
  0x24   :  { %v122_v41 = vmul.f32 %v375_v27, %v52_v24  ;;  %v123_v42 = vmul.f32 %v375_v27, %v53_v25  ;;  %v124_v43 = vmul.f32 %v375_v27, %v54_v28  ;;  %v125_v44 = vmul.f32 %v375_v27, %v55_v29  ;;  %v74_v24 = vld [vmem:[%s942_s0 + $0xc8] sm:$0xff]  ;;  %v75_v25 = vld [vmem:[%s942_s0 + $0xd0] sm:$0xff] }
  0x25   :  { %v411_v45 = vrot.slane %v48_v34, %v116_v18  ;;  %v126_v46 = vmul.f32 %v375_v27, %v56_v30  ;;  %v127_v47 = vmul.f32 %v375_v27, %v57_v31  ;;  %v128_v48 = vmul.f32 %v375_v27, %v58_v32  ;;  %v72_v18 = vld [vmem:[%s942_s0 + $0xb8] sm:$0xff]  ;;  %v77_v32 = vld [vmem:[%s942_s0 + $0xe0] sm:$0xff] }
  0x26   :  { %v129_v49 = vmul.f32 %v375_v27, %v59_v33  ;;  %v130_v50 = vmul.f32 %v375_v27, %v60_v38  ;;  %v131_v51 = vmul.f32 %v375_v27, %v61_v39  ;;  %v132_v52 = vmul.f32 %v375_v27, %v62_v40  ;;  %v78_v33 = vld [vmem:[%s942_s0 + $0xe8] sm:$0xff] }
  0x27   :  { %v189_v53 = vadd.f32 %v411_v45, %v119_v35  ;;  %v190_v54 = vadd.f32 %v411_v45, %v120_v36  ;;  %v191_v55 = vadd.f32 %v411_v45, %v121_v37  ;;  %v192_v56 = vadd.f32 %v411_v45, %v122_v41 }
  0x28   :  { %v193_v60 = vadd.f32 %v411_v45, %v123_v42  ;;  %v194_v61 = vadd.f32 %v411_v45, %v124_v43  ;;  %v195_v62 = vadd.f32 %v411_v45, %v125_v44  ;;  %v196_v63 = vadd.f32 %v411_v45, %v126_v46  ;;  %v79_v42 = vld [vmem:[%s942_s0 + $0xf0] sm:$0xff]  ;;  %v80_v43 = vld [vmem:[%s942_s0 + $0xf8] sm:$0xff]  ;;  %v81_v44 = vld [vmem:[%s942_s0 + $0x100] sm:$0xff] }
  0x29   :  { %254 = vst.msk [vmem:[%s944_s4] sm:$0xff] %vm253_vm0, %v189_v53  ;;  %255 = vst.msk [vmem:[%s944_s4 + $0x8] sm:$0xff] %vm253_vm0, %v190_v54  ;;  %v197_v3 = vadd.f32 %v411_v45, %v127_v47  ;;  %v198_v4 = vadd.f32 %v411_v45, %v128_v48  ;;  %v199_v5 = vadd.f32 %v411_v45, %v129_v49 }
  0x2a   :  { %256 = vst.msk [vmem:[%s944_s4 + $0x10] sm:$0xff] %vm253_vm0, %v191_v55  ;;  %257 = vst.msk [vmem:[%s944_s4 + $0x18] sm:$0xff] %vm253_vm0, %v192_v56  ;;  %v200_v6 = vadd.f32 %v411_v45, %v130_v50  ;;  %v201_v9 = vadd.f32 %v411_v45, %v131_v51  ;;  %v202_v10 = vadd.f32 %v411_v45, %v132_v52  ;;  %v82_v50 = vld [vmem:[%s942_s0 + $0x108] sm:$0xff]  ;;  %v83_v51 = vld [vmem:[%s942_s0 + $0x110] sm:$0xff] }
  0x2b   :  { %258 = vst.msk [vmem:[%s944_s4 + $0x20] sm:$0xff] %vm253_vm0, %v193_v60  ;;  %259 = vst.msk [vmem:[%s944_s4 + $0x28] sm:$0xff] %vm253_vm0, %v194_v61  ;;  %v133_v11 = vmul.f32 %v375_v27, %v63_v57  ;;  %v134_v12 = vmul.f32 %v375_v27, %v64_v58  ;;  %v135_v13 = vmul.f32 %v375_v27, %v65_v59  ;;  %v84_v52 = vld [vmem:[%s942_s0 + $0x118] sm:$0xff]  ;;  %v85_v57 = vld [vmem:[%s942_s0 + $0x120] sm:$0xff] }
  0x2c   :  { %260 = vst.msk [vmem:[%s944_s4 + $0x30] sm:$0xff] %vm253_vm0, %v195_v62  ;;  %261 = vst.msk [vmem:[%s944_s4 + $0x38] sm:$0xff] %vm253_vm0, %v196_v63  ;;  %v136_v14 = vmul.f32 %v375_v27, %v66_v0  ;;  %v137_v15 = vmul.f32 %v375_v27, %v67_v1  ;;  %v138_v16 = vmul.f32 %v375_v27, %v68_v2  ;;  %v86_v58 = vld [vmem:[%s942_s0 + $0x128] sm:$0xff] }
  0x2d   :  { %262 = vst.msk [vmem:[%s944_s4 + $0x40] sm:$0xff] %vm253_vm0, %v197_v3  ;;  %263 = vst.msk [vmem:[%s944_s4 + $0x48] sm:$0xff] %vm253_vm0, %v198_v4  ;;  %v203_v20 = vadd.f32 %v411_v45, %v133_v11  ;;  %v204_v21 = vadd.f32 %v411_v45, %v134_v12  ;;  %v139_v22 = vmul.f32 %v375_v27, %v69_v7  ;;  %v87_v3 = vld [vmem:[%s942_s0 + $0x130] sm:$0xff]  ;;  %v88_v4 = vld [vmem:[%s942_s0 + $0x138] sm:$0xff] }
  0x2e   :  { %264 = vst.msk [vmem:[%s944_s4 + $0x50] sm:$0xff] %vm253_vm0, %v199_v5  ;;  %265 = vst.msk [vmem:[%s944_s4 + $0x58] sm:$0xff] %vm253_vm0, %v200_v6  ;;  %v140_v23 = vmul.f32 %v375_v27, %v70_v8  ;;  %v205_v28 = vadd.f32 %v411_v45, %v135_v13  ;;  %v206_v29 = vadd.f32 %v411_v45, %v136_v14  ;;  %v89_v5 = vld [vmem:[%s942_s0 + $0x140] sm:$0xff]  ;;  %v91_v11 = vld [vmem:[%s942_s0 + $0x150] sm:$0xff] }
  0x2f   :  { %266 = vst.msk [vmem:[%s944_s4 + $0x60] sm:$0xff] %vm253_vm0, %v201_v9  ;;  %267 = vst.msk [vmem:[%s944_s4 + $0x68] sm:$0xff] %vm253_vm0, %v202_v10  ;;  %v207_v30 = vadd.f32 %v411_v45, %v137_v15  ;;  %v208_v31 = vadd.f32 %v411_v45, %v138_v16  ;;  %v209_v34 = vadd.f32 %v411_v45, %v139_v22  ;;  %v90_v10 = vld [vmem:[%s942_s0 + $0x148] sm:$0xff]  ;;  %v92_v12 = vld [vmem:[%s942_s0 + $0x158] sm:$0xff] }
  0x30   :  { %268 = vst.msk [vmem:[%s944_s4 + $0x70] sm:$0xff] %vm253_vm0, %v203_v20  ;;  %269 = vst.msk [vmem:[%s944_s4 + $0x78] sm:$0xff] %vm253_vm0, %v204_v21  ;;  %v210_v35 = vadd.f32 %v411_v45, %v140_v23  ;;  %v141_v36 = vmul.f32 %v375_v27, %v71_v17  ;;  %v142_v37 = vmul.f32 %v375_v27, %v72_v18  ;;  %v93_v17 = vld [vmem:[%s942_s0 + $0x160] sm:$0xff]  ;;  %v94_v18 = vld [vmem:[%s942_s0 + $0x168] sm:$0xff] }
  0x31   :  { %270 = vst.msk [vmem:[%s944_s4 + $0x80] sm:$0xff] %vm253_vm0, %v205_v28  ;;  %271 = vst.msk [vmem:[%s944_s4 + $0x88] sm:$0xff] %vm253_vm0, %v206_v29  ;;  %v143_v38 = vmul.f32 %v375_v27, %v73_v19  ;;  %v144_v39 = vmul.f32 %v375_v27, %v74_v24  ;;  %v145_v40 = vmul.f32 %v375_v27, %v75_v25  ;;  %v95_v28 = vld [vmem:[%s942_s0 + $0x170] sm:$0xff]  ;;  %v96_v29 = vld [vmem:[%s942_s0 + $0x178] sm:$0xff] }
  0x32   :  { %272 = vst.msk [vmem:[%s944_s4 + $0x90] sm:$0xff] %vm253_vm0, %v207_v30  ;;  %273 = vst.msk [vmem:[%s944_s4 + $0x98] sm:$0xff] %vm253_vm0, %v208_v31  ;;  %v146_v41 = vmul.f32 %v375_v27, %v76_v26  ;;  %v211_v46 = vadd.f32 %v411_v45, %v141_v36  ;;  %v212_v47 = vadd.f32 %v411_v45, %v142_v37  ;;  %v97_v30 = vld [vmem:[%s942_s0 + $0x180] sm:$0xff]  ;;  %v99_v36 = vld [vmem:[%s942_s0 + $0x190] sm:$0xff] }
  0x33   :  { %274 = vst.msk [vmem:[%s944_s4 + $0xa0] sm:$0xff] %vm253_vm0, %v209_v34  ;;  %275 = vst.msk [vmem:[%s944_s4 + $0xa8] sm:$0xff] %vm253_vm0, %v210_v35  ;;  %v147_v48 = vmul.f32 %v375_v27, %v77_v32  ;;  %v148_v49 = vmul.f32 %v375_v27, %v78_v33  ;;  %v213_v53 = vadd.f32 %v411_v45, %v143_v38  ;;  %v98_v35 = vld [vmem:[%s942_s0 + $0x188] sm:$0xff]  ;;  %v100_v37 = vld [vmem:[%s942_s0 + $0x198] sm:$0xff] }
  0x34   :  { %v214_v54 = vadd.f32 %v411_v45, %v144_v39  ;;  %v215_v55 = vadd.f32 %v411_v45, %v145_v40  ;;  %v216_v56 = vadd.f32 %v411_v45, %v146_v41  ;;  %276 = vst.msk [vmem:[%s944_s4 + $0xb0] sm:$0xff] %vm253_vm0, %v211_v46  ;;  %277 = vst.msk [vmem:[%s944_s4 + $0xb8] sm:$0xff] %vm253_vm0, %v212_v47 }
  0x35   :  { %v217_v59 = vadd.f32 %v411_v45, %v147_v48  ;;  %v218_v60 = vadd.f32 %v411_v45, %v148_v49  ;;  %v149_v61 = vmul.f32 %v375_v27, %v79_v42  ;;  %v150_v62 = vmul.f32 %v375_v27, %v80_v43  ;;  %278 = vst.msk [vmem:[%s944_s4 + $0xc0] sm:$0xff] %vm253_vm0, %v213_v53  ;;  %v101_v42 = vld [vmem:[%s942_s0 + $0x1a0] sm:$0xff]  ;;  %v102_v43 = vld [vmem:[%s942_s0 + $0x1a8] sm:$0xff]  ;;  %v103_v53 = vld [vmem:[%s942_s0 + $0x1b0] sm:$0xff] }
  0x36   :  { %279 = vst.msk [vmem:[%s944_s4 + $0xc8] sm:$0xff] %vm253_vm0, %v214_v54  ;;  %280 = vst.msk [vmem:[%s944_s4 + $0xd0] sm:$0xff] %vm253_vm0, %v215_v55  ;;  %v151_v63 = vmul.f32 %v375_v27, %v81_v44  ;;  %v152_v0 = vmul.f32 %v375_v27, %v82_v50  ;;  %v153_v1 = vmul.f32 %v375_v27, %v83_v51  ;;  %v104_v54 = vld [vmem:[%s942_s0 + $0x1b8] sm:$0xff]  ;;  %v105_v55 = vld [vmem:[%s942_s0 + $0x1c0] sm:$0xff] }
  0x37   :  { %281 = vst.msk [vmem:[%s944_s4 + $0xd8] sm:$0xff] %vm253_vm0, %v216_v56  ;;  %v154_v2 = vmul.f32 %v375_v27, %v84_v52  ;;  %282 = vst.msk [vmem:[%s944_s4 + $0xe0] sm:$0xff] %vm253_vm0, %v217_v59  ;;  %v219_v6 = vadd.f32 %v411_v45, %v149_v61  ;;  %v220_v7 = vadd.f32 %v411_v45, %v150_v62  ;;  %v107_v61 = vld [vmem:[%s942_s0 + $0x1d0] sm:$0xff]  ;;  %v108_v62 = vld [vmem:[%s942_s0 + $0x1d8] sm:$0xff] }
  0x38   :  { %283 = vst.msk [vmem:[%s944_s4 + $0xe8] sm:$0xff] %vm253_vm0, %v218_v60  ;;  %v155_v8 = vmul.f32 %v375_v27, %v85_v57  ;;  %v156_v9 = vmul.f32 %v375_v27, %v86_v58  ;;  %v221_v13 = vadd.f32 %v411_v45, %v151_v63  ;;  %v222_v14 = vadd.f32 %v411_v45, %v152_v0  ;;  %v106_v60 = vld [vmem:[%s942_s0 + $0x1c8] sm:$0xff] }
  0x39   :  { %v223_v15 = vadd.f32 %v411_v45, %v153_v1  ;;  %v224_v16 = vadd.f32 %v411_v45, %v154_v2  ;;  %284 = vst.msk [vmem:[%s944_s4 + $0xf0] sm:$0xff] %vm253_vm0, %v219_v6  ;;  %285 = vst.msk [vmem:[%s944_s4 + $0xf8] sm:$0xff] %vm253_vm0, %v220_v7  ;;  %v157_v21 = vmul.f32 %v375_v27, %v87_v3  ;;  %v109_v3 = vld [vmem:[%s942_s0 + $0x1e0] sm:$0xff] }
  0x3a   :  { %v225_v19 = vadd.f32 %v411_v45, %v155_v8  ;;  %v226_v20 = vadd.f32 %v411_v45, %v156_v9  ;;  %v158_v22 = vmul.f32 %v375_v27, %v88_v4  ;;  %286 = vst.msk [vmem:[%s944_s4 + $0x100] sm:$0xff] %vm253_vm0, %v221_v13  ;;  %287 = vst.msk [vmem:[%s944_s4 + $0x108] sm:$0xff] %vm253_vm0, %v222_v14  ;;  %v110_v4 = vld [vmem:[%s942_s0 + $0x1e8] sm:$0xff]  ;;  %v111_v13 = vld [vmem:[%s942_s0 + $0x1f0] sm:$0xff] }
  0x3b   :  { %288 = vst.msk [vmem:[%s944_s4 + $0x110] sm:$0xff] %vm253_vm0, %v223_v15  ;;  %289 = vst.msk [vmem:[%s944_s4 + $0x118] sm:$0xff] %vm253_vm0, %v224_v16  ;;  %v159_v23 = vmul.f32 %v375_v27, %v89_v5  ;;  %v160_v24 = vmul.f32 %v375_v27, %v90_v10  ;;  %v161_v25 = vmul.f32 %v375_v27, %v91_v11  ;;  %v112_v14 = vld [vmem:[%s942_s0 + $0x1f8] sm:$0xff] }
  0x3c   :  { %v162_v26 = vmul.f32 %v375_v27, %v92_v12  ;;  %290 = vst.msk [vmem:[%s944_s4 + $0x120] sm:$0xff] %vm253_vm0, %v225_v19  ;;  %291 = vst.msk [vmem:[%s944_s4 + $0x128] sm:$0xff] %vm253_vm0, %v226_v20  ;;  %v227_v31 = vadd.f32 %v411_v45, %v157_v21  ;;  %v228_v32 = vadd.f32 %v411_v45, %v158_v22 }
  0x3d   :  { %v163_v33 = vmul.f32 %v375_v27, %v93_v17  ;;  %v164_v34 = vmul.f32 %v375_v27, %v94_v18  ;;  %v229_v38 = vadd.f32 %v411_v45, %v159_v23  ;;  %v230_v39 = vadd.f32 %v411_v45, %v160_v24 }
  0x3e   :  { %v231_v40 = vadd.f32 %v411_v45, %v161_v25  ;;  %v232_v41 = vadd.f32 %v411_v45, %v162_v26  ;;  %292 = vst.msk [vmem:[%s944_s4 + $0x130] sm:$0xff] %vm253_vm0, %v227_v31  ;;  %293 = vst.msk [vmem:[%s944_s4 + $0x138] sm:$0xff] %vm253_vm0, %v228_v32  ;;  %v165_v47 = vmul.f32 %v375_v27, %v95_v28 }
  0x3f   :  { %v233_v44 = vadd.f32 %v411_v45, %v163_v33  ;;  %v234_v46 = vadd.f32 %v411_v45, %v164_v34  ;;  %v166_v48 = vmul.f32 %v375_v27, %v96_v29  ;;  %294 = vst.msk [vmem:[%s944_s4 + $0x140] sm:$0xff] %vm253_vm0, %v229_v38  ;;  %295 = vst.msk [vmem:[%s944_s4 + $0x148] sm:$0xff] %vm253_vm0, %v230_v39 }
  0x40   :  { %296 = vst.msk [vmem:[%s944_s4 + $0x150] sm:$0xff] %vm253_vm0, %v231_v40  ;;  %297 = vst.msk [vmem:[%s944_s4 + $0x158] sm:$0xff] %vm253_vm0, %v232_v41  ;;  %v167_v49 = vmul.f32 %v375_v27, %v97_v30  ;;  %v168_v50 = vmul.f32 %v375_v27, %v98_v35  ;;  %v169_v51 = vmul.f32 %v375_v27, %v99_v36 }
  0x41   :  { %v170_v52 = vmul.f32 %v375_v27, %v100_v37  ;;  %298 = vst.msk [vmem:[%s944_s4 + $0x160] sm:$0xff] %vm253_vm0, %v233_v44  ;;  %299 = vst.msk [vmem:[%s944_s4 + $0x168] sm:$0xff] %vm253_vm0, %v234_v46  ;;  %v235_v56 = vadd.f32 %v411_v45, %v165_v47  ;;  %v236_v57 = vadd.f32 %v411_v45, %v166_v48 }
  0x42   :  { %v171_v58 = vmul.f32 %v375_v27, %v101_v42  ;;  %v172_v59 = vmul.f32 %v375_v27, %v102_v43  ;;  %v237_v63 = vadd.f32 %v411_v45, %v167_v49  ;;  %v238_v0 = vadd.f32 %v411_v45, %v168_v50 }
  0x43   :  { %v239_v1 = vadd.f32 %v411_v45, %v169_v51  ;;  %v240_v2 = vadd.f32 %v411_v45, %v170_v52  ;;  %300 = vst.msk [vmem:[%s944_s4 + $0x170] sm:$0xff] %vm253_vm0, %v235_v56  ;;  %301 = vst.msk [vmem:[%s944_s4 + $0x178] sm:$0xff] %vm253_vm0, %v236_v57  ;;  %v173_v7 = vmul.f32 %v375_v27, %v103_v53 }
  0x44   :  { %v241_v5 = vadd.f32 %v411_v45, %v171_v58  ;;  %v242_v6 = vadd.f32 %v411_v45, %v172_v59  ;;  %v174_v8 = vmul.f32 %v375_v27, %v104_v54  ;;  %302 = vst.msk [vmem:[%s944_s4 + $0x180] sm:$0xff] %vm253_vm0, %v237_v63  ;;  %303 = vst.msk [vmem:[%s944_s4 + $0x188] sm:$0xff] %vm253_vm0, %v238_v0 }
  0x45   :  { %304 = vst.msk [vmem:[%s944_s4 + $0x190] sm:$0xff] %vm253_vm0, %v239_v1  ;;  %305 = vst.msk [vmem:[%s944_s4 + $0x198] sm:$0xff] %vm253_vm0, %v240_v2  ;;  %v175_v9 = vmul.f32 %v375_v27, %v105_v55  ;;  %v176_v10 = vmul.f32 %v375_v27, %v106_v60  ;;  %v177_v11 = vmul.f32 %v375_v27, %v107_v61 }
  0x46   :  { %v178_v12 = vmul.f32 %v375_v27, %v108_v62  ;;  %306 = vst.msk [vmem:[%s944_s4 + $0x1a0] sm:$0xff] %vm253_vm0, %v241_v5  ;;  %307 = vst.msk [vmem:[%s944_s4 + $0x1a8] sm:$0xff] %vm253_vm0, %v242_v6  ;;  %v243_v15 = vadd.f32 %v411_v45, %v173_v7  ;;  %v244_v16 = vadd.f32 %v411_v45, %v174_v8 }
  0x47   :  { %v179_v17 = vmul.f32 %v375_v27, %v109_v3  ;;  %v180_v18 = vmul.f32 %v375_v27, %v110_v4  ;;  %v245_v19 = vadd.f32 %v411_v45, %v175_v9  ;;  %v246_v20 = vadd.f32 %v411_v45, %v176_v10 }
  0x48   :  { %v247_v21 = vadd.f32 %v411_v45, %v177_v11  ;;  %v248_v22 = vadd.f32 %v411_v45, %v178_v12  ;;  %308 = vst.msk [vmem:[%s944_s4 + $0x1b0] sm:$0xff] %vm253_vm0, %v243_v15  ;;  %309 = vst.msk [vmem:[%s944_s4 + $0x1b8] sm:$0xff] %vm253_vm0, %v244_v16  ;;  %v181_v25 = vmul.f32 %v375_v27, %v111_v13 }
  0x49   :  { %v249_v23 = vadd.f32 %v411_v45, %v179_v17  ;;  %v250_v24 = vadd.f32 %v411_v45, %v180_v18  ;;  %v182_v26 = vmul.f32 %v375_v27, %v112_v14  ;;  %310 = vst.msk [vmem:[%s944_s4 + $0x1c0] sm:$0xff] %vm253_vm0, %v245_v19  ;;  %311 = vst.msk [vmem:[%s944_s4 + $0x1c8] sm:$0xff] %vm253_vm0, %v246_v20 }
  0x4a   :  { %312 = vst.msk [vmem:[%s944_s4 + $0x1d0] sm:$0xff] %vm253_vm0, %v247_v21  ;;  %313 = vst.msk [vmem:[%s944_s4 + $0x1d8] sm:$0xff] %vm253_vm0, %v248_v22  ;;  %v251_v27 = vadd.f32 %v411_v45, %v181_v25 }
  0x4b   :  { %314 = vst.msk [vmem:[%s944_s4 + $0x1e0] sm:$0xff] %vm253_vm0, %v249_v23  ;;  %315 = vst.msk [vmem:[%s944_s4 + $0x1e8] sm:$0xff] %vm253_vm0, %v250_v24  ;;  %v252_v28 = vadd.f32 %v411_v45, %v182_v26 }
  0x4c   :  { %316 = vst.msk [vmem:[%s944_s4 + $0x1f0] sm:$0xff] %vm253_vm0, %v251_v27 }
  0x4d   :  { %317 = vst.msk [vmem:[%s944_s4 + $0x1f8] sm:$0xff] %vm253_vm0, %v252_v28 }

// kernel: _lambda_.47
= control target key start
LH: loop header
LB: loop body
LE: loop exit
PB: predicated region body
PF: predicated region fallthrough
CT: control target
= control target key end

     0   :  { %s1416_s12 = smov 0   ;;  %s1418_s13 = smov 0   ;;  %s1625_s0 = inlined_call_operand.vmem [shape: bf16[4,512,128], index: 0, kind: input, shape index: {}]   ;;  %s1626_s1 = inlined_call_operand.vmem [shape: bf16[4,128,128], index: 1, kind: input, shape index: {}]   ;;  %s1627_s2 = inlined_call_operand.vmem [shape: f32[4,1,128], index: 2, kind: input, shape index: {}]   ;;  %s1628_s3 = inlined_call_operand.vmem [shape: f32[4,512,128], index: 3, kind: output, shape index: {}]  }
   0x1   :  { %s1420_s14 = smov 0   ;;  %s1422_s15 = smov 0  }
   0x2   :  { %s1424_s16 = smov 0  }
   0x3 LB: > { %s35_s17 = sadd.s32 1, %s1385_s14  ;;  %s39_s18 = sadd.s32 1, %s1389_s15  ;;  %s1393_s16 = sphi %s1424_s16, %s13_s16   ;;  %s1389_s15 = sphi %s1422_s15, %s1632_s15   ;;  %s1385_s14 = sphi %s1420_s14, %s1631_s14   ;;  %s1381_s13 = sphi %s1418_s13, %s1630_s13   ;;  %s1377_s12 = sphi %s1416_s12, %s1629_s12  }
   0x4   : > { %p37_p0 = scmp.ge.s32.totalorder %s35_s17, 2  ;;  %p1117_p1 = scmp.ge.s32.totalorder %s1393_s16, 1 }
   0x5   : > { %p214_p2 = scmp.lt.s32.totalorder %s1393_s16, 9 }
   0x6   : > { %s1634_s17 = smov (%p37_p0, %s35_s17), 0  ;;  %s1636_s18 = smov (!%p37_p0, %s39_s18), %s1389_s15 }
   0x7   : > { %p215_p3 = pnand %p1117_p1, %p214_p2  ;;  %p41_p4 = scmp.ge.s32.totalorder %s1636_s18, 4 }
   0x8   : > { %s1118_s19 = sshll.u32 (!%p215_p3), %s1377_s12, 5  ;;  %p271_p5 = scmp.lt.s32.totalorder (!%p215_p3), %s1381_s13, 3  ;;  %v1395_v6 = vmov (!%p215_p3), 0  }
   0x9   : > { %s1638_s18 = smov (%p41_p4, %s1636_s18), 0  ;;  %218 = sbr.rel (%p215_p3) target bundleno = 312 (0x138), region = 32 }
   0xa   : > { %p273_p6 = scmp.lt.s32.totalorder (!%p215_p3), %s1118_s19, 63 }
  0x10   : > { %s1640_s13 = smov (!%p271_p5, %s1381_s13), 3  ;;  %s1642_s19 = smov (!%p273_p6, %s1118_s19), 63 }
  0x11   : > { %s1119_s20 = sshll.u32 %s1640_s13, 6  ;;  %s301_s4 = scalar_lea.vmem %s1627_s2, %s1640_s13 }
  0x12   : > { %s1449_s21 = sadd.s32 %s1119_s20, %s1642_s19  ;;  %s1454_s24 = scalar_lea.vmem %s1626_s1, %s1119_s20 }
  0x13   : > { %v1283_v0 = vld [vmem:[%s1454_s24] sm:$0xff]   ;;  %s1120_s25 = sshll.u32 %s1449_s21, 2  ;;  %v1284_v1 = vld [vmem:[%s1454_s24 + $0x8] sm:$0xff]   ;;  %v1285_v2 = vld [vmem:[%s1454_s24 + $0x10] sm:$0xff]   ;;  %s1125_s5 = sshll.u32 %s1449_s21, 3 }
  0x14   : > { %1178 = vmatprep.subr.bf16.mxu0 %v1283_v0  ;;  %1226 = vmatprep.subr.bf16.mxu1 %v1283_v0  ;;  %s1462_s28 = scalar_lea.vmem %s1625_s0, %s1120_s25  ;;  %v1286_v5 = vld [vmem:[%s1454_s24 + $0x18] sm:$0xff]   ;;  %v1287_v15 = vld [vmem:[%s1454_s24 + $0x20] sm:$0xff]   ;;  %v1288_v16 = vld [vmem:[%s1454_s24 + $0x28] sm:$0xff]   ;;  %s1556_s8 = scalar_lea.vmem %s1628_s3, %s1125_s5 }
  0x15   : > { %1179 = vmatpush3.bf16.msra.mxu0 %v1283_v0  ;;  %1234 = vmatpush3.bf16.msra.mxu1 %v1283_v0  ;;  %v352_v3 = vld [vmem:[%s1462_s28] sm:$0xf]  ;;  %v353_v4 = vld [vmem:[%s1462_s28 + $0x4] sm:$0xf]  ;;  %v1289_v17 = vld [vmem:[%s1454_s24 + $0x30] sm:$0xff]  }
  0x16   : > { %1180 = vmatprep.subr.bf16.mxu0 %v1284_v1  ;;  %1227 = vmatprep.subr.bf16.mxu1 %v1284_v1  ;;  %v384_v7 = vmax.bf16 %v1395_v6, %v352_v3  ;;  %v385_v8 = vmax.bf16 %v1395_v6, %v353_v4  ;;  %v368_v9 = vld [vmem:[%s1462_s28 + $0x40] sm:$0xf]  ;;  %v369_v10 = vld [vmem:[%s1462_s28 + $0x44] sm:$0xf]  ;;  %v1290_v18 = vld [vmem:[%s1454_s24 + $0x38] sm:$0xff]  }
  0x17   : > { %v400_v11 = vmax.bf16 %v1395_v6, %v368_v9  ;;  %v401_v12 = vmax.bf16 %v1395_v6, %v369_v10  ;;  %v354_v19 = vld [vmem:[%s1462_s28 + $0x8] sm:$0xf]  ;;  %v355_v20 = vld [vmem:[%s1462_s28 + $0xc] sm:$0xf]  ;;  %v356_v23 = vld [vmem:[%s1462_s28 + $0x10] sm:$0xf] }
  0x18   : > { %v1126_v13 = vcombine.low %v384_v7, %v385_v8  ;;  %v370_v21 = vld [vmem:[%s1462_s28 + $0x48] sm:$0xf]  ;;  %v371_v22 = vld [vmem:[%s1462_s28 + $0x4c] sm:$0xf]  ;;  %v357_v24 = vld [vmem:[%s1462_s28 + $0x14] sm:$0xf]  ;;  %v386_v27 = vmax.bf16 %v1395_v6, %v354_v19  ;;  %v387_v28 = vmax.bf16 %v1395_v6, %v355_v20  ;;  %v388_v31 = vmax.bf16 %v1395_v6, %v356_v23 }
  0x19   : > { %1181 = vmatpush3.bf16.msra.mxu0 %v1284_v1  ;;  %1235 = vmatpush3.bf16.msra.mxu1 %v1284_v1  ;;  %v1134_v14 = vcombine.low %v400_v11, %v401_v12  ;;  %v372_v25 = vld [vmem:[%s1462_s28 + $0x50] sm:$0xf]  ;;  %v373_v26 = vld [vmem:[%s1462_s28 + $0x54] sm:$0xf]  ;;  %v402_v29 = vmax.bf16 %v1395_v6, %v370_v21  ;;  %v403_v30 = vmax.bf16 %v1395_v6, %v371_v22  ;;  %v358_v37 = vld [vmem:[%s1462_s28 + $0x18] sm:$0xf] }
  0x1a   : > { %1182 = vmatprep.subr.bf16.mxu0 %v1285_v2  ;;  %1228 = vmatprep.subr.bf16.mxu1 %v1285_v2  ;;  %v389_v32 = vmax.bf16 %v1395_v6, %v357_v24  ;;  %v404_v33 = vmax.bf16 %v1395_v6, %v372_v25  ;;  %v405_v34 = vmax.bf16 %v1395_v6, %v373_v26  ;;  %v359_v38 = vld [vmem:[%s1462_s28 + $0x1c] sm:$0xf]  ;;  %v374_v41 = vld [vmem:[%s1462_s28 + $0x58] sm:$0xf]  ;;  %v360_v43 = vld [vmem:[%s1462_s28 + $0x20] sm:$0xf] }
  0x1b   : > { %1194 = vmatprep.mubr.bf16.mxu0 %v1126_v13  ;;  %1210 = vmatprep.mubr.bf16.mxu1 %v1134_v14  ;;  %v1127_v35 = vcombine.low %v386_v27, %v387_v28  ;;  %v1135_v36 = vcombine.low %v402_v29, %v403_v30  ;;  %v375_v42 = vld [vmem:[%s1462_s28 + $0x5c] sm:$0xf]  ;;  %v361_v44 = vld [vmem:[%s1462_s28 + $0x24] sm:$0xf]  ;;  %v376_v45 = vld [vmem:[%s1462_s28 + $0x60] sm:$0xf]  ;;  %v390_v47 = vmax.bf16 %v1395_v6, %v358_v37 }
  0x1c   : > { %v1128_v39 = vcombine.low %v388_v31, %v389_v32  ;;  %v1136_v40 = vcombine.low %v404_v33, %v405_v34  ;;  %v377_v46 = vld [vmem:[%s1462_s28 + $0x64] sm:$0xf]  ;;  %v391_v48 = vmax.bf16 %v1395_v6, %v359_v38  ;;  %v406_v49 = vmax.bf16 %v1395_v6, %v374_v41  ;;  %v362_v57 = vld [vmem:[%s1462_s28 + $0x28] sm:$0xf]  ;;  %v363_v58 = vld [vmem:[%s1462_s28 + $0x2c] sm:$0xf] }
  0x1d   : > { %1183 = vmatpush3.bf16.msra.mxu0 %v1285_v2  ;;  %1236 = vmatpush3.bf16.msra.mxu1 %v1285_v2  ;;  %v407_v50 = vmax.bf16 %v1395_v6, %v375_v42  ;;  %v392_v51 = vmax.bf16 %v1395_v6, %v360_v43  ;;  %v393_v52 = vmax.bf16 %v1395_v6, %v361_v44  ;;  %v378_v61 = vld [vmem:[%s1462_s28 + $0x68] sm:$0xf]  ;;  %v379_v62 = vld [vmem:[%s1462_s28 + $0x6c] sm:$0xf]  ;;  %v364_v63 = vld [vmem:[%s1462_s28 + $0x30] sm:$0xf] }
  0x1e   : > { %1184 = vmatprep.subr.bf16.mxu0 %v1286_v5  ;;  %1229 = vmatprep.subr.bf16.mxu1 %v1286_v5  ;;  %v408_v53 = vmax.bf16 %v1395_v6, %v376_v45  ;;  %v409_v54 = vmax.bf16 %v1395_v6, %v377_v46  ;;  %v1129_v55 = vcombine.low %v390_v47, %v391_v48  ;;  %v365_v0 = vld [vmem:[%s1462_s28 + $0x34] sm:$0xf]  ;;  %v380_v1 = vld [vmem:[%s1462_s28 + $0x70] sm:$0xf]  ;;  %v366_v14 = vld [vmem:[%s1462_s28 + $0x38] sm:$0xf] }
  0x1f   : > { %v1137_v56 = vcombine.low %v406_v49, %v407_v50  ;;  %v1130_v59 = vcombine.low %v392_v51, %v393_v52  ;;  %v381_v2 = vld [vmem:[%s1462_s28 + $0x74] sm:$0xf]  ;;  %v394_v3 = vmax.bf16 %v1395_v6, %v362_v57  ;;  %v395_v4 = vmax.bf16 %v1395_v6, %v363_v58  ;;  %v383_v19 = vld [vmem:[%s1462_s28 + $0x7c] sm:$0xf]  ;;  %v1538_v26 = vld [vmem:[%s301_s4] ss:$0 sm:$0xff] }
  0x20   : > { %v1138_v60 = vcombine.low %v408_v53, %v409_v54  ;;  %v411_v7 = vmax.bf16 %v1395_v6, %v379_v62  ;;  %v396_v8 = vmax.bf16 %v1395_v6, %v364_v63  ;;  %v397_v9 = vmax.bf16 %v1395_v6, %v365_v0 }
  0x21   : > { %1185 = vmatpush3.bf16.msra.mxu0 %v1286_v5  ;;  %1237 = vmatpush3.bf16.msra.mxu1 %v1286_v5  ;;  %v410_v5 = vmax.bf16 %v1395_v6, %v378_v61  ;;  %v412_v10 = vmax.bf16 %v1395_v6, %v380_v1  ;;  %v413_v11 = vmax.bf16 %v1395_v6, %v381_v2 }
  0x22   : > { %1186 = vmatprep.subr.bf16.mxu0 %v1287_v15  ;;  %1230 = vmatprep.subr.bf16.mxu1 %v1287_v15  ;;  %v1131_v12 = vcombine.low %v394_v3, %v395_v4  ;;  %v398_v20 = vmax.bf16 %v1395_v6, %v366_v14  ;;  %v415_v23 = vmax.bf16 %v1395_v6, %v383_v19 }
  0x23   : > { %v1139_v13 = vcombine.low %v410_v5, %v411_v7 }
  0x25   : > { %1187 = vmatpush3.bf16.msra.mxu0 %v1287_v15  ;;  %1238 = vmatpush3.bf16.msra.mxu1 %v1287_v15  ;;  %v1132_v15 = vcombine.low %v396_v8, %v397_v9 }
  0x26   : > { %1188 = vmatprep.subr.bf16.mxu0 %v1288_v16  ;;  %1231 = vmatprep.subr.bf16.mxu1 %v1288_v16 }
  0x29   : > { %1189 = vmatpush3.bf16.msra.mxu0 %v1288_v16  ;;  %1239 = vmatpush3.bf16.msra.mxu1 %v1288_v16  ;;  %v1140_v16 = vcombine.low %v412_v10, %v413_v11 }
  0x2a   : > { %1190 = vmatprep.subr.bf16.mxu0 %v1289_v17  ;;  %1232 = vmatprep.subr.bf16.mxu1 %v1289_v17 }
  0x2d   : > { %1191 = vmatpush3.bf16.msra.mxu0 %v1289_v17  ;;  %1240 = vmatpush3.bf16.msra.mxu1 %v1289_v17  ;;  %v367_v17 = vld [vmem:[%s1462_s28 + $0x3c] sm:$0xf] }
  0x2e   : > { %1192 = vmatprep.subr.bf16.mxu0 %v1290_v18  ;;  %1233 = vmatprep.subr.bf16.mxu1 %v1290_v18  ;;  %v399_v21 = vmax.bf16 %v1395_v6, %v367_v17 }
  0x30   : > { %v1133_v24 = vcombine.low %v398_v20, %v399_v21 }
  0x31   : > { %1193 = vmatpush3.bf16.msra.mxu0 %v1290_v18  ;;  %1241 = vmatpush3.bf16.msra.mxu1 %v1290_v18  ;;  %v382_v18 = vld [vmem:[%s1462_s28 + $0x78] sm:$0xf] }
  0x32   : > { %v414_v22 = vmax.bf16 %v1395_v6, %v382_v18 }
  0x34   : > { %1195 = vmatmul.mubr.bf16.vlgmr.msra.gmra.mrb[0].mxu0 %v1127_v35  ;;  %1211 = vmatmul.mubr.bf16.vlgmr.msra.gmra.mrb[0].mxu1 %v1135_v36  ;;  %v1141_v25 = vcombine.low %v414_v22, %v415_v23 }
  0x35   : > { %1198 = vmatprep.mubr.bf16.mxu0 %v1128_v39  ;;  %1214 = vmatprep.mubr.bf16.mxu1 %v1136_v40 }
  0x3c   : > { %1199 = vmatmul.mubr.bf16.gmra.mrb[4].mxu0 %v1129_v55  ;;  %1215 = vmatmul.mubr.bf16.gmra.mrb[4].mxu1 %v1137_v56 }
  0x3d   : > { %1202 = vmatprep.mubr.bf16.mxu0 %v1130_v59  ;;  %1218 = vmatprep.mubr.bf16.mxu1 %v1138_v60 }
  0x44   : > { %1203 = vmatmul.mubr.bf16.gmra.mrb[8].mxu0 %v1131_v12  ;;  %1219 = vmatmul.mubr.bf16.gmra.mrb[8].mxu1 %v1139_v13 }
  0x45   : > { %1206 = vmatprep.mubr.bf16.mxu0 %v1132_v15  ;;  %1222 = vmatprep.mubr.bf16.mxu1 %v1140_v16 }
  0x4c   : > { %1207 = vmatmul.mubr.bf16.gmra.mrb[12].mxu0 %v1133_v24  ;;  %1223 = vmatmul.mubr.bf16.gmra.mrb[12].mxu1 %v1141_v25 }
 0x107   : > { %v1196_v27 = vpop.f32.mrb[0].mxu0  ;;  %v1212_v28 = vpop.f32.mrb[0].mxu1 }
 0x108   : > { %v877_v29 = vadd.f32 %v1196_v27, %v1538_v26  ;;  %v893_v30 = vadd.f32 %v1212_v28, %v1538_v26  ;;  %v642_v31 = vpop.f32.mrb[1].mxu0  ;;  %v706_v6 = vpop.f32.mrb[1].mxu1 }
 0x109   : > { %v875_v32 = vadd.f32 %v1538_v26, %v642_v31  ;;  %v891_v33 = vadd.f32 %v1538_v26, %v706_v6  ;;  %v1197_v34 = vpop.f32.mrb[2].mxu0  ;;  %v1213_v35 = vpop.f32.mrb[2].mxu1 }
 0x10a   : > { %1291 = vtanh.f32 %v877_v29  ;;  %v878_v36 = vadd.f32 %v1197_v34, %v1538_v26  ;;  %v894_v37 = vadd.f32 %v1213_v35, %v1538_v26  ;;  %v645_v38 = vpop.f32.mrb[3].mxu0  ;;  %v709_v39 = vpop.f32.mrb[3].mxu1 }
 0x10b   : > { %1293 = vtanh.f32 %v893_v30  ;;  %v876_v40 = vadd.f32 %v1538_v26, %v645_v38  ;;  %v892_v41 = vadd.f32 %v1538_v26, %v709_v39 }
 0x10c   : > { %1295 = vtanh.f32 %v875_v32 }
 0x10d   : > { %1297 = vtanh.f32 %v891_v33 }
 0x10e   : > { %1299 = vtanh.f32 %v878_v36 }
 0x10f   : > { %1301 = vtanh.f32 %v894_v37  ;;  %v1200_v42 = vpop.f32.mrb[4].mxu0  ;;  %v1216_v43 = vpop.f32.mrb[4].mxu1 }
 0x110   : > { %1303 = vtanh.f32 %v876_v40  ;;  %v881_v44 = vadd.f32 %v1200_v42, %v1538_v26  ;;  %v897_v45 = vadd.f32 %v1216_v43, %v1538_v26  ;;  %v658_v46 = vpop.f32.mrb[5].mxu0  ;;  %v722_v47 = vpop.f32.mrb[5].mxu1 }
 0x111   : > { %1305 = vtanh.f32 %v892_v41  ;;  %v879_v48 = vadd.f32 %v1538_v26, %v658_v46  ;;  %v895_v49 = vadd.f32 %v1538_v26, %v722_v47  ;;  %v1201_v50 = vpop.f32.mrb[6].mxu0  ;;  %v1217_v51 = vpop.f32.mrb[6].mxu1 }
 0x112   : > { %1307 = vtanh.f32 %v881_v44  ;;  %v882_v52 = vadd.f32 %v1201_v50, %v1538_v26  ;;  %v898_v53 = vadd.f32 %v1217_v51, %v1538_v26  ;;  %v661_v54 = vpop.f32.mrb[7].mxu0  ;;  %v725_v55 = vpop.f32.mrb[7].mxu1 }
 0x113   : > { %1309 = vtanh.f32 %v897_v45  ;;  %v880_v56 = vadd.f32 %v1538_v26, %v661_v54  ;;  %v896_v57 = vadd.f32 %v1538_v26, %v725_v55 }
 0x114   : > { %v1292_v58 = vpop.eup %1291  ;;  %1311 = vtanh.f32 %v879_v48 }
 0x115   : > { %v1294_v59 = vpop.eup %1293  ;;  %941 = vst [vmem:[%s1556_s8 + $0x10] sm:$0xff] %v1292_v58  ;;  %1313 = vtanh.f32 %v895_v49 }
 0x116   : > { %v1296_v60 = vpop.eup %1295  ;;  %957 = vst [vmem:[%s1556_s8 + $0x90] sm:$0xff] %v1294_v59  ;;  %1315 = vtanh.f32 %v882_v52 }
 0x117   : > { %v1298_v61 = vpop.eup %1297  ;;  %939 = vst [vmem:[%s1556_s8] sm:$0xff] %v1296_v60  ;;  %1317 = vtanh.f32 %v898_v53  ;;  %v1204_v62 = vpop.f32.mrb[8].mxu0 }
 0x118   : > { %v1220_v63 = vpop.f32.mrb[8].mxu1  ;;  %v1300_v0 = vpop.eup %1299  ;;  %955 = vst [vmem:[%s1556_s8 + $0x80] sm:$0xff] %v1298_v61  ;;  %1319 = vtanh.f32 %v880_v56  ;;  %v885_v1 = vadd.f32 %v1204_v62, %v1538_v26 }
 0x119   : > { %v901_v2 = vadd.f32 %v1220_v63, %v1538_v26  ;;  %v674_v3 = vpop.f32.mrb[9].mxu0  ;;  %v738_v4 = vpop.f32.mrb[9].mxu1  ;;  %942 = vst [vmem:[%s1556_s8 + $0x18] sm:$0xff] %v1300_v0  ;;  %1321 = vtanh.f32 %v896_v57 }
 0x11a   : > { %v1302_v5 = vpop.eup %1301  ;;  %v883_v7 = vadd.f32 %v1538_v26, %v674_v3  ;;  %v899_v8 = vadd.f32 %v1538_v26, %v738_v4  ;;  %v1205_v9 = vpop.f32.mrb[10].mxu0  ;;  %1323 = vtanh.f32 %v885_v1 }
 0x11b   : > { %v1221_v10 = vpop.f32.mrb[10].mxu1  ;;  %v1304_v11 = vpop.eup %1303  ;;  %958 = vst [vmem:[%s1556_s8 + $0x98] sm:$0xff] %v1302_v5  ;;  %v886_v12 = vadd.f32 %v1205_v9, %v1538_v26  ;;  %1325 = vtanh.f32 %v901_v2 }
 0x11c   : > { %v902_v13 = vadd.f32 %v1221_v10, %v1538_v26  ;;  %v677_v14 = vpop.f32.mrb[11].mxu0  ;;  %v741_v15 = vpop.f32.mrb[11].mxu1  ;;  %940 = vst [vmem:[%s1556_s8 + $0x8] sm:$0xff] %v1304_v11  ;;  %1327 = vtanh.f32 %v883_v7 }
 0x11d   : > { %v1306_v16 = vpop.eup %1305  ;;  %v884_v17 = vadd.f32 %v1538_v26, %v677_v14  ;;  %v900_v18 = vadd.f32 %v1538_v26, %v741_v15  ;;  %1329 = vtanh.f32 %v899_v8 }
 0x11e   : > { %v1308_v19 = vpop.eup %1307  ;;  %956 = vst [vmem:[%s1556_s8 + $0x88] sm:$0xff] %v1306_v16  ;;  %1331 = vtanh.f32 %v886_v12 }
 0x11f   : > { %v1310_v20 = vpop.eup %1309  ;;  %945 = vst [vmem:[%s1556_s8 + $0x30] sm:$0xff] %v1308_v19  ;;  %1333 = vtanh.f32 %v902_v13  ;;  %v1208_v23 = vpop.f32.mrb[12].mxu0 }
 0x120   : > { %v1312_v21 = vpop.eup %1311  ;;  %961 = vst [vmem:[%s1556_s8 + $0xb0] sm:$0xff] %v1310_v20  ;;  %v1224_v24 = vpop.f32.mrb[12].mxu1  ;;  %1335 = vtanh.f32 %v884_v17  ;;  %v889_v27 = vadd.f32 %v1208_v23, %v1538_v26 }
 0x121   : > { %v1314_v22 = vpop.eup %1313  ;;  %943 = vst [vmem:[%s1556_s8 + $0x20] sm:$0xff] %v1312_v21  ;;  %v905_v28 = vadd.f32 %v1224_v24, %v1538_v26  ;;  %v690_v29 = vpop.f32.mrb[13].mxu0  ;;  %1337 = vtanh.f32 %v900_v18 }
 0x122   : > { %v1316_v25 = vpop.eup %1315  ;;  %959 = vst [vmem:[%s1556_s8 + $0xa0] sm:$0xff] %v1314_v22  ;;  %v754_v30 = vpop.f32.mrb[13].mxu1  ;;  %v887_v6 = vadd.f32 %v1538_v26, %v690_v29  ;;  %1339 = vtanh.f32 %v889_v27 }
 0x123   : > { %v1318_v31 = vpop.eup %1317  ;;  %946 = vst [vmem:[%s1556_s8 + $0x38] sm:$0xff] %v1316_v25  ;;  %v903_v32 = vadd.f32 %v1538_v26, %v754_v30  ;;  %v1209_v33 = vpop.f32.mrb[14].mxu0  ;;  %1341 = vtanh.f32 %v905_v28 }
 0x124   : > { %v1225_v34 = vpop.f32.mrb[14].mxu1  ;;  %v1320_v35 = vpop.eup %1319  ;;  %962 = vst [vmem:[%s1556_s8 + $0xb8] sm:$0xff] %v1318_v31  ;;  %v890_v36 = vadd.f32 %v1209_v33, %v1538_v26  ;;  %1343 = vtanh.f32 %v887_v6 }
 0x125   : > { %v906_v37 = vadd.f32 %v1225_v34, %v1538_v26  ;;  %v693_v38 = vpop.f32.mrb[15].mxu0  ;;  %v757_v39 = vpop.f32.mrb[15].mxu1  ;;  %944 = vst [vmem:[%s1556_s8 + $0x28] sm:$0xff] %v1320_v35  ;;  %1345 = vtanh.f32 %v903_v32 }
 0x126   : > { %v1322_v40 = vpop.eup %1321  ;;  %v888_v41 = vadd.f32 %v1538_v26, %v693_v38  ;;  %v904_v42 = vadd.f32 %v1538_v26, %v757_v39  ;;  %1347 = vtanh.f32 %v890_v36 }
 0x127   : > { %v1324_v43 = vpop.eup %1323  ;;  %960 = vst [vmem:[%s1556_s8 + $0xa8] sm:$0xff] %v1322_v40  ;;  %1349 = vtanh.f32 %v906_v37 }
 0x128   : > { %v1326_v44 = vpop.eup %1325  ;;  %949 = vst [vmem:[%s1556_s8 + $0x50] sm:$0xff] %v1324_v43  ;;  %1351 = vtanh.f32 %v888_v41 }
 0x129   : > { %v1328_v45 = vpop.eup %1327  ;;  %965 = vst [vmem:[%s1556_s8 + $0xd0] sm:$0xff] %v1326_v44  ;;  %1353 = vtanh.f32 %v904_v42 }
 0x12a   : > { %v1330_v46 = vpop.eup %1329  ;;  %947 = vst [vmem:[%s1556_s8 + $0x40] sm:$0xff] %v1328_v45 }
 0x12b   : > { %v1332_v47 = vpop.eup %1331  ;;  %963 = vst [vmem:[%s1556_s8 + $0xc0] sm:$0xff] %v1330_v46 }
 0x12c   : > { %v1334_v26 = vpop.eup %1333  ;;  %950 = vst [vmem:[%s1556_s8 + $0x58] sm:$0xff] %v1332_v47 }
 0x12d   : > { %v1336_v48 = vpop.eup %1335  ;;  %966 = vst [vmem:[%s1556_s8 + $0xd8] sm:$0xff] %v1334_v26 }
 0x12e   : > { %v1338_v49 = vpop.eup %1337  ;;  %948 = vst [vmem:[%s1556_s8 + $0x48] sm:$0xff] %v1336_v48 }
 0x12f   : > { %v1340_v50 = vpop.eup %1339  ;;  %964 = vst [vmem:[%s1556_s8 + $0xc8] sm:$0xff] %v1338_v49 }
 0x130   : > { %v1342_v51 = vpop.eup %1341  ;;  %953 = vst [vmem:[%s1556_s8 + $0x70] sm:$0xff] %v1340_v50 }
 0x131   : > { %v1344_v52 = vpop.eup %1343  ;;  %969 = vst [vmem:[%s1556_s8 + $0xf0] sm:$0xff] %v1342_v51 }
 0x132   : > { %v1346_v53 = vpop.eup %1345  ;;  %951 = vst [vmem:[%s1556_s8 + $0x60] sm:$0xff] %v1344_v52 }
 0x133   : > { %v1348_v54 = vpop.eup %1347  ;;  %967 = vst [vmem:[%s1556_s8 + $0xe0] sm:$0xff] %v1346_v53 }
 0x134   : > { %v1350_v55 = vpop.eup %1349  ;;  %954 = vst [vmem:[%s1556_s8 + $0x78] sm:$0xff] %v1348_v54 }
 0x135   : > { %v1352_v56 = vpop.eup %1351  ;;  %970 = vst [vmem:[%s1556_s8 + $0xf8] sm:$0xff] %v1350_v55 }
 0x136   : > { %v1354_v57 = vpop.eup %1353  ;;  %952 = vst [vmem:[%s1556_s8 + $0x68] sm:$0xff] %v1352_v56 }
 0x137   : > { %968 = vst [vmem:[%s1556_s8 + $0xe8] sm:$0xff] %v1354_v57 }
 0x138 PF: > { %s13_s16 = sadd.s32 1, %s1393_s16   ;;  %s1629_s12 = smov %s1385_s14 }
 0x139   : > { %p10_p7 = scmp.ge.s32.totalorder %s13_s16, 10   ;;  %s1630_s13 = smov %s1389_s15 }
 0x13a   : > { %s1631_s14 = smov %s1634_s17  ;;  %s1632_s15 = smov %s1638_s18 }
 0x13b   :  { %12 = sbr.rel (!%p10_p7) target bundleno = 3 (0x3), region = 76 }

</bundles_post_ra>
